<compile_context>
chip_gen: v6e
topology: v6e:2x2x1
jax: 0.10.0
libtpu: 0.0.40
codegen_flags: <defaults>
</compile_context>

<pallas_src>
import jax
import jax.numpy as jnp
from jax.experimental import pallas as pl
from jax.experimental.pallas import tpu as pltpu

# ----------------------------- config ---------------------------------------
B = 2          # batch
V = 50         # vocab size
E = 16         # embedding size
H = 32         # hidden size
A = 32         # attention dim
S_A = 8        # anchor max seq len
S_C = 6        # candidate max seq len
PAD_IDX = 0
H3 = 3 * H


# --------------------------- fused kernel ------------------------------------
def fused_kernel(anc_len_ref, cand_len_ref, anc_x_ref, cnd_x_ref,
                 anc_w_ih_ref, anc_w_hh_ref, anc_b_fold_ref, anc_b_hn_ref,
                 cand_w_ih_x_ref, cand_w_ih_c_ref, cand_w_cat_ref,
                 cand_b_fold_ref, cand_b_hn_ref,
                 wk_ref, v_ref,
                 anchor_emb_ref, cand_emb_ref,
                 anc_out_scr, xg_anc_scr, xg_cnd_scr):
    f32 = jnp.float32
    anc_len = anc_len_ref[...]               # (B, 1) int32
    cand_len = cand_len_ref[...]             # (B, 1) int32

    # ---- hoisted, t-invariant input projections for BOTH encoders ----
    # (the r/z thirds of b_hh are already folded into the bias by the wrapper)
    # Issued before the anchor recurrence so the scheduler can hide them in its
    # MXU bubbles.  Stored flat 2D, no reshape of the matmul result.
    xg_anc_scr[...] = (jnp.dot(anc_x_ref[...], anc_w_ih_ref[...],
                               preferred_element_type=f32) + anc_b_fold_ref[...])
    xg_cnd_scr[...] = (jnp.dot(cnd_x_ref[...], cand_w_ih_x_ref[...],
                               preferred_element_type=f32) + cand_b_fold_ref[...])

    anc_w_hh = anc_w_hh_ref[...]
    anc_hn_bias = jnp.broadcast_to(anc_b_hn_ref[...], (B, H))     # hoisted broadcast
    zero_bh = jnp.zeros((B, H), f32)

    # ================================ anchor GRU ==============================
    def anchor_step(t, carry):
        h, run_sum = carry
        start = pl.multiple_of(t * B, B)
        xg = xg_anc_scr[pl.ds(start, B), :]                        # (B, 3H)
        hg = jnp.dot(h, anc_w_hh, preferred_element_type=f32)      # (B, 3H), no bias
        r = jax.nn.sigmoid(xg[:, :H] + hg[:, :H])
        z = jax.nn.sigmoid(xg[:, H:2 * H] + hg[:, H:2 * H])
        n = jnp.tanh(xg[:, 2 * H:] + r * (hg[:, 2 * H:] + anc_hn_bias))
        h_new = (1.0 - z) * n + z * h
        valid = t < anc_len                                        # (B, 1) bool
        h_next = jnp.where(valid, h_new, h)                        # freeze past length
        out = jnp.where(valid, h_new, 0.0)                         # packed-seq zeros
        for b in range(B):                                         # batch-major store
            anc_out_scr[pl.ds(b * S_A + t, 1), :] = out[b:b + 1, :]
        return h_next, run_sum + out                               # in-loop mean-pool sum

    anc_hid, anc_sum = jax.lax.fori_loop(
        0, S_A, anchor_step, (zero_bh, zero_bh), unroll=True)

    # fixedSizeMethod='mean': padded steps contributed zero, so sum / length
    anchor_emb_ref[...] = anc_sum / anc_len.astype(f32)

    # ========================= candidate attention decoder ====================
    wk = wk_ref[...]
    v_row = v_ref[...]                                             # (1, A)
    w_cat = cand_w_cat_ref[...]                                    # (H, A+3H) = [Wq | W_hh]
    w_ih_c = cand_w_ih_c_ref[...]
    cand_hn_bias = jnp.broadcast_to(cand_b_hn_ref[...], (B, H))

    # loop-invariant per-batch anchor memories and attention keys
    # (contiguous, 8-row aligned slabs of the flat batch-major scratch)
    ao_list = [anc_out_scr[pl.ds(b * S_A, S_A), :] for b in range(B)]          # (S_A, H)
    k_list = [jnp.dot(ao, wk, preferred_element_type=f32) for ao in ao_list]   # (S_A, A)

    def cand_step(t, carry):
        h_prev, run_sum = carry
        # fused query + hidden-gate projection: single 128-lane MXU op on h_prev
        qhg = jnp.dot(h_prev, w_cat, preferred_element_type=f32)   # (B, A+3H)
        q = qhg[:, :A]
        hg = qhg[:, A:]

        # ---- Bahdanau additive attention, per batch row, 2D tensors only ----
        # TODO(synk): upstream attention module not provided; standard unmasked
        # additive attention over (zero-padded) anchor outputs assumed.
        ctx_rows = []
        for b in range(B):
            e = jnp.tanh(k_list[b] + q[b:b + 1, :])                # (S_A, A)  EUP
            s = jnp.sum(e * v_row, axis=-1, keepdims=True)         # (S_A, 1)  VPU+lane red.
            m = jnp.max(s, axis=0, keepdims=True)
            ex = jnp.exp(s - m)
            attn = ex * pl.reciprocal(jnp.sum(ex, axis=0, keepdims=True),
                                      approx=True)
            ctx_rows.append(jnp.sum(attn * ao_list[b], axis=0, keepdims=True))  # (1, H)
        context = jnp.concatenate(ctx_rows, axis=0)                # (B, H)

        # ---- GRU step on concat(embedding, context): split-weight form ----
        start = pl.multiple_of(t * B, B)
        xg = xg_cnd_scr[pl.ds(start, B), :] + jnp.dot(
            context, w_ih_c, preferred_element_type=f32)           # (B, 3H)
        r = jax.nn.sigmoid(xg[:, :H] + hg[:, :H])
        z = jax.nn.sigmoid(xg[:, H:2 * H] + hg[:, H:2 * H])
        n = jnp.tanh(xg[:, 2 * H:] + r * (hg[:, 2 * H:] + cand_hn_bias))
        h_new = (1.0 - z) * n + z * h_prev

        # mask = (candidateLength < stepIdx), exactly as in the PyTorch code
        finished = cand_len < t                                    # (B, 1) bool
        h_next = jnp.where(finished, h_prev, h_new)
        run_sum = run_sum + jnp.where(finished, 0.0, h_next)
        return h_next, run_sum

    _, cand_sum = jax.lax.fori_loop(
        0, S_C, cand_step, (anc_hid, zero_bh), unroll=True)

    cand_emb_ref[...] = cand_sum / cand_len.astype(f32)


def _fused_pallas_call():
    full = lambda shape: pl.BlockSpec(shape, lambda i: (0,) * len(shape))
    in_specs = [
        full((B, 1)),            # anchor lengths (int32)
        full((B, 1)),            # candidate lengths (int32)
        full((S_A * B, E)),      # anchor embeddings, time-major flat
        full((S_C * B, E)),      # candidate embeddings, time-major flat
        full((E, H3)),           # anc_w_ih
        full((H, H3)),           # anc_w_hh
        full((1, H3)),           # anc bias: b_ih + [b_hh_r, b_hh_z, 0]
        full((1, H)),            # anc bias: b_hh_n
        full((E, H3)),           # cand_w_ih (embedding part)
        full((H, H3)),           # cand_w_ih (context part)
        full((H, A + H3)),       # fused [attn_Wq | cand_w_hh]
        full((1, H3)),           # cand bias: b_ih + [b_hh_r, b_hh_z, 0]
        full((1, H)),            # cand bias: b_hh_n
        full((H, A)),            # attn Wk
        full((1, A)),            # attn v (row)
    ]
    out_specs = (full((B, H)), full((B, H)))
    grid_spec = pltpu.PrefetchScalarGridSpec(
        num_scalar_prefetch=0,
        grid=(1,),
        in_specs=in_specs,
        out_specs=out_specs,
        scratch_shapes=[
            pltpu.VMEM((B * S_A, H), jnp.float32),    # anchor outputs, flat batch-major
            pltpu.VMEM((S_A * B, H3), jnp.float32),   # hoisted anchor input gates, flat
            pltpu.VMEM((S_C * B, H3), jnp.float32),   # hoisted candidate input gates, flat
        ],
    )
    return pl.pallas_call(
        fused_kernel,
        out_shape=(jax.ShapeDtypeStruct((B, H), jnp.float32),
                   jax.ShapeDtypeStruct((B, H), jnp.float32)),
        grid_spec=grid_spec,
        compiler_params=pltpu.CompilerParams(dimension_semantics=("arbitrary",)),
    )


# ----------------------------- full forward ----------------------------------
@jax.jit
def bahdanau_encoder_forward(params, anchor_ids, anchor_len, cand_ids, cand_len):
    emb = params["embedding"]                                     # (V, E), row 0 = pad

    # embedding lookups (glue, XLA gather), already time-major + flattened
    anc_x = jnp.take(emb, anchor_ids.T, axis=0).reshape(S_A * B, E).astype(jnp.float32)
    cnd_x = jnp.take(emb, cand_ids.T, axis=0).reshape(S_C * B, E).astype(jnp.float32)

    anc_len_i = anchor_len.astype(jnp.int32).reshape(B, 1)
    cnd_len_i = cand_len.astype(jnp.int32).reshape(B, 1)

    # one-time weight/bias prep (tiny, constant-folded by XLA):
    # fold the r/z thirds of b_hh into the input-projection bias; fuse Wq with W_hh.
    zeros_h = jnp.zeros((1, H), jnp.float32)
    anc_b_fold = params["anc_b_ih"] + jnp.concatenate(
        [params["anc_b_hh"][:, :2 * H], zeros_h], axis=1)
    cand_b_fold = params["cand_b_ih"] + jnp.concatenate(
        [params["cand_b_hh"][:, :2 * H], zeros_h], axis=1)
    w_cat = jnp.concatenate([params["attn_wq"], params["cand_w_hh"]], axis=1)  # (H, A+3H)
    cand_w_ih = params["cand_w_ih"]                               # (E+H, 3H)

    anchor_emb, candidate_emb = _fused_pallas_call()(
        anc_len_i, cnd_len_i, anc_x, cnd_x,
        params["anc_w_ih"], params["anc_w_hh"],
        anc_b_fold, params["anc_b_hh"][:, 2 * H:],
        cand_w_ih[:E, :], cand_w_ih[E:, :], w_cat,
        cand_b_fold, params["cand_b_hh"][:, 2 * H:],
        params["attn_wk"], params["attn_v"].reshape(1, A),
    )
    # dropout == 0.0 -> identity
    return anchor_emb, candidate_emb


# --------------------------- deterministic params -----------------------------
def init_params(key):
    ks = jax.random.split(key, 12)
    s = 0.1
    emb = s * jax.random.normal(ks[0], (V, E), jnp.float32)
    emb = emb.at[PAD_IDX].set(0.0)                                # padding_idx row
    return {
        "embedding": emb,
        # anchor GRU: input E -> hidden H
        "anc_w_ih": s * jax.random.normal(ks[1], (E, H3), jnp.float32),
        "anc_w_hh": s * jax.random.normal(ks[2], (H, H3), jnp.float32),
        "anc_b_ih": s * jax.random.normal(ks[3], (1, H3), jnp.float32),
        "anc_b_hh": s * jax.random.normal(ks[4], (1, H3), jnp.float32),
        # candidate GRU: input (E + H) -> hidden H
        "cand_w_ih": s * jax.random.normal(ks[5], (E + H, H3), jnp.float32),
        "cand_w_hh": s * jax.random.normal(ks[6], (H, H3), jnp.float32),
        "cand_b_ih": s * jax.random.normal(ks[7], (1, H3), jnp.float32),
        "cand_b_hh": s * jax.random.normal(ks[8], (1, H3), jnp.float32),
        # additive attention
        "attn_wq": s * jax.random.normal(ks[9], (H, A), jnp.float32),
        "attn_wk": s * jax.random.normal(ks[10], (H, A), jnp.float32),
        "attn_v": s * jax.random.normal(ks[11], (A, 1), jnp.float32),
    }


if __name__ == "__main__":
    key = jax.random.PRNGKey(0)
    pkey, akey, ckey = jax.random.split(key, 3)
    params = init_params(pkey)

    anchor_ids = jax.random.randint(akey, (B, S_A), 1, V, dtype=jnp.int32)
    cand_ids = jax.random.randint(ckey, (B, S_C), 1, V, dtype=jnp.int32)
    anchor_len = jnp.array([S_A, 5], dtype=jnp.int32)
    cand_len = jnp.array([S_C, 3], dtype=jnp.int32)
    # zero out padded token positions (padding idx = 0)
    anchor_ids = jnp.where(jnp.arange(S_A)[None, :] < anchor_len[:, None], anchor_ids, 0)
    cand_ids = jnp.where(jnp.arange(S_C)[None, :] < cand_len[:, None], cand_ids, 0)

    anchor_emb, candidate_emb = bahdanau_encoder_forward(
        params, anchor_ids, anchor_len, cand_ids, cand_len)
    jax.block_until_ready((anchor_emb, candidate_emb))
    assert anchor_emb.shape == (B, H) and candidate_emb.shape == (B, H)
    assert bool(jnp.all(jnp.isfinite(anchor_emb))) and bool(jnp.all(jnp.isfinite(candidate_emb)))

    # TODO(synk): upstream RNNEncoder / attention / meanVector implementations were
    # not provided; standard GRU + (unmasked) Bahdanau additive attention + mean
    # pooling assumed, and the original's (length < stepIdx) candidate mask is kept.
    print("KERNEL_OK")
</pallas_src>

<mosaic_0001>
module attributes {stable_mosaic.version = 11 : i64} {
  func.func @fused_kernel(%arg0: i32, %arg1: memref<2x1xi32, #tpu.memory_space<vmem>>, %arg2: memref<2x1xi32, #tpu.memory_space<vmem>>, %arg3: memref<16x16xf32, #tpu.memory_space<vmem>>, %arg4: memref<12x16xf32, #tpu.memory_space<vmem>>, %arg5: memref<16x96xf32, #tpu.memory_space<vmem>>, %arg6: memref<32x96xf32, #tpu.memory_space<vmem>>, %arg7: memref<1x96xf32, #tpu.memory_space<vmem>>, %arg8: memref<1x32xf32, #tpu.memory_space<vmem>>, %arg9: memref<16x96xf32, #tpu.memory_space<vmem>>, %arg10: memref<32x96xf32, #tpu.memory_space<vmem>>, %arg11: memref<32x128xf32, #tpu.memory_space<vmem>>, %arg12: memref<1x96xf32, #tpu.memory_space<vmem>>, %arg13: memref<1x32xf32, #tpu.memory_space<vmem>>, %arg14: memref<32x32xf32, #tpu.memory_space<vmem>>, %arg15: memref<1x32xf32, #tpu.memory_space<vmem>>, %arg16: memref<2x32xf32, #tpu.memory_space<vmem>>, %arg17: memref<2x32xf32, #tpu.memory_space<vmem>>, %arg18: memref<16x32xf32, #tpu.memory_space<vmem>>, %arg19: memref<16x96xf32, #tpu.memory_space<vmem>>, %arg20: memref<12x96xf32, #tpu.memory_space<vmem>>) attributes {dimension_semantics = [#tpu.dimension_semantics<arbitrary>], iteration_bounds = array<i64: 1>, scalar_prefetch = 0 : i64, scratch_operands = 3 : i64, tpu.core_type = #tpu.core_type<tc>, window_params = [{pipeline_mode = #tpu.pipeline_mode<synchronous>, transform_indices = @transform_0, window_bounds = array<i64: 2, 1>}, {pipeline_mode = #tpu.pipeline_mode<synchronous>, transform_indices = @transform_1, window_bounds = array<i64: 2, 1>}, {pipeline_mode = #tpu.pipeline_mode<synchronous>, transform_indices = @transform_2, window_bounds = array<i64: 16, 16>}, {pipeline_mode = #tpu.pipeline_mode<synchronous>, transform_indices = @transform_3, window_bounds = array<i64: 12, 16>}, {pipeline_mode = #tpu.pipeline_mode<synchronous>, transform_indices = @transform_4, window_bounds = array<i64: 16, 96>}, {pipeline_mode = #tpu.pipeline_mode<synchronous>, transform_indices = @transform_5, window_bounds = array<i64: 32, 96>}, {pipeline_mode = #tpu.pipeline_mode<synchronous>, transform_indices = @transform_6, window_bounds = array<i64: 1, 96>}, {pipeline_mode = #tpu.pipeline_mode<synchronous>, transform_indices = @transform_7, window_bounds = array<i64: 1, 32>}, {pipeline_mode = #tpu.pipeline_mode<synchronous>, transform_indices = @transform_8, window_bounds = array<i64: 16, 96>}, {pipeline_mode = #tpu.pipeline_mode<synchronous>, transform_indices = @transform_9, window_bounds = array<i64: 32, 96>}, {pipeline_mode = #tpu.pipeline_mode<synchronous>, transform_indices = @transform_10, window_bounds = array<i64: 32, 128>}, {pipeline_mode = #tpu.pipeline_mode<synchronous>, transform_indices = @transform_11, window_bounds = array<i64: 1, 96>}, {pipeline_mode = #tpu.pipeline_mode<synchronous>, transform_indices = @transform_12, window_bounds = array<i64: 1, 32>}, {pipeline_mode = #tpu.pipeline_mode<synchronous>, transform_indices = @transform_13, window_bounds = array<i64: 32, 32>}, {pipeline_mode = #tpu.pipeline_mode<synchronous>, transform_indices = @transform_14, window_bounds = array<i64: 1, 32>}, {pipeline_mode = #tpu.pipeline_mode<synchronous>, transform_indices = @transform_15, window_bounds = array<i64: 2, 32>}, {pipeline_mode = #tpu.pipeline_mode<synchronous>, transform_indices = @transform_16, window_bounds = array<i64: 2, 32>}]} {
    %c0 = arith.constant 0 : index
    %c0_0 = arith.constant 0 : index
    %0 = vector.load %arg1[%c0, %c0_0] : memref<2x1xi32, #tpu.memory_space<vmem>>, vector<2x1xi32>
    %c0_1 = arith.constant 0 : index
    %c0_2 = arith.constant 0 : index
    %1 = vector.load %arg2[%c0_1, %c0_2] : memref<2x1xi32, #tpu.memory_space<vmem>>, vector<2x1xi32>
    %c0_3 = arith.constant 0 : index
    %c0_4 = arith.constant 0 : index
    %2 = vector.load %arg3[%c0_3, %c0_4] : memref<16x16xf32, #tpu.memory_space<vmem>>, vector<16x16xf32>
    %c0_5 = arith.constant 0 : index
    %c0_6 = arith.constant 0 : index
    %3 = vector.load %arg5[%c0_5, %c0_6] : memref<16x96xf32, #tpu.memory_space<vmem>>, vector<16x96xf32>
    %cst = arith.constant dense<0.000000e+00> : vector<16x96xf32>
    %4 = tpu.matmul %2, %3, %cst {dimension_numbers = #tpu.dot_dimension_numbers<[1], [0], [0], [1], [0, 0, 1, 1], [], []>} : vector<16x16xf32>, vector<16x96xf32>, vector<16x96xf32> -> vector<16x96xf32>
    %c0_7 = arith.constant 0 : index
    %c0_8 = arith.constant 0 : index
    %5 = vector.load %arg7[%c0_7, %c0_8] : memref<1x96xf32, #tpu.memory_space<vmem>>, vector<1x96xf32>
    %6 = vector.broadcast %5 : vector<1x96xf32> to vector<16x96xf32>
    %7 = arith.addf %4, %6 : vector<16x96xf32>
    %c0_9 = arith.constant 0 : index
    %c0_10 = arith.constant 0 : index
    %8 = vector.load %arg19[%c0_9, %c0_10] : memref<16x96xf32, #tpu.memory_space<vmem>>, vector<16x96xf32>
    tpu.vector_store %arg19[%c0_9, %c0_10], %7 {strides = array<i32>} : memref<16x96xf32, #tpu.memory_space<vmem>>, vector<16x96xf32>,
    %c0_11 = arith.constant 0 : index
    %c0_12 = arith.constant 0 : index
    %9 = vector.load %arg4[%c0_11, %c0_12] : memref<12x16xf32, #tpu.memory_space<vmem>>, vector<12x16xf32>
    %c0_13 = arith.constant 0 : index
    %c0_14 = arith.constant 0 : index
    %10 = vector.load %arg9[%c0_13, %c0_14] : memref<16x96xf32, #tpu.memory_space<vmem>>, vector<16x96xf32>
    %cst_15 = arith.constant dense<0.000000e+00> : vector<12x96xf32>
    %11 = tpu.matmul %9, %10, %cst_15 {dimension_numbers = #tpu.dot_dimension_numbers<[1], [0], [0], [1], [0, 0, 1, 1], [], []>} : vector<12x16xf32>, vector<16x96xf32>, vector<12x96xf32> -> vector<12x96xf32>
    %c0_16 = arith.constant 0 : index
    %c0_17 = arith.constant 0 : index
    %12 = vector.load %arg12[%c0_16, %c0_17] : memref<1x96xf32, #tpu.memory_space<vmem>>, vector<1x96xf32>
    %13 = vector.broadcast %12 : vector<1x96xf32> to vector<12x96xf32>
    %14 = arith.addf %11, %13 : vector<12x96xf32>
    %c0_18 = arith.constant 0 : index
    %c0_19 = arith.constant 0 : index
    %15 = vector.load %arg20[%c0_18, %c0_19] : memref<12x96xf32, #tpu.memory_space<vmem>>, vector<12x96xf32>
    tpu.vector_store %arg20[%c0_18, %c0_19], %14 {strides = array<i32>} : memref<12x96xf32, #tpu.memory_space<vmem>>, vector<12x96xf32>,
    %c0_20 = arith.constant 0 : index
    %c0_21 = arith.constant 0 : index
    %16 = vector.load %arg6[%c0_20, %c0_21] : memref<32x96xf32, #tpu.memory_space<vmem>>, vector<32x96xf32>
    %c0_22 = arith.constant 0 : index
    %c0_23 = arith.constant 0 : index
    %17 = vector.load %arg8[%c0_22, %c0_23] : memref<1x32xf32, #tpu.memory_space<vmem>>, vector<1x32xf32>
    %18 = vector.shape_cast %17 : vector<1x32xf32> to vector<1x32xf32>
    %19 = vector.broadcast %18 : vector<1x32xf32> to vector<2x32xf32>
    %cst_24 = arith.constant 0.000000e+00 : f32
    %20 = vector.broadcast %cst_24 : f32 to vector<2x32xf32>
    %c0_i32 = arith.constant 0 : i32
    %c2_i32 = arith.constant 2 : i32
    %21 = arith.muli %c0_i32, %c2_i32 : i32
    %22 = tpu.assume_multiple %21, 2 : i32
    %23 = arith.index_cast %22 : i32 to index
    %c0_25 = arith.constant 0 : index
    %24 = vector.load %arg19[%23, %c0_25] : memref<16x96xf32, #tpu.memory_space<vmem>>, vector<2x96xf32>
    %cst_26 = arith.constant dense<0.000000e+00> : vector<2x96xf32>
    %25 = tpu.matmul %20, %16, %cst_26 {dimension_numbers = #tpu.dot_dimension_numbers<[1], [0], [0], [1], [0, 0, 1, 1], [], []>} : vector<2x32xf32>, vector<32x96xf32>, vector<2x96xf32> -> vector<2x96xf32>
    %26 = vector.extract_strided_slice %24 {offsets = [0, 0], sizes = [2, 32], strides = [1, 1]} : vector<2x96xf32> to vector<2x32xf32>
    %27 = vector.extract_strided_slice %25 {offsets = [0, 0], sizes = [2, 32], strides = [1, 1]} : vector<2x96xf32> to vector<2x32xf32>
    %28 = arith.addf %26, %27 : vector<2x32xf32>
    %29 = arith.negf %28 : vector<2x32xf32>
    %30 = math.exp %29 : vector<2x32xf32>
    %cst_27 = arith.constant 1.000000e+00 : f32
    %31 = vector.broadcast %cst_27 : f32 to vector<2x32xf32>
    %32 = arith.addf %31, %30 : vector<2x32xf32>
    %33 = arith.divf %31, %32 : vector<2x32xf32>
    %34 = vector.extract_strided_slice %24 {offsets = [0, 32], sizes = [2, 32], strides = [1, 1]} : vector<2x96xf32> to vector<2x32xf32>
    %35 = vector.extract_strided_slice %25 {offsets = [0, 32], sizes = [2, 32], strides = [1, 1]} : vector<2x96xf32> to vector<2x32xf32>
    %36 = arith.addf %34, %35 : vector<2x32xf32>
    %37 = arith.negf %36 : vector<2x32xf32>
    %38 = math.exp %37 : vector<2x32xf32>
    %cst_28 = arith.constant 1.000000e+00 : f32
    %39 = vector.broadcast %cst_28 : f32 to vector<2x32xf32>
    %40 = arith.addf %39, %38 : vector<2x32xf32>
    %41 = arith.divf %39, %40 : vector<2x32xf32>
    %42 = vector.extract_strided_slice %24 {offsets = [0, 64], sizes = [2, 32], strides = [1, 1]} : vector<2x96xf32> to vector<2x32xf32>
    %43 = vector.extract_strided_slice %25 {offsets = [0, 64], sizes = [2, 32], strides = [1, 1]} : vector<2x96xf32> to vector<2x32xf32>
    %44 = arith.addf %43, %19 : vector<2x32xf32>
    %45 = arith.mulf %33, %44 : vector<2x32xf32>
    %46 = arith.addf %42, %45 : vector<2x32xf32>
    %47 = math.tanh %46 : vector<2x32xf32>
    %cst_29 = arith.constant 1.000000e+00 : f32
    %48 = vector.broadcast %cst_29 : f32 to vector<2x32xf32>
    %49 = arith.subf %48, %41 : vector<2x32xf32>
    %50 = arith.mulf %49, %47 : vector<2x32xf32>
    %51 = arith.mulf %41, %20 : vector<2x32xf32>
    %52 = arith.addf %50, %51 : vector<2x32xf32>
    %53 = vector.broadcast %c0_i32 : i32 to vector<2x1xi32>
    %54 = arith.cmpi slt, %53, %0 : vector<2x1xi32>
    %55 = vector.shape_cast %54 : vector<2x1xi1> to vector<2x1xi1>
    %56 = vector.broadcast %55 : vector<2x1xi1> to vector<2x32xi1>
    %57 = arith.select %56, %52, %20 : vector<2x32xi1>, vector<2x32xf32>
    %cst_30 = arith.constant 0.000000e+00 : f32
    %58 = vector.shape_cast %54 : vector<2x1xi1> to vector<2x1xi1>
    %59 = vector.broadcast %58 : vector<2x1xi1> to vector<2x32xi1>
    %60 = vector.broadcast %cst_30 : f32 to vector<2x32xf32>
    %61 = arith.select %59, %52, %60 : vector<2x32xi1>, vector<2x32xf32>
    %62 = vector.extract_strided_slice %61 {offsets = [0, 0], sizes = [1, 32], strides = [1, 1]} : vector<2x32xf32> to vector<1x32xf32>
    %c0_i32_31 = arith.constant 0 : i32
    %63 = arith.addi %c0_i32_31, %c0_i32 : i32
    %64 = arith.index_cast %63 : i32 to index
    %c0_32 = arith.constant 0 : index
    %65 = vector.load %arg18[%64, %c0_32] : memref<16x32xf32, #tpu.memory_space<vmem>>, vector<1x32xf32>
    tpu.vector_store %arg18[%64, %c0_32], %62 {strides = array<i32>} : memref<16x32xf32, #tpu.memory_space<vmem>>, vector<1x32xf32>,
    %66 = vector.extract_strided_slice %61 {offsets = [1, 0], sizes = [1, 32], strides = [1, 1]} : vector<2x32xf32> to vector<1x32xf32>
    %c8_i32 = arith.constant 8 : i32
    %67 = arith.addi %c8_i32, %c0_i32 : i32
    %68 = arith.index_cast %67 : i32 to index
    %c0_33 = arith.constant 0 : index
    %69 = vector.load %arg18[%68, %c0_33] : memref<16x32xf32, #tpu.memory_space<vmem>>, vector<1x32xf32>
    tpu.vector_store %arg18[%68, %c0_33], %66 {strides = array<i32>} : memref<16x32xf32, #tpu.memory_space<vmem>>, vector<1x32xf32>,
    %70 = arith.addf %20, %61 : vector<2x32xf32>
    %c1_i32 = arith.constant 1 : i32
    %c2_i32_34 = arith.constant 2 : i32
    %71 = arith.muli %c1_i32, %c2_i32_34 : i32
    %72 = tpu.assume_multiple %71, 2 : i32
    %73 = arith.index_cast %72 : i32 to index
    %c0_35 = arith.constant 0 : index
    %74 = vector.load %arg19[%73, %c0_35] : memref<16x96xf32, #tpu.memory_space<vmem>>, vector<2x96xf32>
    %cst_36 = arith.constant dense<0.000000e+00> : vector<2x96xf32>
    %75 = tpu.matmul %57, %16, %cst_36 {dimension_numbers = #tpu.dot_dimension_numbers<[1], [0], [0], [1], [0, 0, 1, 1], [], []>} : vector<2x32xf32>, vector<32x96xf32>, vector<2x96xf32> -> vector<2x96xf32>
    %76 = vector.extract_strided_slice %74 {offsets = [0, 0], sizes = [2, 32], strides = [1, 1]} : vector<2x96xf32> to vector<2x32xf32>
    %77 = vector.extract_strided_slice %75 {offsets = [0, 0], sizes = [2, 32], strides = [1, 1]} : vector<2x96xf32> to vector<2x32xf32>
    %78 = arith.addf %76, %77 : vector<2x32xf32>
    %79 = arith.negf %78 : vector<2x32xf32>
    %80 = math.exp %79 : vector<2x32xf32>
    %cst_37 = arith.constant 1.000000e+00 : f32
    %81 = vector.broadcast %cst_37 : f32 to vector<2x32xf32>
    %82 = arith.addf %81, %80 : vector<2x32xf32>
    %83 = arith.divf %81, %82 : vector<2x32xf32>
    %84 = vector.extract_strided_slice %74 {offsets = [0, 32], sizes = [2, 32], strides = [1, 1]} : vector<2x96xf32> to vector<2x32xf32>
    %85 = vector.extract_strided_slice %75 {offsets = [0, 32], sizes = [2, 32], strides = [1, 1]} : vector<2x96xf32> to vector<2x32xf32>
    %86 = arith.addf %84, %85 : vector<2x32xf32>
    %87 = arith.negf %86 : vector<2x32xf32>
    %88 = math.exp %87 : vector<2x32xf32>
    %cst_38 = arith.constant 1.000000e+00 : f32
    %89 = vector.broadcast %cst_38 : f32 to vector<2x32xf32>
    %90 = arith.addf %89, %88 : vector<2x32xf32>
    %91 = arith.divf %89, %90 : vector<2x32xf32>
    %92 = vector.extract_strided_slice %74 {offsets = [0, 64], sizes = [2, 32], strides = [1, 1]} : vector<2x96xf32> to vector<2x32xf32>
    %93 = vector.extract_strided_slice %75 {offsets = [0, 64], sizes = [2, 32], strides = [1, 1]} : vector<2x96xf32> to vector<2x32xf32>
    %94 = arith.addf %93, %19 : vector<2x32xf32>
    %95 = arith.mulf %83, %94 : vector<2x32xf32>
    %96 = arith.addf %92, %95 : vector<2x32xf32>
    %97 = math.tanh %96 : vector<2x32xf32>
    %cst_39 = arith.constant 1.000000e+00 : f32
    %98 = vector.broadcast %cst_39 : f32 to vector<2x32xf32>
    %99 = arith.subf %98, %91 : vector<2x32xf32>
    %100 = arith.mulf %99, %97 : vector<2x32xf32>
    %101 = arith.mulf %91, %57 : vector<2x32xf32>
    %102 = arith.addf %100, %101 : vector<2x32xf32>
    %103 = vector.broadcast %c1_i32 : i32 to vector<2x1xi32>
    %104 = arith.cmpi slt, %103, %0 : vector<2x1xi32>
    %105 = vector.shape_cast %104 : vector<2x1xi1> to vector<2x1xi1>
    %106 = vector.broadcast %105 : vector<2x1xi1> to vector<2x32xi1>
    %107 = arith.select %106, %102, %57 : vector<2x32xi1>, vector<2x32xf32>
    %cst_40 = arith.constant 0.000000e+00 : f32
    %108 = vector.shape_cast %104 : vector<2x1xi1> to vector<2x1xi1>
    %109 = vector.broadcast %108 : vector<2x1xi1> to vector<2x32xi1>
    %110 = vector.broadcast %cst_40 : f32 to vector<2x32xf32>
    %111 = arith.select %109, %102, %110 : vector<2x32xi1>, vector<2x32xf32>
    %112 = vector.extract_strided_slice %111 {offsets = [0, 0], sizes = [1, 32], strides = [1, 1]} : vector<2x32xf32> to vector<1x32xf32>
    %c0_i32_41 = arith.constant 0 : i32
    %113 = arith.addi %c0_i32_41, %c1_i32 : i32
    %114 = arith.index_cast %113 : i32 to index
    %c0_42 = arith.constant 0 : index
    %115 = vector.load %arg18[%114, %c0_42] : memref<16x32xf32, #tpu.memory_space<vmem>>, vector<1x32xf32>
    tpu.vector_store %arg18[%114, %c0_42], %112 {strides = array<i32>} : memref<16x32xf32, #tpu.memory_space<vmem>>, vector<1x32xf32>,
    %116 = vector.extract_strided_slice %111 {offsets = [1, 0], sizes = [1, 32], strides = [1, 1]} : vector<2x32xf32> to vector<1x32xf32>
    %c8_i32_43 = arith.constant 8 : i32
    %117 = arith.addi %c8_i32_43, %c1_i32 : i32
    %118 = arith.index_cast %117 : i32 to index
    %c0_44 = arith.constant 0 : index
    %119 = vector.load %arg18[%118, %c0_44] : memref<16x32xf32, #tpu.memory_space<vmem>>, vector<1x32xf32>
    tpu.vector_store %arg18[%118, %c0_44], %116 {strides = array<i32>} : memref<16x32xf32, #tpu.memory_space<vmem>>, vector<1x32xf32>,
    %120 = arith.addf %70, %111 : vector<2x32xf32>
    %c2_i32_45 = arith.constant 2 : i32
    %c2_i32_46 = arith.constant 2 : i32
    %121 = arith.muli %c2_i32_45, %c2_i32_46 : i32
    %122 = tpu.assume_multiple %121, 2 : i32
    %123 = arith.index_cast %122 : i32 to index
    %c0_47 = arith.constant 0 : index
    %124 = vector.load %arg19[%123, %c0_47] : memref<16x96xf32, #tpu.memory_space<vmem>>, vector<2x96xf32>
    %cst_48 = arith.constant dense<0.000000e+00> : vector<2x96xf32>
    %125 = tpu.matmul %107, %16, %cst_48 {dimension_numbers = #tpu.dot_dimension_numbers<[1], [0], [0], [1], [0, 0, 1, 1], [], []>} : vector<2x32xf32>, vector<32x96xf32>, vector<2x96xf32> -> vector<2x96xf32>
    %126 = vector.extract_strided_slice %124 {offsets = [0, 0], sizes = [2, 32], strides = [1, 1]} : vector<2x96xf32> to vector<2x32xf32>
    %127 = vector.extract_strided_slice %125 {offsets = [0, 0], sizes = [2, 32], strides = [1, 1]} : vector<2x96xf32> to vector<2x32xf32>
    %128 = arith.addf %126, %127 : vector<2x32xf32>
    %129 = arith.negf %128 : vector<2x32xf32>
    %130 = math.exp %129 : vector<2x32xf32>
    %cst_49 = arith.constant 1.000000e+00 : f32
    %131 = vector.broadcast %cst_49 : f32 to vector<2x32xf32>
    %132 = arith.addf %131, %130 : vector<2x32xf32>
    %133 = arith.divf %131, %132 : vector<2x32xf32>
    %134 = vector.extract_strided_slice %124 {offsets = [0, 32], sizes = [2, 32], strides = [1, 1]} : vector<2x96xf32> to vector<2x32xf32>
    %135 = vector.extract_strided_slice %125 {offsets = [0, 32], sizes = [2, 32], strides = [1, 1]} : vector<2x96xf32> to vector<2x32xf32>
    %136 = arith.addf %134, %135 : vector<2x32xf32>
    %137 = arith.negf %136 : vector<2x32xf32>
    %138 = math.exp %137 : vector<2x32xf32>
    %cst_50 = arith.constant 1.000000e+00 : f32
    %139 = vector.broadcast %cst_50 : f32 to vector<2x32xf32>
    %140 = arith.addf %139, %138 : vector<2x32xf32>
    %141 = arith.divf %139, %140 : vector<2x32xf32>
    %142 = vector.extract_strided_slice %124 {offsets = [0, 64], sizes = [2, 32], strides = [1, 1]} : vector<2x96xf32> to vector<2x32xf32>
    %143 = vector.extract_strided_slice %125 {offsets = [0, 64], sizes = [2, 32], strides = [1, 1]} : vector<2x96xf32> to vector<2x32xf32>
    %144 = arith.addf %143, %19 : vector<2x32xf32>
    %145 = arith.mulf %133, %144 : vector<2x32xf32>
    %146 = arith.addf %142, %145 : vector<2x32xf32>
    %147 = math.tanh %146 : vector<2x32xf32>
    %cst_51 = arith.constant 1.000000e+00 : f32
    %148 = vector.broadcast %cst_51 : f32 to vector<2x32xf32>
    %149 = arith.subf %148, %141 : vector<2x32xf32>
    %150 = arith.mulf %149, %147 : vector<2x32xf32>
    %151 = arith.mulf %141, %107 : vector<2x32xf32>
    %152 = arith.addf %150, %151 : vector<2x32xf32>
    %153 = vector.broadcast %c2_i32_45 : i32 to vector<2x1xi32>
    %154 = arith.cmpi slt, %153, %0 : vector<2x1xi32>
    %155 = vector.shape_cast %154 : vector<2x1xi1> to vector<2x1xi1>
    %156 = vector.broadcast %155 : vector<2x1xi1> to vector<2x32xi1>
    %157 = arith.select %156, %152, %107 : vector<2x32xi1>, vector<2x32xf32>
    %cst_52 = arith.constant 0.000000e+00 : f32
    %158 = vector.shape_cast %154 : vector<2x1xi1> to vector<2x1xi1>
    %159 = vector.broadcast %158 : vector<2x1xi1> to vector<2x32xi1>
    %160 = vector.broadcast %cst_52 : f32 to vector<2x32xf32>
    %161 = arith.select %159, %152, %160 : vector<2x32xi1>, vector<2x32xf32>
    %162 = vector.extract_strided_slice %161 {offsets = [0, 0], sizes = [1, 32], strides = [1, 1]} : vector<2x32xf32> to vector<1x32xf32>
    %c0_i32_53 = arith.constant 0 : i32
    %163 = arith.addi %c0_i32_53, %c2_i32_45 : i32
    %164 = arith.index_cast %163 : i32 to index
    %c0_54 = arith.constant 0 : index
    %165 = vector.load %arg18[%164, %c0_54] : memref<16x32xf32, #tpu.memory_space<vmem>>, vector<1x32xf32>
    tpu.vector_store %arg18[%164, %c0_54], %162 {strides = array<i32>} : memref<16x32xf32, #tpu.memory_space<vmem>>, vector<1x32xf32>,
    %166 = vector.extract_strided_slice %161 {offsets = [1, 0], sizes = [1, 32], strides = [1, 1]} : vector<2x32xf32> to vector<1x32xf32>
    %c8_i32_55 = arith.constant 8 : i32
    %167 = arith.addi %c8_i32_55, %c2_i32_45 : i32
    %168 = arith.index_cast %167 : i32 to index
    %c0_56 = arith.constant 0 : index
    %169 = vector.load %arg18[%168, %c0_56] : memref<16x32xf32, #tpu.memory_space<vmem>>, vector<1x32xf32>
    tpu.vector_store %arg18[%168, %c0_56], %166 {strides = array<i32>} : memref<16x32xf32, #tpu.memory_space<vmem>>, vector<1x32xf32>,
    %170 = arith.addf %120, %161 : vector<2x32xf32>
    %c3_i32 = arith.constant 3 : i32
    %c2_i32_57 = arith.constant 2 : i32
    %171 = arith.muli %c3_i32, %c2_i32_57 : i32
    %172 = tpu.assume_multiple %171, 2 : i32
    %173 = arith.index_cast %172 : i32 to index
    %c0_58 = arith.constant 0 : index
    %174 = vector.load %arg19[%173, %c0_58] : memref<16x96xf32, #tpu.memory_space<vmem>>, vector<2x96xf32>
    %cst_59 = arith.constant dense<0.000000e+00> : vector<2x96xf32>
    %175 = tpu.matmul %157, %16, %cst_59 {dimension_numbers = #tpu.dot_dimension_numbers<[1], [0], [0], [1], [0, 0, 1, 1], [], []>} : vector<2x32xf32>, vector<32x96xf32>, vector<2x96xf32> -> vector<2x96xf32>
    %176 = vector.extract_strided_slice %174 {offsets = [0, 0], sizes = [2, 32], strides = [1, 1]} : vector<2x96xf32> to vector<2x32xf32>
    %177 = vector.extract_strided_slice %175 {offsets = [0, 0], sizes = [2, 32], strides = [1, 1]} : vector<2x96xf32> to vector<2x32xf32>
    %178 = arith.addf %176, %177 : vector<2x32xf32>
    %179 = arith.negf %178 : vector<2x32xf32>
    %180 = math.exp %179 : vector<2x32xf32>
    %cst_60 = arith.constant 1.000000e+00 : f32
    %181 = vector.broadcast %cst_60 : f32 to vector<2x32xf32>
    %182 = arith.addf %181, %180 : vector<2x32xf32>
    %183 = arith.divf %181, %182 : vector<2x32xf32>
    %184 = vector.extract_strided_slice %174 {offsets = [0, 32], sizes = [2, 32], strides = [1, 1]} : vector<2x96xf32> to vector<2x32xf32>
    %185 = vector.extract_strided_slice %175 {offsets = [0, 32], sizes = [2, 32], strides = [1, 1]} : vector<2x96xf32> to vector<2x32xf32>
    %186 = arith.addf %184, %185 : vector<2x32xf32>
    %187 = arith.negf %186 : vector<2x32xf32>
    %188 = math.exp %187 : vector<2x32xf32>
    %cst_61 = arith.constant 1.000000e+00 : f32
    %189 = vector.broadcast %cst_61 : f32 to vector<2x32xf32>
    %190 = arith.addf %189, %188 : vector<2x32xf32>
    %191 = arith.divf %189, %190 : vector<2x32xf32>
    %192 = vector.extract_strided_slice %174 {offsets = [0, 64], sizes = [2, 32], strides = [1, 1]} : vector<2x96xf32> to vector<2x32xf32>
    %193 = vector.extract_strided_slice %175 {offsets = [0, 64], sizes = [2, 32], strides = [1, 1]} : vector<2x96xf32> to vector<2x32xf32>
    %194 = arith.addf %193, %19 : vector<2x32xf32>
    %195 = arith.mulf %183, %194 : vector<2x32xf32>
    %196 = arith.addf %192, %195 : vector<2x32xf32>
    %197 = math.tanh %196 : vector<2x32xf32>
    %cst_62 = arith.constant 1.000000e+00 : f32
    %198 = vector.broadcast %cst_62 : f32 to vector<2x32xf32>
    %199 = arith.subf %198, %191 : vector<2x32xf32>
    %200 = arith.mulf %199, %197 : vector<2x32xf32>
    %201 = arith.mulf %191, %157 : vector<2x32xf32>
    %202 = arith.addf %200, %201 : vector<2x32xf32>
    %203 = vector.broadcast %c3_i32 : i32 to vector<2x1xi32>
    %204 = arith.cmpi slt, %203, %0 : vector<2x1xi32>
    %205 = vector.shape_cast %204 : vector<2x1xi1> to vector<2x1xi1>
    %206 = vector.broadcast %205 : vector<2x1xi1> to vector<2x32xi1>
    %207 = arith.select %206, %202, %157 : vector<2x32xi1>, vector<2x32xf32>
    %cst_63 = arith.constant 0.000000e+00 : f32
    %208 = vector.shape_cast %204 : vector<2x1xi1> to vector<2x1xi1>
    %209 = vector.broadcast %208 : vector<2x1xi1> to vector<2x32xi1>
    %210 = vector.broadcast %cst_63 : f32 to vector<2x32xf32>
    %211 = arith.select %209, %202, %210 : vector<2x32xi1>, vector<2x32xf32>
    %212 = vector.extract_strided_slice %211 {offsets = [0, 0], sizes = [1, 32], strides = [1, 1]} : vector<2x32xf32> to vector<1x32xf32>
    %c0_i32_64 = arith.constant 0 : i32
    %213 = arith.addi %c0_i32_64, %c3_i32 : i32
    %214 = arith.index_cast %213 : i32 to index
    %c0_65 = arith.constant 0 : index
    %215 = vector.load %arg18[%214, %c0_65] : memref<16x32xf32, #tpu.memory_space<vmem>>, vector<1x32xf32>
    tpu.vector_store %arg18[%214, %c0_65], %212 {strides = array<i32>} : memref<16x32xf32, #tpu.memory_space<vmem>>, vector<1x32xf32>,
    %216 = vector.extract_strided_slice %211 {offsets = [1, 0], sizes = [1, 32], strides = [1, 1]} : vector<2x32xf32> to vector<1x32xf32>
    %c8_i32_66 = arith.constant 8 : i32
    %217 = arith.addi %c8_i32_66, %c3_i32 : i32
    %218 = arith.index_cast %217 : i32 to index
    %c0_67 = arith.constant 0 : index
    %219 = vector.load %arg18[%218, %c0_67] : memref<16x32xf32, #tpu.memory_space<vmem>>, vector<1x32xf32>
    tpu.vector_store %arg18[%218, %c0_67], %216 {strides = array<i32>} : memref<16x32xf32, #tpu.memory_space<vmem>>, vector<1x32xf32>,
    %220 = arith.addf %170, %211 : vector<2x32xf32>
    %c4_i32 = arith.constant 4 : i32
    %c2_i32_68 = arith.constant 2 : i32
    %221 = arith.muli %c4_i32, %c2_i32_68 : i32
    %222 = tpu.assume_multiple %221, 2 : i32
    %223 = arith.index_cast %222 : i32 to index
    %c0_69 = arith.constant 0 : index
    %224 = vector.load %arg19[%223, %c0_69] : memref<16x96xf32, #tpu.memory_space<vmem>>, vector<2x96xf32>
    %cst_70 = arith.constant dense<0.000000e+00> : vector<2x96xf32>
    %225 = tpu.matmul %207, %16, %cst_70 {dimension_numbers = #tpu.dot_dimension_numbers<[1], [0], [0], [1], [0, 0, 1, 1], [], []>} : vector<2x32xf32>, vector<32x96xf32>, vector<2x96xf32> -> vector<2x96xf32>
    %226 = vector.extract_strided_slice %224 {offsets = [0, 0], sizes = [2, 32], strides = [1, 1]} : vector<2x96xf32> to vector<2x32xf32>
    %227 = vector.extract_strided_slice %225 {offsets = [0, 0], sizes = [2, 32], strides = [1, 1]} : vector<2x96xf32> to vector<2x32xf32>
    %228 = arith.addf %226, %227 : vector<2x32xf32>
    %229 = arith.negf %228 : vector<2x32xf32>
    %230 = math.exp %229 : vector<2x32xf32>
    %cst_71 = arith.constant 1.000000e+00 : f32
    %231 = vector.broadcast %cst_71 : f32 to vector<2x32xf32>
    %232 = arith.addf %231, %230 : vector<2x32xf32>
    %233 = arith.divf %231, %232 : vector<2x32xf32>
    %234 = vector.extract_strided_slice %224 {offsets = [0, 32], sizes = [2, 32], strides = [1, 1]} : vector<2x96xf32> to vector<2x32xf32>
    %235 = vector.extract_strided_slice %225 {offsets = [0, 32], sizes = [2, 32], strides = [1, 1]} : vector<2x96xf32> to vector<2x32xf32>
    %236 = arith.addf %234, %235 : vector<2x32xf32>
    %237 = arith.negf %236 : vector<2x32xf32>
    %238 = math.exp %237 : vector<2x32xf32>
    %cst_72 = arith.constant 1.000000e+00 : f32
    %239 = vector.broadcast %cst_72 : f32 to vector<2x32xf32>
    %240 = arith.addf %239, %238 : vector<2x32xf32>
    %241 = arith.divf %239, %240 : vector<2x32xf32>
    %242 = vector.extract_strided_slice %224 {offsets = [0, 64], sizes = [2, 32], strides = [1, 1]} : vector<2x96xf32> to vector<2x32xf32>
    %243 = vector.extract_strided_slice %225 {offsets = [0, 64], sizes = [2, 32], strides = [1, 1]} : vector<2x96xf32> to vector<2x32xf32>
    %244 = arith.addf %243, %19 : vector<2x32xf32>
    %245 = arith.mulf %233, %244 : vector<2x32xf32>
    %246 = arith.addf %242, %245 : vector<2x32xf32>
    %247 = math.tanh %246 : vector<2x32xf32>
    %cst_73 = arith.constant 1.000000e+00 : f32
    %248 = vector.broadcast %cst_73 : f32 to vector<2x32xf32>
    %249 = arith.subf %248, %241 : vector<2x32xf32>
    %250 = arith.mulf %249, %247 : vector<2x32xf32>
    %251 = arith.mulf %241, %207 : vector<2x32xf32>
    %252 = arith.addf %250, %251 : vector<2x32xf32>
    %253 = vector.broadcast %c4_i32 : i32 to vector<2x1xi32>
    %254 = arith.cmpi slt, %253, %0 : vector<2x1xi32>
    %255 = vector.shape_cast %254 : vector<2x1xi1> to vector<2x1xi1>
    %256 = vector.broadcast %255 : vector<2x1xi1> to vector<2x32xi1>
    %257 = arith.select %256, %252, %207 : vector<2x32xi1>, vector<2x32xf32>
    %cst_74 = arith.constant 0.000000e+00 : f32
    %258 = vector.shape_cast %254 : vector<2x1xi1> to vector<2x1xi1>
    %259 = vector.broadcast %258 : vector<2x1xi1> to vector<2x32xi1>
    %260 = vector.broadcast %cst_74 : f32 to vector<2x32xf32>
    %261 = arith.select %259, %252, %260 : vector<2x32xi1>, vector<2x32xf32>
    %262 = vector.extract_strided_slice %261 {offsets = [0, 0], sizes = [1, 32], strides = [1, 1]} : vector<2x32xf32> to vector<1x32xf32>
    %c0_i32_75 = arith.constant 0 : i32
    %263 = arith.addi %c0_i32_75, %c4_i32 : i32
    %264 = arith.index_cast %263 : i32 to index
    %c0_76 = arith.constant 0 : index
    %265 = vector.load %arg18[%264, %c0_76] : memref<16x32xf32, #tpu.memory_space<vmem>>, vector<1x32xf32>
    tpu.vector_store %arg18[%264, %c0_76], %262 {strides = array<i32>} : memref<16x32xf32, #tpu.memory_space<vmem>>, vector<1x32xf32>,
    %266 = vector.extract_strided_slice %261 {offsets = [1, 0], sizes = [1, 32], strides = [1, 1]} : vector<2x32xf32> to vector<1x32xf32>
    %c8_i32_77 = arith.constant 8 : i32
    %267 = arith.addi %c8_i32_77, %c4_i32 : i32
    %268 = arith.index_cast %267 : i32 to index
    %c0_78 = arith.constant 0 : index
    %269 = vector.load %arg18[%268, %c0_78] : memref<16x32xf32, #tpu.memory_space<vmem>>, vector<1x32xf32>
    tpu.vector_store %arg18[%268, %c0_78], %266 {strides = array<i32>} : memref<16x32xf32, #tpu.memory_space<vmem>>, vector<1x32xf32>,
    %270 = arith.addf %220, %261 : vector<2x32xf32>
    %c5_i32 = arith.constant 5 : i32
    %c2_i32_79 = arith.constant 2 : i32
    %271 = arith.muli %c5_i32, %c2_i32_79 : i32
    %272 = tpu.assume_multiple %271, 2 : i32
    %273 = arith.index_cast %272 : i32 to index
    %c0_80 = arith.constant 0 : index
    %274 = vector.load %arg19[%273, %c0_80] : memref<16x96xf32, #tpu.memory_space<vmem>>, vector<2x96xf32>
    %cst_81 = arith.constant dense<0.000000e+00> : vector<2x96xf32>
    %275 = tpu.matmul %257, %16, %cst_81 {dimension_numbers = #tpu.dot_dimension_numbers<[1], [0], [0], [1], [0, 0, 1, 1], [], []>} : vector<2x32xf32>, vector<32x96xf32>, vector<2x96xf32> -> vector<2x96xf32>
    %276 = vector.extract_strided_slice %274 {offsets = [0, 0], sizes = [2, 32], strides = [1, 1]} : vector<2x96xf32> to vector<2x32xf32>
    %277 = vector.extract_strided_slice %275 {offsets = [0, 0], sizes = [2, 32], strides = [1, 1]} : vector<2x96xf32> to vector<2x32xf32>
    %278 = arith.addf %276, %277 : vector<2x32xf32>
    %279 = arith.negf %278 : vector<2x32xf32>
    %280 = math.exp %279 : vector<2x32xf32>
    %cst_82 = arith.constant 1.000000e+00 : f32
    %281 = vector.broadcast %cst_82 : f32 to vector<2x32xf32>
    %282 = arith.addf %281, %280 : vector<2x32xf32>
    %283 = arith.divf %281, %282 : vector<2x32xf32>
    %284 = vector.extract_strided_slice %274 {offsets = [0, 32], sizes = [2, 32], strides = [1, 1]} : vector<2x96xf32> to vector<2x32xf32>
    %285 = vector.extract_strided_slice %275 {offsets = [0, 32], sizes = [2, 32], strides = [1, 1]} : vector<2x96xf32> to vector<2x32xf32>
    %286 = arith.addf %284, %285 : vector<2x32xf32>
    %287 = arith.negf %286 : vector<2x32xf32>
    %288 = math.exp %287 : vector<2x32xf32>
    %cst_83 = arith.constant 1.000000e+00 : f32
    %289 = vector.broadcast %cst_83 : f32 to vector<2x32xf32>
    %290 = arith.addf %289, %288 : vector<2x32xf32>
    %291 = arith.divf %289, %290 : vector<2x32xf32>
    %292 = vector.extract_strided_slice %274 {offsets = [0, 64], sizes = [2, 32], strides = [1, 1]} : vector<2x96xf32> to vector<2x32xf32>
    %293 = vector.extract_strided_slice %275 {offsets = [0, 64], sizes = [2, 32], strides = [1, 1]} : vector<2x96xf32> to vector<2x32xf32>
    %294 = arith.addf %293, %19 : vector<2x32xf32>
    %295 = arith.mulf %283, %294 : vector<2x32xf32>
    %296 = arith.addf %292, %295 : vector<2x32xf32>
    %297 = math.tanh %296 : vector<2x32xf32>
    %cst_84 = arith.constant 1.000000e+00 : f32
    %298 = vector.broadcast %cst_84 : f32 to vector<2x32xf32>
    %299 = arith.subf %298, %291 : vector<2x32xf32>
    %300 = arith.mulf %299, %297 : vector<2x32xf32>
    %301 = arith.mulf %291, %257 : vector<2x32xf32>
    %302 = arith.addf %300, %301 : vector<2x32xf32>
    %303 = vector.broadcast %c5_i32 : i32 to vector<2x1xi32>
    %304 = arith.cmpi slt, %303, %0 : vector<2x1xi32>
    %305 = vector.shape_cast %304 : vector<2x1xi1> to vector<2x1xi1>
    %306 = vector.broadcast %305 : vector<2x1xi1> to vector<2x32xi1>
    %307 = arith.select %306, %302, %257 : vector<2x32xi1>, vector<2x32xf32>
    %cst_85 = arith.constant 0.000000e+00 : f32
    %308 = vector.shape_cast %304 : vector<2x1xi1> to vector<2x1xi1>
    %309 = vector.broadcast %308 : vector<2x1xi1> to vector<2x32xi1>
    %310 = vector.broadcast %cst_85 : f32 to vector<2x32xf32>
    %311 = arith.select %309, %302, %310 : vector<2x32xi1>, vector<2x32xf32>
    %312 = vector.extract_strided_slice %311 {offsets = [0, 0], sizes = [1, 32], strides = [1, 1]} : vector<2x32xf32> to vector<1x32xf32>
    %c0_i32_86 = arith.constant 0 : i32
    %313 = arith.addi %c0_i32_86, %c5_i32 : i32
    %314 = arith.index_cast %313 : i32 to index
    %c0_87 = arith.constant 0 : index
    %315 = vector.load %arg18[%314, %c0_87] : memref<16x32xf32, #tpu.memory_space<vmem>>, vector<1x32xf32>
    tpu.vector_store %arg18[%314, %c0_87], %312 {strides = array<i32>} : memref<16x32xf32, #tpu.memory_space<vmem>>, vector<1x32xf32>,
    %316 = vector.extract_strided_slice %311 {offsets = [1, 0], sizes = [1, 32], strides = [1, 1]} : vector<2x32xf32> to vector<1x32xf32>
    %c8_i32_88 = arith.constant 8 : i32
    %317 = arith.addi %c8_i32_88, %c5_i32 : i32
    %318 = arith.index_cast %317 : i32 to index
    %c0_89 = arith.constant 0 : index
    %319 = vector.load %arg18[%318, %c0_89] : memref<16x32xf32, #tpu.memory_space<vmem>>, vector<1x32xf32>
    tpu.vector_store %arg18[%318, %c0_89], %316 {strides = array<i32>} : memref<16x32xf32, #tpu.memory_space<vmem>>, vector<1x32xf32>,
    %320 = arith.addf %270, %311 : vector<2x32xf32>
    %c6_i32 = arith.constant 6 : i32
    %c2_i32_90 = arith.constant 2 : i32
    %321 = arith.muli %c6_i32, %c2_i32_90 : i32
    %322 = tpu.assume_multiple %321, 2 : i32
    %323 = arith.index_cast %322 : i32 to index
    %c0_91 = arith.constant 0 : index
    %324 = vector.load %arg19[%323, %c0_91] : memref<16x96xf32, #tpu.memory_space<vmem>>, vector<2x96xf32>
    %cst_92 = arith.constant dense<0.000000e+00> : vector<2x96xf32>
    %325 = tpu.matmul %307, %16, %cst_92 {dimension_numbers = #tpu.dot_dimension_numbers<[1], [0], [0], [1], [0, 0, 1, 1], [], []>} : vector<2x32xf32>, vector<32x96xf32>, vector<2x96xf32> -> vector<2x96xf32>
    %326 = vector.extract_strided_slice %324 {offsets = [0, 0], sizes = [2, 32], strides = [1, 1]} : vector<2x96xf32> to vector<2x32xf32>
    %327 = vector.extract_strided_slice %325 {offsets = [0, 0], sizes = [2, 32], strides = [1, 1]} : vector<2x96xf32> to vector<2x32xf32>
    %328 = arith.addf %326, %327 : vector<2x32xf32>
    %329 = arith.negf %328 : vector<2x32xf32>
    %330 = math.exp %329 : vector<2x32xf32>
    %cst_93 = arith.constant 1.000000e+00 : f32
    %331 = vector.broadcast %cst_93 : f32 to vector<2x32xf32>
    %332 = arith.addf %331, %330 : vector<2x32xf32>
    %333 = arith.divf %331, %332 : vector<2x32xf32>
    %334 = vector.extract_strided_slice %324 {offsets = [0, 32], sizes = [2, 32], strides = [1, 1]} : vector<2x96xf32> to vector<2x32xf32>
    %335 = vector.extract_strided_slice %325 {offsets = [0, 32], sizes = [2, 32], strides = [1, 1]} : vector<2x96xf32> to vector<2x32xf32>
    %336 = arith.addf %334, %335 : vector<2x32xf32>
    %337 = arith.negf %336 : vector<2x32xf32>
    %338 = math.exp %337 : vector<2x32xf32>
    %cst_94 = arith.constant 1.000000e+00 : f32
    %339 = vector.broadcast %cst_94 : f32 to vector<2x32xf32>
    %340 = arith.addf %339, %338 : vector<2x32xf32>
    %341 = arith.divf %339, %340 : vector<2x32xf32>
    %342 = vector.extract_strided_slice %324 {offsets = [0, 64], sizes = [2, 32], strides = [1, 1]} : vector<2x96xf32> to vector<2x32xf32>
    %343 = vector.extract_strided_slice %325 {offsets = [0, 64], sizes = [2, 32], strides = [1, 1]} : vector<2x96xf32> to vector<2x32xf32>
    %344 = arith.addf %343, %19 : vector<2x32xf32>
    %345 = arith.mulf %333, %344 : vector<2x32xf32>
    %346 = arith.addf %342, %345 : vector<2x32xf32>
    %347 = math.tanh %346 : vector<2x32xf32>
    %cst_95 = arith.constant 1.000000e+00 : f32
    %348 = vector.broadcast %cst_95 : f32 to vector<2x32xf32>
    %349 = arith.subf %348, %341 : vector<2x32xf32>
    %350 = arith.mulf %349, %347 : vector<2x32xf32>
    %351 = arith.mulf %341, %307 : vector<2x32xf32>
    %352 = arith.addf %350, %351 : vector<2x32xf32>
    %353 = vector.broadcast %c6_i32 : i32 to vector<2x1xi32>
    %354 = arith.cmpi slt, %353, %0 : vector<2x1xi32>
    %355 = vector.shape_cast %354 : vector<2x1xi1> to vector<2x1xi1>
    %356 = vector.broadcast %355 : vector<2x1xi1> to vector<2x32xi1>
    %357 = arith.select %356, %352, %307 : vector<2x32xi1>, vector<2x32xf32>
    %cst_96 = arith.constant 0.000000e+00 : f32
    %358 = vector.shape_cast %354 : vector<2x1xi1> to vector<2x1xi1>
    %359 = vector.broadcast %358 : vector<2x1xi1> to vector<2x32xi1>
    %360 = vector.broadcast %cst_96 : f32 to vector<2x32xf32>
    %361 = arith.select %359, %352, %360 : vector<2x32xi1>, vector<2x32xf32>
    %362 = vector.extract_strided_slice %361 {offsets = [0, 0], sizes = [1, 32], strides = [1, 1]} : vector<2x32xf32> to vector<1x32xf32>
    %c0_i32_97 = arith.constant 0 : i32
    %363 = arith.addi %c0_i32_97, %c6_i32 : i32
    %364 = arith.index_cast %363 : i32 to index
    %c0_98 = arith.constant 0 : index
    %365 = vector.load %arg18[%364, %c0_98] : memref<16x32xf32, #tpu.memory_space<vmem>>, vector<1x32xf32>
    tpu.vector_store %arg18[%364, %c0_98], %362 {strides = array<i32>} : memref<16x32xf32, #tpu.memory_space<vmem>>, vector<1x32xf32>,
    %366 = vector.extract_strided_slice %361 {offsets = [1, 0], sizes = [1, 32], strides = [1, 1]} : vector<2x32xf32> to vector<1x32xf32>
    %c8_i32_99 = arith.constant 8 : i32
    %367 = arith.addi %c8_i32_99, %c6_i32 : i32
    %368 = arith.index_cast %367 : i32 to index
    %c0_100 = arith.constant 0 : index
    %369 = vector.load %arg18[%368, %c0_100] : memref<16x32xf32, #tpu.memory_space<vmem>>, vector<1x32xf32>
    tpu.vector_store %arg18[%368, %c0_100], %366 {strides = array<i32>} : memref<16x32xf32, #tpu.memory_space<vmem>>, vector<1x32xf32>,
    %370 = arith.addf %320, %361 : vector<2x32xf32>
    %c7_i32 = arith.constant 7 : i32
    %c2_i32_101 = arith.constant 2 : i32
    %371 = arith.muli %c7_i32, %c2_i32_101 : i32
    %372 = tpu.assume_multiple %371, 2 : i32
    %373 = arith.index_cast %372 : i32 to index
    %c0_102 = arith.constant 0 : index
    %374 = vector.load %arg19[%373, %c0_102] : memref<16x96xf32, #tpu.memory_space<vmem>>, vector<2x96xf32>
    %cst_103 = arith.constant dense<0.000000e+00> : vector<2x96xf32>
    %375 = tpu.matmul %357, %16, %cst_103 {dimension_numbers = #tpu.dot_dimension_numbers<[1], [0], [0], [1], [0, 0, 1, 1], [], []>} : vector<2x32xf32>, vector<32x96xf32>, vector<2x96xf32> -> vector<2x96xf32>
    %376 = vector.extract_strided_slice %374 {offsets = [0, 0], sizes = [2, 32], strides = [1, 1]} : vector<2x96xf32> to vector<2x32xf32>
    %377 = vector.extract_strided_slice %375 {offsets = [0, 0], sizes = [2, 32], strides = [1, 1]} : vector<2x96xf32> to vector<2x32xf32>
    %378 = arith.addf %376, %377 : vector<2x32xf32>
    %379 = arith.negf %378 : vector<2x32xf32>
    %380 = math.exp %379 : vector<2x32xf32>
    %cst_104 = arith.constant 1.000000e+00 : f32
    %381 = vector.broadcast %cst_104 : f32 to vector<2x32xf32>
    %382 = arith.addf %381, %380 : vector<2x32xf32>
    %383 = arith.divf %381, %382 : vector<2x32xf32>
    %384 = vector.extract_strided_slice %374 {offsets = [0, 32], sizes = [2, 32], strides = [1, 1]} : vector<2x96xf32> to vector<2x32xf32>
    %385 = vector.extract_strided_slice %375 {offsets = [0, 32], sizes = [2, 32], strides = [1, 1]} : vector<2x96xf32> to vector<2x32xf32>
    %386 = arith.addf %384, %385 : vector<2x32xf32>
    %387 = arith.negf %386 : vector<2x32xf32>
    %388 = math.exp %387 : vector<2x32xf32>
    %cst_105 = arith.constant 1.000000e+00 : f32
    %389 = vector.broadcast %cst_105 : f32 to vector<2x32xf32>
    %390 = arith.addf %389, %388 : vector<2x32xf32>
    %391 = arith.divf %389, %390 : vector<2x32xf32>
    %392 = vector.extract_strided_slice %374 {offsets = [0, 64], sizes = [2, 32], strides = [1, 1]} : vector<2x96xf32> to vector<2x32xf32>
    %393 = vector.extract_strided_slice %375 {offsets = [0, 64], sizes = [2, 32], strides = [1, 1]} : vector<2x96xf32> to vector<2x32xf32>
    %394 = arith.addf %393, %19 : vector<2x32xf32>
    %395 = arith.mulf %383, %394 : vector<2x32xf32>
    %396 = arith.addf %392, %395 : vector<2x32xf32>
    %397 = math.tanh %396 : vector<2x32xf32>
    %cst_106 = arith.constant 1.000000e+00 : f32
    %398 = vector.broadcast %cst_106 : f32 to vector<2x32xf32>
    %399 = arith.subf %398, %391 : vector<2x32xf32>
    %400 = arith.mulf %399, %397 : vector<2x32xf32>
    %401 = arith.mulf %391, %357 : vector<2x32xf32>
    %402 = arith.addf %400, %401 : vector<2x32xf32>
    %403 = vector.broadcast %c7_i32 : i32 to vector<2x1xi32>
    %404 = arith.cmpi slt, %403, %0 : vector<2x1xi32>
    %405 = vector.shape_cast %404 : vector<2x1xi1> to vector<2x1xi1>
    %406 = vector.broadcast %405 : vector<2x1xi1> to vector<2x32xi1>
    %407 = arith.select %406, %402, %357 : vector<2x32xi1>, vector<2x32xf32>
    %cst_107 = arith.constant 0.000000e+00 : f32
    %408 = vector.shape_cast %404 : vector<2x1xi1> to vector<2x1xi1>
    %409 = vector.broadcast %408 : vector<2x1xi1> to vector<2x32xi1>
    %410 = vector.broadcast %cst_107 : f32 to vector<2x32xf32>
    %411 = arith.select %409, %402, %410 : vector<2x32xi1>, vector<2x32xf32>
    %412 = vector.extract_strided_slice %411 {offsets = [0, 0], sizes = [1, 32], strides = [1, 1]} : vector<2x32xf32> to vector<1x32xf32>
    %c0_i32_108 = arith.constant 0 : i32
    %413 = arith.addi %c0_i32_108, %c7_i32 : i32
    %414 = arith.index_cast %413 : i32 to index
    %c0_109 = arith.constant 0 : index
    %415 = vector.load %arg18[%414, %c0_109] : memref<16x32xf32, #tpu.memory_space<vmem>>, vector<1x32xf32>
    tpu.vector_store %arg18[%414, %c0_109], %412 {strides = array<i32>} : memref<16x32xf32, #tpu.memory_space<vmem>>, vector<1x32xf32>,
    %416 = vector.extract_strided_slice %411 {offsets = [1, 0], sizes = [1, 32], strides = [1, 1]} : vector<2x32xf32> to vector<1x32xf32>
    %c8_i32_110 = arith.constant 8 : i32
    %417 = arith.addi %c8_i32_110, %c7_i32 : i32
    %418 = arith.index_cast %417 : i32 to index
    %c0_111 = arith.constant 0 : index
    %419 = vector.load %arg18[%418, %c0_111] : memref<16x32xf32, #tpu.memory_space<vmem>>, vector<1x32xf32>
    tpu.vector_store %arg18[%418, %c0_111], %416 {strides = array<i32>} : memref<16x32xf32, #tpu.memory_space<vmem>>, vector<1x32xf32>,
    %420 = arith.addf %370, %411 : vector<2x32xf32>
    %c8_i32_112 = arith.constant 8 : i32
    %421 = arith.sitofp %0 : vector<2x1xi32> to vector<2x1xf32>
    %422 = vector.broadcast %421 : vector<2x1xf32> to vector<2x32xf32>
    %423 = arith.divf %420, %422 : vector<2x32xf32>
    %c0_113 = arith.constant 0 : index
    %c0_114 = arith.constant 0 : index
    %424 = vector.load %arg16[%c0_113, %c0_114] : memref<2x32xf32, #tpu.memory_space<vmem>>, vector<2x32xf32>
    tpu.vector_store %arg16[%c0_113, %c0_114], %423 {strides = array<i32>} : memref<2x32xf32, #tpu.memory_space<vmem>>, vector<2x32xf32>,
    %c0_115 = arith.constant 0 : index
    %c0_116 = arith.constant 0 : index
    %425 = vector.load %arg14[%c0_115, %c0_116] : memref<32x32xf32, #tpu.memory_space<vmem>>, vector<32x32xf32>
    %c0_117 = arith.constant 0 : index
    %c0_118 = arith.constant 0 : index
    %426 = vector.load %arg15[%c0_117, %c0_118] : memref<1x32xf32, #tpu.memory_space<vmem>>, vector<1x32xf32>
    %c0_119 = arith.constant 0 : index
    %c0_120 = arith.constant 0 : index
    %427 = vector.load %arg11[%c0_119, %c0_120] : memref<32x128xf32, #tpu.memory_space<vmem>>, vector<32x128xf32>
    %c0_121 = arith.constant 0 : index
    %c0_122 = arith.constant 0 : index
    %428 = vector.load %arg10[%c0_121, %c0_122] : memref<32x96xf32, #tpu.memory_space<vmem>>, vector<32x96xf32>
    %c0_123 = arith.constant 0 : index
    %c0_124 = arith.constant 0 : index
    %429 = vector.load %arg13[%c0_123, %c0_124] : memref<1x32xf32, #tpu.memory_space<vmem>>, vector<1x32xf32>
    %430 = vector.shape_cast %429 : vector<1x32xf32> to vector<1x32xf32>
    %431 = vector.broadcast %430 : vector<1x32xf32> to vector<2x32xf32>
    %c0_125 = arith.constant 0 : index
    %c0_126 = arith.constant 0 : index
    %432 = vector.load %arg18[%c0_125, %c0_126] : memref<16x32xf32, #tpu.memory_space<vmem>>, vector<8x32xf32>
    %c8 = arith.constant 8 : index
    %c0_127 = arith.constant 0 : index
    %433 = vector.load %arg18[%c8, %c0_127] : memref<16x32xf32, #tpu.memory_space<vmem>>, vector<8x32xf32>
    %cst_128 = arith.constant dense<0.000000e+00> : vector<8x32xf32>
    %434 = tpu.matmul %432, %425, %cst_128 {dimension_numbers = #tpu.dot_dimension_numbers<[1], [0], [0], [1], [0, 0, 1, 1], [], []>} : vector<8x32xf32>, vector<32x32xf32>, vector<8x32xf32> -> vector<8x32xf32>
    %cst_129 = arith.constant dense<0.000000e+00> : vector<8x32xf32>
    %435 = tpu.matmul %433, %425, %cst_129 {dimension_numbers = #tpu.dot_dimension_numbers<[1], [0], [0], [1], [0, 0, 1, 1], [], []>} : vector<8x32xf32>, vector<32x32xf32>, vector<8x32xf32> -> vector<8x32xf32>
    %c0_i32_130 = arith.constant 0 : i32
    %cst_131 = arith.constant dense<0.000000e+00> : vector<2x128xf32>
    %436 = tpu.matmul %407, %427, %cst_131 {dimension_numbers = #tpu.dot_dimension_numbers<[1], [0], [0], [1], [0, 0, 1, 1], [], []>} : vector<2x32xf32>, vector<32x128xf32>, vector<2x128xf32> -> vector<2x128xf32>
    %437 = vector.extract_strided_slice %436 {offsets = [0, 0], sizes = [2, 32], strides = [1, 1]} : vector<2x128xf32> to vector<2x32xf32>
    %438 = vector.extract_strided_slice %436 {offsets = [0, 32], sizes = [2, 96], strides = [1, 1]} : vector<2x128xf32> to vector<2x96xf32>
    %439 = vector.extract_strided_slice %437 {offsets = [0, 0], sizes = [1, 32], strides = [1, 1]} : vector<2x32xf32> to vector<1x32xf32>
    %440 = vector.broadcast %439 : vector<1x32xf32> to vector<8x32xf32>
    %441 = arith.addf %434, %440 : vector<8x32xf32>
    %442 = math.tanh %441 : vector<8x32xf32>
    %443 = vector.broadcast %426 : vector<1x32xf32> to vector<8x32xf32>
    %444 = arith.mulf %442, %443 : vector<8x32xf32>
    %cst_132 = arith.constant dense<0.000000e+00> : vector<8xf32>
    %445 = vector.multi_reduction <add>, %444, %cst_132 [1] : vector<8x32xf32> to vector<8xf32>
    %446 = vector.shape_cast %445 : vector<8xf32> to vector<8x1xf32>
    %cst_133 = arith.constant dense<0xFF800000> : vector<1xf32>
    %447 = vector.multi_reduction <maximumf>, %446, %cst_133 [0] : vector<8x1xf32> to vector<1xf32>
    %448 = vector.shape_cast %447 : vector<1xf32> to vector<1x1xf32>
    %449 = vector.broadcast %448 : vector<1x1xf32> to vector<8x1xf32>
    %450 = arith.subf %446, %449 : vector<8x1xf32>
    %451 = math.exp %450 : vector<8x1xf32>
    %cst_134 = arith.constant dense<0.000000e+00> : vector<1xf32>
    %452 = vector.multi_reduction <add>, %451, %cst_134 [0] : vector<8x1xf32> to vector<1xf32>
    %453 = vector.shape_cast %452 : vector<1xf32> to vector<1x1xf32>
    %454 = tpu.reciprocal %453 {approx = true} : vector<1x1xf32> -> vector<1x1xf32>
    %455 = vector.broadcast %454 : vector<1x1xf32> to vector<8x1xf32>
    %456 = arith.mulf %451, %455 : vector<8x1xf32>
    %457 = vector.broadcast %456 : vector<8x1xf32> to vector<8x32xf32>
    %458 = arith.mulf %457, %432 : vector<8x32xf32>
    %cst_135 = arith.constant dense<0.000000e+00> : vector<32xf32>
    %459 = vector.multi_reduction <add>, %458, %cst_135 [0] : vector<8x32xf32> to vector<32xf32>
    %460 = vector.shape_cast %459 : vector<32xf32> to vector<1x32xf32>
    %461 = vector.extract_strided_slice %437 {offsets = [1, 0], sizes = [1, 32], strides = [1, 1]} : vector<2x32xf32> to vector<1x32xf32>
    %462 = vector.broadcast %461 : vector<1x32xf32> to vector<8x32xf32>
    %463 = arith.addf %435, %462 : vector<8x32xf32>
    %464 = math.tanh %463 : vector<8x32xf32>
    %465 = vector.broadcast %426 : vector<1x32xf32> to vector<8x32xf32>
    %466 = arith.mulf %464, %465 : vector<8x32xf32>
    %cst_136 = arith.constant dense<0.000000e+00> : vector<8xf32>
    %467 = vector.multi_reduction <add>, %466, %cst_136 [1] : vector<8x32xf32> to vector<8xf32>
    %468 = vector.shape_cast %467 : vector<8xf32> to vector<8x1xf32>
    %cst_137 = arith.constant dense<0xFF800000> : vector<1xf32>
    %469 = vector.multi_reduction <maximumf>, %468, %cst_137 [0] : vector<8x1xf32> to vector<1xf32>
    %470 = vector.shape_cast %469 : vector<1xf32> to vector<1x1xf32>
    %471 = vector.broadcast %470 : vector<1x1xf32> to vector<8x1xf32>
    %472 = arith.subf %468, %471 : vector<8x1xf32>
    %473 = math.exp %472 : vector<8x1xf32>
    %cst_138 = arith.constant dense<0.000000e+00> : vector<1xf32>
    %474 = vector.multi_reduction <add>, %473, %cst_138 [0] : vector<8x1xf32> to vector<1xf32>
    %475 = vector.shape_cast %474 : vector<1xf32> to vector<1x1xf32>
    %476 = tpu.reciprocal %475 {approx = true} : vector<1x1xf32> -> vector<1x1xf32>
    %477 = vector.broadcast %476 : vector<1x1xf32> to vector<8x1xf32>
    %478 = arith.mulf %473, %477 : vector<8x1xf32>
    %479 = vector.broadcast %478 : vector<8x1xf32> to vector<8x32xf32>
    %480 = arith.mulf %479, %433 : vector<8x32xf32>
    %cst_139 = arith.constant dense<0.000000e+00> : vector<32xf32>
    %481 = vector.multi_reduction <add>, %480, %cst_139 [0] : vector<8x32xf32> to vector<32xf32>
    %482 = vector.shape_cast %481 : vector<32xf32> to vector<1x32xf32>
    %483 = tpu.concatenate %460, %482 in 0 : vector<1x32xf32>, vector<1x32xf32> -> vector<2x32xf32>
    %c2_i32_140 = arith.constant 2 : i32
    %484 = arith.muli %c0_i32_130, %c2_i32_140 : i32
    %485 = tpu.assume_multiple %484, 2 : i32
    %486 = arith.index_cast %485 : i32 to index
    %c0_141 = arith.constant 0 : index
    %487 = vector.load %arg20[%486, %c0_141] : memref<12x96xf32, #tpu.memory_space<vmem>>, vector<2x96xf32>
    %cst_142 = arith.constant dense<0.000000e+00> : vector<2x96xf32>
    %488 = tpu.matmul %483, %428, %cst_142 {dimension_numbers = #tpu.dot_dimension_numbers<[1], [0], [0], [1], [0, 0, 1, 1], [], []>} : vector<2x32xf32>, vector<32x96xf32>, vector<2x96xf32> -> vector<2x96xf32>
    %489 = arith.addf %487, %488 : vector<2x96xf32>
    %490 = vector.extract_strided_slice %489 {offsets = [0, 0], sizes = [2, 32], strides = [1, 1]} : vector<2x96xf32> to vector<2x32xf32>
    %491 = vector.extract_strided_slice %438 {offsets = [0, 0], sizes = [2, 32], strides = [1, 1]} : vector<2x96xf32> to vector<2x32xf32>
    %492 = arith.addf %490, %491 : vector<2x32xf32>
    %493 = arith.negf %492 : vector<2x32xf32>
    %494 = math.exp %493 : vector<2x32xf32>
    %cst_143 = arith.constant 1.000000e+00 : f32
    %495 = vector.broadcast %cst_143 : f32 to vector<2x32xf32>
    %496 = arith.addf %495, %494 : vector<2x32xf32>
    %497 = arith.divf %495, %496 : vector<2x32xf32>
    %498 = vector.extract_strided_slice %489 {offsets = [0, 32], sizes = [2, 32], strides = [1, 1]} : vector<2x96xf32> to vector<2x32xf32>
    %499 = vector.extract_strided_slice %438 {offsets = [0, 32], sizes = [2, 32], strides = [1, 1]} : vector<2x96xf32> to vector<2x32xf32>
    %500 = arith.addf %498, %499 : vector<2x32xf32>
    %501 = arith.negf %500 : vector<2x32xf32>
    %502 = math.exp %501 : vector<2x32xf32>
    %cst_144 = arith.constant 1.000000e+00 : f32
    %503 = vector.broadcast %cst_144 : f32 to vector<2x32xf32>
    %504 = arith.addf %503, %502 : vector<2x32xf32>
    %505 = arith.divf %503, %504 : vector<2x32xf32>
    %506 = vector.extract_strided_slice %489 {offsets = [0, 64], sizes = [2, 32], strides = [1, 1]} : vector<2x96xf32> to vector<2x32xf32>
    %507 = vector.extract_strided_slice %438 {offsets = [0, 64], sizes = [2, 32], strides = [1, 1]} : vector<2x96xf32> to vector<2x32xf32>
    %508 = arith.addf %507, %431 : vector<2x32xf32>
    %509 = arith.mulf %497, %508 : vector<2x32xf32>
    %510 = arith.addf %506, %509 : vector<2x32xf32>
    %511 = math.tanh %510 : vector<2x32xf32>
    %cst_145 = arith.constant 1.000000e+00 : f32
    %512 = vector.broadcast %cst_145 : f32 to vector<2x32xf32>
    %513 = arith.subf %512, %505 : vector<2x32xf32>
    %514 = arith.mulf %513, %511 : vector<2x32xf32>
    %515 = arith.mulf %505, %407 : vector<2x32xf32>
    %516 = arith.addf %514, %515 : vector<2x32xf32>
    %517 = vector.broadcast %c0_i32_130 : i32 to vector<2x1xi32>
    %518 = arith.cmpi slt, %1, %517 : vector<2x1xi32>
    %519 = vector.shape_cast %518 : vector<2x1xi1> to vector<2x1xi1>
    %520 = vector.broadcast %519 : vector<2x1xi1> to vector<2x32xi1>
    %521 = arith.select %520, %407, %516 : vector<2x32xi1>, vector<2x32xf32>
    %cst_146 = arith.constant 0.000000e+00 : f32
    %522 = vector.shape_cast %518 : vector<2x1xi1> to vector<2x1xi1>
    %523 = vector.broadcast %522 : vector<2x1xi1> to vector<2x32xi1>
    %524 = vector.broadcast %cst_146 : f32 to vector<2x32xf32>
    %525 = arith.select %523, %524, %521 : vector<2x32xi1>, vector<2x32xf32>
    %526 = arith.addf %20, %525 : vector<2x32xf32>
    %c1_i32_147 = arith.constant 1 : i32
    %cst_148 = arith.constant dense<0.000000e+00> : vector<2x128xf32>
    %527 = tpu.matmul %521, %427, %cst_148 {dimension_numbers = #tpu.dot_dimension_numbers<[1], [0], [0], [1], [0, 0, 1, 1], [], []>} : vector<2x32xf32>, vector<32x128xf32>, vector<2x128xf32> -> vector<2x128xf32>
    %528 = vector.extract_strided_slice %527 {offsets = [0, 0], sizes = [2, 32], strides = [1, 1]} : vector<2x128xf32> to vector<2x32xf32>
    %529 = vector.extract_strided_slice %527 {offsets = [0, 32], sizes = [2, 96], strides = [1, 1]} : vector<2x128xf32> to vector<2x96xf32>
    %530 = vector.extract_strided_slice %528 {offsets = [0, 0], sizes = [1, 32], strides = [1, 1]} : vector<2x32xf32> to vector<1x32xf32>
    %531 = vector.broadcast %530 : vector<1x32xf32> to vector<8x32xf32>
    %532 = arith.addf %434, %531 : vector<8x32xf32>
    %533 = math.tanh %532 : vector<8x32xf32>
    %534 = vector.broadcast %426 : vector<1x32xf32> to vector<8x32xf32>
    %535 = arith.mulf %533, %534 : vector<8x32xf32>
    %cst_149 = arith.constant dense<0.000000e+00> : vector<8xf32>
    %536 = vector.multi_reduction <add>, %535, %cst_149 [1] : vector<8x32xf32> to vector<8xf32>
    %537 = vector.shape_cast %536 : vector<8xf32> to vector<8x1xf32>
    %cst_150 = arith.constant dense<0xFF800000> : vector<1xf32>
    %538 = vector.multi_reduction <maximumf>, %537, %cst_150 [0] : vector<8x1xf32> to vector<1xf32>
    %539 = vector.shape_cast %538 : vector<1xf32> to vector<1x1xf32>
    %540 = vector.broadcast %539 : vector<1x1xf32> to vector<8x1xf32>
    %541 = arith.subf %537, %540 : vector<8x1xf32>
    %542 = math.exp %541 : vector<8x1xf32>
    %cst_151 = arith.constant dense<0.000000e+00> : vector<1xf32>
    %543 = vector.multi_reduction <add>, %542, %cst_151 [0] : vector<8x1xf32> to vector<1xf32>
    %544 = vector.shape_cast %543 : vector<1xf32> to vector<1x1xf32>
    %545 = tpu.reciprocal %544 {approx = true} : vector<1x1xf32> -> vector<1x1xf32>
    %546 = vector.broadcast %545 : vector<1x1xf32> to vector<8x1xf32>
    %547 = arith.mulf %542, %546 : vector<8x1xf32>
    %548 = vector.broadcast %547 : vector<8x1xf32> to vector<8x32xf32>
    %549 = arith.mulf %548, %432 : vector<8x32xf32>
    %cst_152 = arith.constant dense<0.000000e+00> : vector<32xf32>
    %550 = vector.multi_reduction <add>, %549, %cst_152 [0] : vector<8x32xf32> to vector<32xf32>
    %551 = vector.shape_cast %550 : vector<32xf32> to vector<1x32xf32>
    %552 = vector.extract_strided_slice %528 {offsets = [1, 0], sizes = [1, 32], strides = [1, 1]} : vector<2x32xf32> to vector<1x32xf32>
    %553 = vector.broadcast %552 : vector<1x32xf32> to vector<8x32xf32>
    %554 = arith.addf %435, %553 : vector<8x32xf32>
    %555 = math.tanh %554 : vector<8x32xf32>
    %556 = vector.broadcast %426 : vector<1x32xf32> to vector<8x32xf32>
    %557 = arith.mulf %555, %556 : vector<8x32xf32>
    %cst_153 = arith.constant dense<0.000000e+00> : vector<8xf32>
    %558 = vector.multi_reduction <add>, %557, %cst_153 [1] : vector<8x32xf32> to vector<8xf32>
    %559 = vector.shape_cast %558 : vector<8xf32> to vector<8x1xf32>
    %cst_154 = arith.constant dense<0xFF800000> : vector<1xf32>
    %560 = vector.multi_reduction <maximumf>, %559, %cst_154 [0] : vector<8x1xf32> to vector<1xf32>
    %561 = vector.shape_cast %560 : vector<1xf32> to vector<1x1xf32>
    %562 = vector.broadcast %561 : vector<1x1xf32> to vector<8x1xf32>
    %563 = arith.subf %559, %562 : vector<8x1xf32>
    %564 = math.exp %563 : vector<8x1xf32>
    %cst_155 = arith.constant dense<0.000000e+00> : vector<1xf32>
    %565 = vector.multi_reduction <add>, %564, %cst_155 [0] : vector<8x1xf32> to vector<1xf32>
    %566 = vector.shape_cast %565 : vector<1xf32> to vector<1x1xf32>
    %567 = tpu.reciprocal %566 {approx = true} : vector<1x1xf32> -> vector<1x1xf32>
    %568 = vector.broadcast %567 : vector<1x1xf32> to vector<8x1xf32>
    %569 = arith.mulf %564, %568 : vector<8x1xf32>
    %570 = vector.broadcast %569 : vector<8x1xf32> to vector<8x32xf32>
    %571 = arith.mulf %570, %433 : vector<8x32xf32>
    %cst_156 = arith.constant dense<0.000000e+00> : vector<32xf32>
    %572 = vector.multi_reduction <add>, %571, %cst_156 [0] : vector<8x32xf32> to vector<32xf32>
    %573 = vector.shape_cast %572 : vector<32xf32> to vector<1x32xf32>
    %574 = tpu.concatenate %551, %573 in 0 : vector<1x32xf32>, vector<1x32xf32> -> vector<2x32xf32>
    %c2_i32_157 = arith.constant 2 : i32
    %575 = arith.muli %c1_i32_147, %c2_i32_157 : i32
    %576 = tpu.assume_multiple %575, 2 : i32
    %577 = arith.index_cast %576 : i32 to index
    %c0_158 = arith.constant 0 : index
    %578 = vector.load %arg20[%577, %c0_158] : memref<12x96xf32, #tpu.memory_space<vmem>>, vector<2x96xf32>
    %cst_159 = arith.constant dense<0.000000e+00> : vector<2x96xf32>
    %579 = tpu.matmul %574, %428, %cst_159 {dimension_numbers = #tpu.dot_dimension_numbers<[1], [0], [0], [1], [0, 0, 1, 1], [], []>} : vector<2x32xf32>, vector<32x96xf32>, vector<2x96xf32> -> vector<2x96xf32>
    %580 = arith.addf %578, %579 : vector<2x96xf32>
    %581 = vector.extract_strided_slice %580 {offsets = [0, 0], sizes = [2, 32], strides = [1, 1]} : vector<2x96xf32> to vector<2x32xf32>
    %582 = vector.extract_strided_slice %529 {offsets = [0, 0], sizes = [2, 32], strides = [1, 1]} : vector<2x96xf32> to vector<2x32xf32>
    %583 = arith.addf %581, %582 : vector<2x32xf32>
    %584 = arith.negf %583 : vector<2x32xf32>
    %585 = math.exp %584 : vector<2x32xf32>
    %cst_160 = arith.constant 1.000000e+00 : f32
    %586 = vector.broadcast %cst_160 : f32 to vector<2x32xf32>
    %587 = arith.addf %586, %585 : vector<2x32xf32>
    %588 = arith.divf %586, %587 : vector<2x32xf32>
    %589 = vector.extract_strided_slice %580 {offsets = [0, 32], sizes = [2, 32], strides = [1, 1]} : vector<2x96xf32> to vector<2x32xf32>
    %590 = vector.extract_strided_slice %529 {offsets = [0, 32], sizes = [2, 32], strides = [1, 1]} : vector<2x96xf32> to vector<2x32xf32>
    %591 = arith.addf %589, %590 : vector<2x32xf32>
    %592 = arith.negf %591 : vector<2x32xf32>
    %593 = math.exp %592 : vector<2x32xf32>
    %cst_161 = arith.constant 1.000000e+00 : f32
    %594 = vector.broadcast %cst_161 : f32 to vector<2x32xf32>
    %595 = arith.addf %594, %593 : vector<2x32xf32>
    %596 = arith.divf %594, %595 : vector<2x32xf32>
    %597 = vector.extract_strided_slice %580 {offsets = [0, 64], sizes = [2, 32], strides = [1, 1]} : vector<2x96xf32> to vector<2x32xf32>
    %598 = vector.extract_strided_slice %529 {offsets = [0, 64], sizes = [2, 32], strides = [1, 1]} : vector<2x96xf32> to vector<2x32xf32>
    %599 = arith.addf %598, %431 : vector<2x32xf32>
    %600 = arith.mulf %588, %599 : vector<2x32xf32>
    %601 = arith.addf %597, %600 : vector<2x32xf32>
    %602 = math.tanh %601 : vector<2x32xf32>
    %cst_162 = arith.constant 1.000000e+00 : f32
    %603 = vector.broadcast %cst_162 : f32 to vector<2x32xf32>
    %604 = arith.subf %603, %596 : vector<2x32xf32>
    %605 = arith.mulf %604, %602 : vector<2x32xf32>
    %606 = arith.mulf %596, %521 : vector<2x32xf32>
    %607 = arith.addf %605, %606 : vector<2x32xf32>
    %608 = vector.broadcast %c1_i32_147 : i32 to vector<2x1xi32>
    %609 = arith.cmpi slt, %1, %608 : vector<2x1xi32>
    %610 = vector.shape_cast %609 : vector<2x1xi1> to vector<2x1xi1>
    %611 = vector.broadcast %610 : vector<2x1xi1> to vector<2x32xi1>
    %612 = arith.select %611, %521, %607 : vector<2x32xi1>, vector<2x32xf32>
    %cst_163 = arith.constant 0.000000e+00 : f32
    %613 = vector.shape_cast %609 : vector<2x1xi1> to vector<2x1xi1>
    %614 = vector.broadcast %613 : vector<2x1xi1> to vector<2x32xi1>
    %615 = vector.broadcast %cst_163 : f32 to vector<2x32xf32>
    %616 = arith.select %614, %615, %612 : vector<2x32xi1>, vector<2x32xf32>
    %617 = arith.addf %526, %616 : vector<2x32xf32>
    %c2_i32_164 = arith.constant 2 : i32
    %cst_165 = arith.constant dense<0.000000e+00> : vector<2x128xf32>
    %618 = tpu.matmul %612, %427, %cst_165 {dimension_numbers = #tpu.dot_dimension_numbers<[1], [0], [0], [1], [0, 0, 1, 1], [], []>} : vector<2x32xf32>, vector<32x128xf32>, vector<2x128xf32> -> vector<2x128xf32>
    %619 = vector.extract_strided_slice %618 {offsets = [0, 0], sizes = [2, 32], strides = [1, 1]} : vector<2x128xf32> to vector<2x32xf32>
    %620 = vector.extract_strided_slice %618 {offsets = [0, 32], sizes = [2, 96], strides = [1, 1]} : vector<2x128xf32> to vector<2x96xf32>
    %621 = vector.extract_strided_slice %619 {offsets = [0, 0], sizes = [1, 32], strides = [1, 1]} : vector<2x32xf32> to vector<1x32xf32>
    %622 = vector.broadcast %621 : vector<1x32xf32> to vector<8x32xf32>
    %623 = arith.addf %434, %622 : vector<8x32xf32>
    %624 = math.tanh %623 : vector<8x32xf32>
    %625 = vector.broadcast %426 : vector<1x32xf32> to vector<8x32xf32>
    %626 = arith.mulf %624, %625 : vector<8x32xf32>
    %cst_166 = arith.constant dense<0.000000e+00> : vector<8xf32>
    %627 = vector.multi_reduction <add>, %626, %cst_166 [1] : vector<8x32xf32> to vector<8xf32>
    %628 = vector.shape_cast %627 : vector<8xf32> to vector<8x1xf32>
    %cst_167 = arith.constant dense<0xFF800000> : vector<1xf32>
    %629 = vector.multi_reduction <maximumf>, %628, %cst_167 [0] : vector<8x1xf32> to vector<1xf32>
    %630 = vector.shape_cast %629 : vector<1xf32> to vector<1x1xf32>
    %631 = vector.broadcast %630 : vector<1x1xf32> to vector<8x1xf32>
    %632 = arith.subf %628, %631 : vector<8x1xf32>
    %633 = math.exp %632 : vector<8x1xf32>
    %cst_168 = arith.constant dense<0.000000e+00> : vector<1xf32>
    %634 = vector.multi_reduction <add>, %633, %cst_168 [0] : vector<8x1xf32> to vector<1xf32>
    %635 = vector.shape_cast %634 : vector<1xf32> to vector<1x1xf32>
    %636 = tpu.reciprocal %635 {approx = true} : vector<1x1xf32> -> vector<1x1xf32>
    %637 = vector.broadcast %636 : vector<1x1xf32> to vector<8x1xf32>
    %638 = arith.mulf %633, %637 : vector<8x1xf32>
    %639 = vector.broadcast %638 : vector<8x1xf32> to vector<8x32xf32>
    %640 = arith.mulf %639, %432 : vector<8x32xf32>
    %cst_169 = arith.constant dense<0.000000e+00> : vector<32xf32>
    %641 = vector.multi_reduction <add>, %640, %cst_169 [0] : vector<8x32xf32> to vector<32xf32>
    %642 = vector.shape_cast %641 : vector<32xf32> to vector<1x32xf32>
    %643 = vector.extract_strided_slice %619 {offsets = [1, 0], sizes = [1, 32], strides = [1, 1]} : vector<2x32xf32> to vector<1x32xf32>
    %644 = vector.broadcast %643 : vector<1x32xf32> to vector<8x32xf32>
    %645 = arith.addf %435, %644 : vector<8x32xf32>
    %646 = math.tanh %645 : vector<8x32xf32>
    %647 = vector.broadcast %426 : vector<1x32xf32> to vector<8x32xf32>
    %648 = arith.mulf %646, %647 : vector<8x32xf32>
    %cst_170 = arith.constant dense<0.000000e+00> : vector<8xf32>
    %649 = vector.multi_reduction <add>, %648, %cst_170 [1] : vector<8x32xf32> to vector<8xf32>
    %650 = vector.shape_cast %649 : vector<8xf32> to vector<8x1xf32>
    %cst_171 = arith.constant dense<0xFF800000> : vector<1xf32>
    %651 = vector.multi_reduction <maximumf>, %650, %cst_171 [0] : vector<8x1xf32> to vector<1xf32>
    %652 = vector.shape_cast %651 : vector<1xf32> to vector<1x1xf32>
    %653 = vector.broadcast %652 : vector<1x1xf32> to vector<8x1xf32>
    %654 = arith.subf %650, %653 : vector<8x1xf32>
    %655 = math.exp %654 : vector<8x1xf32>
    %cst_172 = arith.constant dense<0.000000e+00> : vector<1xf32>
    %656 = vector.multi_reduction <add>, %655, %cst_172 [0] : vector<8x1xf32> to vector<1xf32>
    %657 = vector.shape_cast %656 : vector<1xf32> to vector<1x1xf32>
    %658 = tpu.reciprocal %657 {approx = true} : vector<1x1xf32> -> vector<1x1xf32>
    %659 = vector.broadcast %658 : vector<1x1xf32> to vector<8x1xf32>
    %660 = arith.mulf %655, %659 : vector<8x1xf32>
    %661 = vector.broadcast %660 : vector<8x1xf32> to vector<8x32xf32>
    %662 = arith.mulf %661, %433 : vector<8x32xf32>
    %cst_173 = arith.constant dense<0.000000e+00> : vector<32xf32>
    %663 = vector.multi_reduction <add>, %662, %cst_173 [0] : vector<8x32xf32> to vector<32xf32>
    %664 = vector.shape_cast %663 : vector<32xf32> to vector<1x32xf32>
    %665 = tpu.concatenate %642, %664 in 0 : vector<1x32xf32>, vector<1x32xf32> -> vector<2x32xf32>
    %c2_i32_174 = arith.constant 2 : i32
    %666 = arith.muli %c2_i32_164, %c2_i32_174 : i32
    %667 = tpu.assume_multiple %666, 2 : i32
    %668 = arith.index_cast %667 : i32 to index
    %c0_175 = arith.constant 0 : index
    %669 = vector.load %arg20[%668, %c0_175] : memref<12x96xf32, #tpu.memory_space<vmem>>, vector<2x96xf32>
    %cst_176 = arith.constant dense<0.000000e+00> : vector<2x96xf32>
    %670 = tpu.matmul %665, %428, %cst_176 {dimension_numbers = #tpu.dot_dimension_numbers<[1], [0], [0], [1], [0, 0, 1, 1], [], []>} : vector<2x32xf32>, vector<32x96xf32>, vector<2x96xf32> -> vector<2x96xf32>
    %671 = arith.addf %669, %670 : vector<2x96xf32>
    %672 = vector.extract_strided_slice %671 {offsets = [0, 0], sizes = [2, 32], strides = [1, 1]} : vector<2x96xf32> to vector<2x32xf32>
    %673 = vector.extract_strided_slice %620 {offsets = [0, 0], sizes = [2, 32], strides = [1, 1]} : vector<2x96xf32> to vector<2x32xf32>
    %674 = arith.addf %672, %673 : vector<2x32xf32>
    %675 = arith.negf %674 : vector<2x32xf32>
    %676 = math.exp %675 : vector<2x32xf32>
    %cst_177 = arith.constant 1.000000e+00 : f32
    %677 = vector.broadcast %cst_177 : f32 to vector<2x32xf32>
    %678 = arith.addf %677, %676 : vector<2x32xf32>
    %679 = arith.divf %677, %678 : vector<2x32xf32>
    %680 = vector.extract_strided_slice %671 {offsets = [0, 32], sizes = [2, 32], strides = [1, 1]} : vector<2x96xf32> to vector<2x32xf32>
    %681 = vector.extract_strided_slice %620 {offsets = [0, 32], sizes = [2, 32], strides = [1, 1]} : vector<2x96xf32> to vector<2x32xf32>
    %682 = arith.addf %680, %681 : vector<2x32xf32>
    %683 = arith.negf %682 : vector<2x32xf32>
    %684 = math.exp %683 : vector<2x32xf32>
    %cst_178 = arith.constant 1.000000e+00 : f32
    %685 = vector.broadcast %cst_178 : f32 to vector<2x32xf32>
    %686 = arith.addf %685, %684 : vector<2x32xf32>
    %687 = arith.divf %685, %686 : vector<2x32xf32>
    %688 = vector.extract_strided_slice %671 {offsets = [0, 64], sizes = [2, 32], strides = [1, 1]} : vector<2x96xf32> to vector<2x32xf32>
    %689 = vector.extract_strided_slice %620 {offsets = [0, 64], sizes = [2, 32], strides = [1, 1]} : vector<2x96xf32> to vector<2x32xf32>
    %690 = arith.addf %689, %431 : vector<2x32xf32>
    %691 = arith.mulf %679, %690 : vector<2x32xf32>
    %692 = arith.addf %688, %691 : vector<2x32xf32>
    %693 = math.tanh %692 : vector<2x32xf32>
    %cst_179 = arith.constant 1.000000e+00 : f32
    %694 = vector.broadcast %cst_179 : f32 to vector<2x32xf32>
    %695 = arith.subf %694, %687 : vector<2x32xf32>
    %696 = arith.mulf %695, %693 : vector<2x32xf32>
    %697 = arith.mulf %687, %612 : vector<2x32xf32>
    %698 = arith.addf %696, %697 : vector<2x32xf32>
    %699 = vector.broadcast %c2_i32_164 : i32 to vector<2x1xi32>
    %700 = arith.cmpi slt, %1, %699 : vector<2x1xi32>
    %701 = vector.shape_cast %700 : vector<2x1xi1> to vector<2x1xi1>
    %702 = vector.broadcast %701 : vector<2x1xi1> to vector<2x32xi1>
    %703 = arith.select %702, %612, %698 : vector<2x32xi1>, vector<2x32xf32>
    %cst_180 = arith.constant 0.000000e+00 : f32
    %704 = vector.shape_cast %700 : vector<2x1xi1> to vector<2x1xi1>
    %705 = vector.broadcast %704 : vector<2x1xi1> to vector<2x32xi1>
    %706 = vector.broadcast %cst_180 : f32 to vector<2x32xf32>
    %707 = arith.select %705, %706, %703 : vector<2x32xi1>, vector<2x32xf32>
    %708 = arith.addf %617, %707 : vector<2x32xf32>
    %c3_i32_181 = arith.constant 3 : i32
    %cst_182 = arith.constant dense<0.000000e+00> : vector<2x128xf32>
    %709 = tpu.matmul %703, %427, %cst_182 {dimension_numbers = #tpu.dot_dimension_numbers<[1], [0], [0], [1], [0, 0, 1, 1], [], []>} : vector<2x32xf32>, vector<32x128xf32>, vector<2x128xf32> -> vector<2x128xf32>
    %710 = vector.extract_strided_slice %709 {offsets = [0, 0], sizes = [2, 32], strides = [1, 1]} : vector<2x128xf32> to vector<2x32xf32>
    %711 = vector.extract_strided_slice %709 {offsets = [0, 32], sizes = [2, 96], strides = [1, 1]} : vector<2x128xf32> to vector<2x96xf32>
    %712 = vector.extract_strided_slice %710 {offsets = [0, 0], sizes = [1, 32], strides = [1, 1]} : vector<2x32xf32> to vector<1x32xf32>
    %713 = vector.broadcast %712 : vector<1x32xf32> to vector<8x32xf32>
    %714 = arith.addf %434, %713 : vector<8x32xf32>
    %715 = math.tanh %714 : vector<8x32xf32>
    %716 = vector.broadcast %426 : vector<1x32xf32> to vector<8x32xf32>
    %717 = arith.mulf %715, %716 : vector<8x32xf32>
    %cst_183 = arith.constant dense<0.000000e+00> : vector<8xf32>
    %718 = vector.multi_reduction <add>, %717, %cst_183 [1] : vector<8x32xf32> to vector<8xf32>
    %719 = vector.shape_cast %718 : vector<8xf32> to vector<8x1xf32>
    %cst_184 = arith.constant dense<0xFF800000> : vector<1xf32>
    %720 = vector.multi_reduction <maximumf>, %719, %cst_184 [0] : vector<8x1xf32> to vector<1xf32>
    %721 = vector.shape_cast %720 : vector<1xf32> to vector<1x1xf32>
    %722 = vector.broadcast %721 : vector<1x1xf32> to vector<8x1xf32>
    %723 = arith.subf %719, %722 : vector<8x1xf32>
    %724 = math.exp %723 : vector<8x1xf32>
    %cst_185 = arith.constant dense<0.000000e+00> : vector<1xf32>
    %725 = vector.multi_reduction <add>, %724, %cst_185 [0] : vector<8x1xf32> to vector<1xf32>
    %726 = vector.shape_cast %725 : vector<1xf32> to vector<1x1xf32>
    %727 = tpu.reciprocal %726 {approx = true} : vector<1x1xf32> -> vector<1x1xf32>
    %728 = vector.broadcast %727 : vector<1x1xf32> to vector<8x1xf32>
    %729 = arith.mulf %724, %728 : vector<8x1xf32>
    %730 = vector.broadcast %729 : vector<8x1xf32> to vector<8x32xf32>
    %731 = arith.mulf %730, %432 : vector<8x32xf32>
    %cst_186 = arith.constant dense<0.000000e+00> : vector<32xf32>
    %732 = vector.multi_reduction <add>, %731, %cst_186 [0] : vector<8x32xf32> to vector<32xf32>
    %733 = vector.shape_cast %732 : vector<32xf32> to vector<1x32xf32>
    %734 = vector.extract_strided_slice %710 {offsets = [1, 0], sizes = [1, 32], strides = [1, 1]} : vector<2x32xf32> to vector<1x32xf32>
    %735 = vector.broadcast %734 : vector<1x32xf32> to vector<8x32xf32>
    %736 = arith.addf %435, %735 : vector<8x32xf32>
    %737 = math.tanh %736 : vector<8x32xf32>
    %738 = vector.broadcast %426 : vector<1x32xf32> to vector<8x32xf32>
    %739 = arith.mulf %737, %738 : vector<8x32xf32>
    %cst_187 = arith.constant dense<0.000000e+00> : vector<8xf32>
    %740 = vector.multi_reduction <add>, %739, %cst_187 [1] : vector<8x32xf32> to vector<8xf32>
    %741 = vector.shape_cast %740 : vector<8xf32> to vector<8x1xf32>
    %cst_188 = arith.constant dense<0xFF800000> : vector<1xf32>
    %742 = vector.multi_reduction <maximumf>, %741, %cst_188 [0] : vector<8x1xf32> to vector<1xf32>
    %743 = vector.shape_cast %742 : vector<1xf32> to vector<1x1xf32>
    %744 = vector.broadcast %743 : vector<1x1xf32> to vector<8x1xf32>
    %745 = arith.subf %741, %744 : vector<8x1xf32>
    %746 = math.exp %745 : vector<8x1xf32>
    %cst_189 = arith.constant dense<0.000000e+00> : vector<1xf32>
    %747 = vector.multi_reduction <add>, %746, %cst_189 [0] : vector<8x1xf32> to vector<1xf32>
    %748 = vector.shape_cast %747 : vector<1xf32> to vector<1x1xf32>
    %749 = tpu.reciprocal %748 {approx = true} : vector<1x1xf32> -> vector<1x1xf32>
    %750 = vector.broadcast %749 : vector<1x1xf32> to vector<8x1xf32>
    %751 = arith.mulf %746, %750 : vector<8x1xf32>
    %752 = vector.broadcast %751 : vector<8x1xf32> to vector<8x32xf32>
    %753 = arith.mulf %752, %433 : vector<8x32xf32>
    %cst_190 = arith.constant dense<0.000000e+00> : vector<32xf32>
    %754 = vector.multi_reduction <add>, %753, %cst_190 [0] : vector<8x32xf32> to vector<32xf32>
    %755 = vector.shape_cast %754 : vector<32xf32> to vector<1x32xf32>
    %756 = tpu.concatenate %733, %755 in 0 : vector<1x32xf32>, vector<1x32xf32> -> vector<2x32xf32>
    %c2_i32_191 = arith.constant 2 : i32
    %757 = arith.muli %c3_i32_181, %c2_i32_191 : i32
    %758 = tpu.assume_multiple %757, 2 : i32
    %759 = arith.index_cast %758 : i32 to index
    %c0_192 = arith.constant 0 : index
    %760 = vector.load %arg20[%759, %c0_192] : memref<12x96xf32, #tpu.memory_space<vmem>>, vector<2x96xf32>
    %cst_193 = arith.constant dense<0.000000e+00> : vector<2x96xf32>
    %761 = tpu.matmul %756, %428, %cst_193 {dimension_numbers = #tpu.dot_dimension_numbers<[1], [0], [0], [1], [0, 0, 1, 1], [], []>} : vector<2x32xf32>, vector<32x96xf32>, vector<2x96xf32> -> vector<2x96xf32>
    %762 = arith.addf %760, %761 : vector<2x96xf32>
    %763 = vector.extract_strided_slice %762 {offsets = [0, 0], sizes = [2, 32], strides = [1, 1]} : vector<2x96xf32> to vector<2x32xf32>
    %764 = vector.extract_strided_slice %711 {offsets = [0, 0], sizes = [2, 32], strides = [1, 1]} : vector<2x96xf32> to vector<2x32xf32>
    %765 = arith.addf %763, %764 : vector<2x32xf32>
    %766 = arith.negf %765 : vector<2x32xf32>
    %767 = math.exp %766 : vector<2x32xf32>
    %cst_194 = arith.constant 1.000000e+00 : f32
    %768 = vector.broadcast %cst_194 : f32 to vector<2x32xf32>
    %769 = arith.addf %768, %767 : vector<2x32xf32>
    %770 = arith.divf %768, %769 : vector<2x32xf32>
    %771 = vector.extract_strided_slice %762 {offsets = [0, 32], sizes = [2, 32], strides = [1, 1]} : vector<2x96xf32> to vector<2x32xf32>
    %772 = vector.extract_strided_slice %711 {offsets = [0, 32], sizes = [2, 32], strides = [1, 1]} : vector<2x96xf32> to vector<2x32xf32>
    %773 = arith.addf %771, %772 : vector<2x32xf32>
    %774 = arith.negf %773 : vector<2x32xf32>
    %775 = math.exp %774 : vector<2x32xf32>
    %cst_195 = arith.constant 1.000000e+00 : f32
    %776 = vector.broadcast %cst_195 : f32 to vector<2x32xf32>
    %777 = arith.addf %776, %775 : vector<2x32xf32>
    %778 = arith.divf %776, %777 : vector<2x32xf32>
    %779 = vector.extract_strided_slice %762 {offsets = [0, 64], sizes = [2, 32], strides = [1, 1]} : vector<2x96xf32> to vector<2x32xf32>
    %780 = vector.extract_strided_slice %711 {offsets = [0, 64], sizes = [2, 32], strides = [1, 1]} : vector<2x96xf32> to vector<2x32xf32>
    %781 = arith.addf %780, %431 : vector<2x32xf32>
    %782 = arith.mulf %770, %781 : vector<2x32xf32>
    %783 = arith.addf %779, %782 : vector<2x32xf32>
    %784 = math.tanh %783 : vector<2x32xf32>
    %cst_196 = arith.constant 1.000000e+00 : f32
    %785 = vector.broadcast %cst_196 : f32 to vector<2x32xf32>
    %786 = arith.subf %785, %778 : vector<2x32xf32>
    %787 = arith.mulf %786, %784 : vector<2x32xf32>
    %788 = arith.mulf %778, %703 : vector<2x32xf32>
    %789 = arith.addf %787, %788 : vector<2x32xf32>
    %790 = vector.broadcast %c3_i32_181 : i32 to vector<2x1xi32>
    %791 = arith.cmpi slt, %1, %790 : vector<2x1xi32>
    %792 = vector.shape_cast %791 : vector<2x1xi1> to vector<2x1xi1>
    %793 = vector.broadcast %792 : vector<2x1xi1> to vector<2x32xi1>
    %794 = arith.select %793, %703, %789 : vector<2x32xi1>, vector<2x32xf32>
    %cst_197 = arith.constant 0.000000e+00 : f32
    %795 = vector.shape_cast %791 : vector<2x1xi1> to vector<2x1xi1>
    %796 = vector.broadcast %795 : vector<2x1xi1> to vector<2x32xi1>
    %797 = vector.broadcast %cst_197 : f32 to vector<2x32xf32>
    %798 = arith.select %796, %797, %794 : vector<2x32xi1>, vector<2x32xf32>
    %799 = arith.addf %708, %798 : vector<2x32xf32>
    %c4_i32_198 = arith.constant 4 : i32
    %cst_199 = arith.constant dense<0.000000e+00> : vector<2x128xf32>
    %800 = tpu.matmul %794, %427, %cst_199 {dimension_numbers = #tpu.dot_dimension_numbers<[1], [0], [0], [1], [0, 0, 1, 1], [], []>} : vector<2x32xf32>, vector<32x128xf32>, vector<2x128xf32> -> vector<2x128xf32>
    %801 = vector.extract_strided_slice %800 {offsets = [0, 0], sizes = [2, 32], strides = [1, 1]} : vector<2x128xf32> to vector<2x32xf32>
    %802 = vector.extract_strided_slice %800 {offsets = [0, 32], sizes = [2, 96], strides = [1, 1]} : vector<2x128xf32> to vector<2x96xf32>
    %803 = vector.extract_strided_slice %801 {offsets = [0, 0], sizes = [1, 32], strides = [1, 1]} : vector<2x32xf32> to vector<1x32xf32>
    %804 = vector.broadcast %803 : vector<1x32xf32> to vector<8x32xf32>
    %805 = arith.addf %434, %804 : vector<8x32xf32>
    %806 = math.tanh %805 : vector<8x32xf32>
    %807 = vector.broadcast %426 : vector<1x32xf32> to vector<8x32xf32>
    %808 = arith.mulf %806, %807 : vector<8x32xf32>
    %cst_200 = arith.constant dense<0.000000e+00> : vector<8xf32>
    %809 = vector.multi_reduction <add>, %808, %cst_200 [1] : vector<8x32xf32> to vector<8xf32>
    %810 = vector.shape_cast %809 : vector<8xf32> to vector<8x1xf32>
    %cst_201 = arith.constant dense<0xFF800000> : vector<1xf32>
    %811 = vector.multi_reduction <maximumf>, %810, %cst_201 [0] : vector<8x1xf32> to vector<1xf32>
    %812 = vector.shape_cast %811 : vector<1xf32> to vector<1x1xf32>
    %813 = vector.broadcast %812 : vector<1x1xf32> to vector<8x1xf32>
    %814 = arith.subf %810, %813 : vector<8x1xf32>
    %815 = math.exp %814 : vector<8x1xf32>
    %cst_202 = arith.constant dense<0.000000e+00> : vector<1xf32>
    %816 = vector.multi_reduction <add>, %815, %cst_202 [0] : vector<8x1xf32> to vector<1xf32>
    %817 = vector.shape_cast %816 : vector<1xf32> to vector<1x1xf32>
    %818 = tpu.reciprocal %817 {approx = true} : vector<1x1xf32> -> vector<1x1xf32>
    %819 = vector.broadcast %818 : vector<1x1xf32> to vector<8x1xf32>
    %820 = arith.mulf %815, %819 : vector<8x1xf32>
    %821 = vector.broadcast %820 : vector<8x1xf32> to vector<8x32xf32>
    %822 = arith.mulf %821, %432 : vector<8x32xf32>
    %cst_203 = arith.constant dense<0.000000e+00> : vector<32xf32>
    %823 = vector.multi_reduction <add>, %822, %cst_203 [0] : vector<8x32xf32> to vector<32xf32>
    %824 = vector.shape_cast %823 : vector<32xf32> to vector<1x32xf32>
    %825 = vector.extract_strided_slice %801 {offsets = [1, 0], sizes = [1, 32], strides = [1, 1]} : vector<2x32xf32> to vector<1x32xf32>
    %826 = vector.broadcast %825 : vector<1x32xf32> to vector<8x32xf32>
    %827 = arith.addf %435, %826 : vector<8x32xf32>
    %828 = math.tanh %827 : vector<8x32xf32>
    %829 = vector.broadcast %426 : vector<1x32xf32> to vector<8x32xf32>
    %830 = arith.mulf %828, %829 : vector<8x32xf32>
    %cst_204 = arith.constant dense<0.000000e+00> : vector<8xf32>
    %831 = vector.multi_reduction <add>, %830, %cst_204 [1] : vector<8x32xf32> to vector<8xf32>
    %832 = vector.shape_cast %831 : vector<8xf32> to vector<8x1xf32>
    %cst_205 = arith.constant dense<0xFF800000> : vector<1xf32>
    %833 = vector.multi_reduction <maximumf>, %832, %cst_205 [0] : vector<8x1xf32> to vector<1xf32>
    %834 = vector.shape_cast %833 : vector<1xf32> to vector<1x1xf32>
    %835 = vector.broadcast %834 : vector<1x1xf32> to vector<8x1xf32>
    %836 = arith.subf %832, %835 : vector<8x1xf32>
    %837 = math.exp %836 : vector<8x1xf32>
    %cst_206 = arith.constant dense<0.000000e+00> : vector<1xf32>
    %838 = vector.multi_reduction <add>, %837, %cst_206 [0] : vector<8x1xf32> to vector<1xf32>
    %839 = vector.shape_cast %838 : vector<1xf32> to vector<1x1xf32>
    %840 = tpu.reciprocal %839 {approx = true} : vector<1x1xf32> -> vector<1x1xf32>
    %841 = vector.broadcast %840 : vector<1x1xf32> to vector<8x1xf32>
    %842 = arith.mulf %837, %841 : vector<8x1xf32>
    %843 = vector.broadcast %842 : vector<8x1xf32> to vector<8x32xf32>
    %844 = arith.mulf %843, %433 : vector<8x32xf32>
    %cst_207 = arith.constant dense<0.000000e+00> : vector<32xf32>
    %845 = vector.multi_reduction <add>, %844, %cst_207 [0] : vector<8x32xf32> to vector<32xf32>
    %846 = vector.shape_cast %845 : vector<32xf32> to vector<1x32xf32>
    %847 = tpu.concatenate %824, %846 in 0 : vector<1x32xf32>, vector<1x32xf32> -> vector<2x32xf32>
    %c2_i32_208 = arith.constant 2 : i32
    %848 = arith.muli %c4_i32_198, %c2_i32_208 : i32
    %849 = tpu.assume_multiple %848, 2 : i32
    %850 = arith.index_cast %849 : i32 to index
    %c0_209 = arith.constant 0 : index
    %851 = vector.load %arg20[%850, %c0_209] : memref<12x96xf32, #tpu.memory_space<vmem>>, vector<2x96xf32>
    %cst_210 = arith.constant dense<0.000000e+00> : vector<2x96xf32>
    %852 = tpu.matmul %847, %428, %cst_210 {dimension_numbers = #tpu.dot_dimension_numbers<[1], [0], [0], [1], [0, 0, 1, 1], [], []>} : vector<2x32xf32>, vector<32x96xf32>, vector<2x96xf32> -> vector<2x96xf32>
    %853 = arith.addf %851, %852 : vector<2x96xf32>
    %854 = vector.extract_strided_slice %853 {offsets = [0, 0], sizes = [2, 32], strides = [1, 1]} : vector<2x96xf32> to vector<2x32xf32>
    %855 = vector.extract_strided_slice %802 {offsets = [0, 0], sizes = [2, 32], strides = [1, 1]} : vector<2x96xf32> to vector<2x32xf32>
    %856 = arith.addf %854, %855 : vector<2x32xf32>
    %857 = arith.negf %856 : vector<2x32xf32>
    %858 = math.exp %857 : vector<2x32xf32>
    %cst_211 = arith.constant 1.000000e+00 : f32
    %859 = vector.broadcast %cst_211 : f32 to vector<2x32xf32>
    %860 = arith.addf %859, %858 : vector<2x32xf32>
    %861 = arith.divf %859, %860 : vector<2x32xf32>
    %862 = vector.extract_strided_slice %853 {offsets = [0, 32], sizes = [2, 32], strides = [1, 1]} : vector<2x96xf32> to vector<2x32xf32>
    %863 = vector.extract_strided_slice %802 {offsets = [0, 32], sizes = [2, 32], strides = [1, 1]} : vector<2x96xf32> to vector<2x32xf32>
    %864 = arith.addf %862, %863 : vector<2x32xf32>
    %865 = arith.negf %864 : vector<2x32xf32>
    %866 = math.exp %865 : vector<2x32xf32>
    %cst_212 = arith.constant 1.000000e+00 : f32
    %867 = vector.broadcast %cst_212 : f32 to vector<2x32xf32>
    %868 = arith.addf %867, %866 : vector<2x32xf32>
    %869 = arith.divf %867, %868 : vector<2x32xf32>
    %870 = vector.extract_strided_slice %853 {offsets = [0, 64], sizes = [2, 32], strides = [1, 1]} : vector<2x96xf32> to vector<2x32xf32>
    %871 = vector.extract_strided_slice %802 {offsets = [0, 64], sizes = [2, 32], strides = [1, 1]} : vector<2x96xf32> to vector<2x32xf32>
    %872 = arith.addf %871, %431 : vector<2x32xf32>
    %873 = arith.mulf %861, %872 : vector<2x32xf32>
    %874 = arith.addf %870, %873 : vector<2x32xf32>
    %875 = math.tanh %874 : vector<2x32xf32>
    %cst_213 = arith.constant 1.000000e+00 : f32
    %876 = vector.broadcast %cst_213 : f32 to vector<2x32xf32>
    %877 = arith.subf %876, %869 : vector<2x32xf32>
    %878 = arith.mulf %877, %875 : vector<2x32xf32>
    %879 = arith.mulf %869, %794 : vector<2x32xf32>
    %880 = arith.addf %878, %879 : vector<2x32xf32>
    %881 = vector.broadcast %c4_i32_198 : i32 to vector<2x1xi32>
    %882 = arith.cmpi slt, %1, %881 : vector<2x1xi32>
    %883 = vector.shape_cast %882 : vector<2x1xi1> to vector<2x1xi1>
    %884 = vector.broadcast %883 : vector<2x1xi1> to vector<2x32xi1>
    %885 = arith.select %884, %794, %880 : vector<2x32xi1>, vector<2x32xf32>
    %cst_214 = arith.constant 0.000000e+00 : f32
    %886 = vector.shape_cast %882 : vector<2x1xi1> to vector<2x1xi1>
    %887 = vector.broadcast %886 : vector<2x1xi1> to vector<2x32xi1>
    %888 = vector.broadcast %cst_214 : f32 to vector<2x32xf32>
    %889 = arith.select %887, %888, %885 : vector<2x32xi1>, vector<2x32xf32>
    %890 = arith.addf %799, %889 : vector<2x32xf32>
    %c5_i32_215 = arith.constant 5 : i32
    %cst_216 = arith.constant dense<0.000000e+00> : vector<2x128xf32>
    %891 = tpu.matmul %885, %427, %cst_216 {dimension_numbers = #tpu.dot_dimension_numbers<[1], [0], [0], [1], [0, 0, 1, 1], [], []>} : vector<2x32xf32>, vector<32x128xf32>, vector<2x128xf32> -> vector<2x128xf32>
    %892 = vector.extract_strided_slice %891 {offsets = [0, 0], sizes = [2, 32], strides = [1, 1]} : vector<2x128xf32> to vector<2x32xf32>
    %893 = vector.extract_strided_slice %891 {offsets = [0, 32], sizes = [2, 96], strides = [1, 1]} : vector<2x128xf32> to vector<2x96xf32>
    %894 = vector.extract_strided_slice %892 {offsets = [0, 0], sizes = [1, 32], strides = [1, 1]} : vector<2x32xf32> to vector<1x32xf32>
    %895 = vector.broadcast %894 : vector<1x32xf32> to vector<8x32xf32>
    %896 = arith.addf %434, %895 : vector<8x32xf32>
    %897 = math.tanh %896 : vector<8x32xf32>
    %898 = vector.broadcast %426 : vector<1x32xf32> to vector<8x32xf32>
    %899 = arith.mulf %897, %898 : vector<8x32xf32>
    %cst_217 = arith.constant dense<0.000000e+00> : vector<8xf32>
    %900 = vector.multi_reduction <add>, %899, %cst_217 [1] : vector<8x32xf32> to vector<8xf32>
    %901 = vector.shape_cast %900 : vector<8xf32> to vector<8x1xf32>
    %cst_218 = arith.constant dense<0xFF800000> : vector<1xf32>
    %902 = vector.multi_reduction <maximumf>, %901, %cst_218 [0] : vector<8x1xf32> to vector<1xf32>
    %903 = vector.shape_cast %902 : vector<1xf32> to vector<1x1xf32>
    %904 = vector.broadcast %903 : vector<1x1xf32> to vector<8x1xf32>
    %905 = arith.subf %901, %904 : vector<8x1xf32>
    %906 = math.exp %905 : vector<8x1xf32>
    %cst_219 = arith.constant dense<0.000000e+00> : vector<1xf32>
    %907 = vector.multi_reduction <add>, %906, %cst_219 [0] : vector<8x1xf32> to vector<1xf32>
    %908 = vector.shape_cast %907 : vector<1xf32> to vector<1x1xf32>
    %909 = tpu.reciprocal %908 {approx = true} : vector<1x1xf32> -> vector<1x1xf32>
    %910 = vector.broadcast %909 : vector<1x1xf32> to vector<8x1xf32>
    %911 = arith.mulf %906, %910 : vector<8x1xf32>
    %912 = vector.broadcast %911 : vector<8x1xf32> to vector<8x32xf32>
    %913 = arith.mulf %912, %432 : vector<8x32xf32>
    %cst_220 = arith.constant dense<0.000000e+00> : vector<32xf32>
    %914 = vector.multi_reduction <add>, %913, %cst_220 [0] : vector<8x32xf32> to vector<32xf32>
    %915 = vector.shape_cast %914 : vector<32xf32> to vector<1x32xf32>
    %916 = vector.extract_strided_slice %892 {offsets = [1, 0], sizes = [1, 32], strides = [1, 1]} : vector<2x32xf32> to vector<1x32xf32>
    %917 = vector.broadcast %916 : vector<1x32xf32> to vector<8x32xf32>
    %918 = arith.addf %435, %917 : vector<8x32xf32>
    %919 = math.tanh %918 : vector<8x32xf32>
    %920 = vector.broadcast %426 : vector<1x32xf32> to vector<8x32xf32>
    %921 = arith.mulf %919, %920 : vector<8x32xf32>
    %cst_221 = arith.constant dense<0.000000e+00> : vector<8xf32>
    %922 = vector.multi_reduction <add>, %921, %cst_221 [1] : vector<8x32xf32> to vector<8xf32>
    %923 = vector.shape_cast %922 : vector<8xf32> to vector<8x1xf32>
    %cst_222 = arith.constant dense<0xFF800000> : vector<1xf32>
    %924 = vector.multi_reduction <maximumf>, %923, %cst_222 [0] : vector<8x1xf32> to vector<1xf32>
    %925 = vector.shape_cast %924 : vector<1xf32> to vector<1x1xf32>
    %926 = vector.broadcast %925 : vector<1x1xf32> to vector<8x1xf32>
    %927 = arith.subf %923, %926 : vector<8x1xf32>
    %928 = math.exp %927 : vector<8x1xf32>
    %cst_223 = arith.constant dense<0.000000e+00> : vector<1xf32>
    %929 = vector.multi_reduction <add>, %928, %cst_223 [0] : vector<8x1xf32> to vector<1xf32>
    %930 = vector.shape_cast %929 : vector<1xf32> to vector<1x1xf32>
    %931 = tpu.reciprocal %930 {approx = true} : vector<1x1xf32> -> vector<1x1xf32>
    %932 = vector.broadcast %931 : vector<1x1xf32> to vector<8x1xf32>
    %933 = arith.mulf %928, %932 : vector<8x1xf32>
    %934 = vector.broadcast %933 : vector<8x1xf32> to vector<8x32xf32>
    %935 = arith.mulf %934, %433 : vector<8x32xf32>
    %cst_224 = arith.constant dense<0.000000e+00> : vector<32xf32>
    %936 = vector.multi_reduction <add>, %935, %cst_224 [0] : vector<8x32xf32> to vector<32xf32>
    %937 = vector.shape_cast %936 : vector<32xf32> to vector<1x32xf32>
    %938 = tpu.concatenate %915, %937 in 0 : vector<1x32xf32>, vector<1x32xf32> -> vector<2x32xf32>
    %c2_i32_225 = arith.constant 2 : i32
    %939 = arith.muli %c5_i32_215, %c2_i32_225 : i32
    %940 = tpu.assume_multiple %939, 2 : i32
    %941 = arith.index_cast %940 : i32 to index
    %c0_226 = arith.constant 0 : index
    %942 = vector.load %arg20[%941, %c0_226] : memref<12x96xf32, #tpu.memory_space<vmem>>, vector<2x96xf32>
    %cst_227 = arith.constant dense<0.000000e+00> : vector<2x96xf32>
    %943 = tpu.matmul %938, %428, %cst_227 {dimension_numbers = #tpu.dot_dimension_numbers<[1], [0], [0], [1], [0, 0, 1, 1], [], []>} : vector<2x32xf32>, vector<32x96xf32>, vector<2x96xf32> -> vector<2x96xf32>
    %944 = arith.addf %942, %943 : vector<2x96xf32>
    %945 = vector.extract_strided_slice %944 {offsets = [0, 0], sizes = [2, 32], strides = [1, 1]} : vector<2x96xf32> to vector<2x32xf32>
    %946 = vector.extract_strided_slice %893 {offsets = [0, 0], sizes = [2, 32], strides = [1, 1]} : vector<2x96xf32> to vector<2x32xf32>
    %947 = arith.addf %945, %946 : vector<2x32xf32>
    %948 = arith.negf %947 : vector<2x32xf32>
    %949 = math.exp %948 : vector<2x32xf32>
    %cst_228 = arith.constant 1.000000e+00 : f32
    %950 = vector.broadcast %cst_228 : f32 to vector<2x32xf32>
    %951 = arith.addf %950, %949 : vector<2x32xf32>
    %952 = arith.divf %950, %951 : vector<2x32xf32>
    %953 = vector.extract_strided_slice %944 {offsets = [0, 32], sizes = [2, 32], strides = [1, 1]} : vector<2x96xf32> to vector<2x32xf32>
    %954 = vector.extract_strided_slice %893 {offsets = [0, 32], sizes = [2, 32], strides = [1, 1]} : vector<2x96xf32> to vector<2x32xf32>
    %955 = arith.addf %953, %954 : vector<2x32xf32>
    %956 = arith.negf %955 : vector<2x32xf32>
    %957 = math.exp %956 : vector<2x32xf32>
    %cst_229 = arith.constant 1.000000e+00 : f32
    %958 = vector.broadcast %cst_229 : f32 to vector<2x32xf32>
    %959 = arith.addf %958, %957 : vector<2x32xf32>
    %960 = arith.divf %958, %959 : vector<2x32xf32>
    %961 = vector.extract_strided_slice %944 {offsets = [0, 64], sizes = [2, 32], strides = [1, 1]} : vector<2x96xf32> to vector<2x32xf32>
    %962 = vector.extract_strided_slice %893 {offsets = [0, 64], sizes = [2, 32], strides = [1, 1]} : vector<2x96xf32> to vector<2x32xf32>
    %963 = arith.addf %962, %431 : vector<2x32xf32>
    %964 = arith.mulf %952, %963 : vector<2x32xf32>
    %965 = arith.addf %961, %964 : vector<2x32xf32>
    %966 = math.tanh %965 : vector<2x32xf32>
    %cst_230 = arith.constant 1.000000e+00 : f32
    %967 = vector.broadcast %cst_230 : f32 to vector<2x32xf32>
    %968 = arith.subf %967, %960 : vector<2x32xf32>
    %969 = arith.mulf %968, %966 : vector<2x32xf32>
    %970 = arith.mulf %960, %885 : vector<2x32xf32>
    %971 = arith.addf %969, %970 : vector<2x32xf32>
    %972 = vector.broadcast %c5_i32_215 : i32 to vector<2x1xi32>
    %973 = arith.cmpi slt, %1, %972 : vector<2x1xi32>
    %974 = vector.shape_cast %973 : vector<2x1xi1> to vector<2x1xi1>
    %975 = vector.broadcast %974 : vector<2x1xi1> to vector<2x32xi1>
    %976 = arith.select %975, %885, %971 : vector<2x32xi1>, vector<2x32xf32>
    %cst_231 = arith.constant 0.000000e+00 : f32
    %977 = vector.shape_cast %973 : vector<2x1xi1> to vector<2x1xi1>
    %978 = vector.broadcast %977 : vector<2x1xi1> to vector<2x32xi1>
    %979 = vector.broadcast %cst_231 : f32 to vector<2x32xf32>
    %980 = arith.select %978, %979, %976 : vector<2x32xi1>, vector<2x32xf32>
    %981 = arith.addf %890, %980 : vector<2x32xf32>
    %c6_i32_232 = arith.constant 6 : i32
    %982 = arith.sitofp %1 : vector<2x1xi32> to vector<2x1xf32>
    %983 = vector.broadcast %982 : vector<2x1xf32> to vector<2x32xf32>
    %984 = arith.divf %981, %983 : vector<2x32xf32>
    %c0_233 = arith.constant 0 : index
    %c0_234 = arith.constant 0 : index
    %985 = vector.load %arg17[%c0_233, %c0_234] : memref<2x32xf32, #tpu.memory_space<vmem>>, vector<2x32xf32>
    tpu.vector_store %arg17[%c0_233, %c0_234], %984 {strides = array<i32>} : memref<2x32xf32, #tpu.memory_space<vmem>>, vector<2x32xf32>,
    return
  }
  func.func @transform_0(%arg0: i32) -> (i32, i32) {
    %c0_i32 = arith.constant 0 : i32
    %c0_i32_0 = arith.constant 0 : i32
    %c0_i32_1 = arith.constant 0 : i32
    return %c0_i32, %c0_i32_0 : i32, i32
  }
  func.func @transform_1(%arg0: i32) -> (i32, i32) {
    %c0_i32 = arith.constant 0 : i32
    %c0_i32_0 = arith.constant 0 : i32
    %c0_i32_1 = arith.constant 0 : i32
    return %c0_i32, %c0_i32_0 : i32, i32
  }
  func.func @transform_2(%arg0: i32) -> (i32, i32) {
    %c0_i32 = arith.constant 0 : i32
    %c0_i32_0 = arith.constant 0 : i32
    %c0_i32_1 = arith.constant 0 : i32
    return %c0_i32, %c0_i32_0 : i32, i32
  }
  func.func @transform_3(%arg0: i32) -> (i32, i32) {
    %c0_i32 = arith.constant 0 : i32
    %c0_i32_0 = arith.constant 0 : i32
    %c0_i32_1 = arith.constant 0 : i32
    return %c0_i32, %c0_i32_0 : i32, i32
  }
  func.func @transform_4(%arg0: i32) -> (i32, i32) {
    %c0_i32 = arith.constant 0 : i32
    %c0_i32_0 = arith.constant 0 : i32
    %c0_i32_1 = arith.constant 0 : i32
    return %c0_i32, %c0_i32_0 : i32, i32
  }
  func.func @transform_5(%arg0: i32) -> (i32, i32) {
    %c0_i32 = arith.constant 0 : i32
    %c0_i32_0 = arith.constant 0 : i32
    %c0_i32_1 = arith.constant 0 : i32
    return %c0_i32, %c0_i32_0 : i32, i32
  }
  func.func @transform_6(%arg0: i32) -> (i32, i32) {
    %c0_i32 = arith.constant 0 : i32
    %c0_i32_0 = arith.constant 0 : i32
    %c0_i32_1 = arith.constant 0 : i32
    return %c0_i32, %c0_i32_0 : i32, i32
  }
  func.func @transform_7(%arg0: i32) -> (i32, i32) {
    %c0_i32 = arith.constant 0 : i32
    %c0_i32_0 = arith.constant 0 : i32
    %c0_i32_1 = arith.constant 0 : i32
    return %c0_i32, %c0_i32_0 : i32, i32
  }
  func.func @transform_8(%arg0: i32) -> (i32, i32) {
    %c0_i32 = arith.constant 0 : i32
    %c0_i32_0 = arith.constant 0 : i32
    %c0_i32_1 = arith.constant 0 : i32
    return %c0_i32, %c0_i32_0 : i32, i32
  }
  func.func @transform_9(%arg0: i32) -> (i32, i32) {
    %c0_i32 = arith.constant 0 : i32
    %c0_i32_0 = arith.constant 0 : i32
    %c0_i32_1 = arith.constant 0 : i32
    return %c0_i32, %c0_i32_0 : i32, i32
  }
  func.func @transform_10(%arg0: i32) -> (i32, i32) {
    %c0_i32 = arith.constant 0 : i32
    %c0_i32_0 = arith.constant 0 : i32
    %c0_i32_1 = arith.constant 0 : i32
    return %c0_i32, %c0_i32_0 : i32, i32
  }
  func.func @transform_11(%arg0: i32) -> (i32, i32) {
    %c0_i32 = arith.constant 0 : i32
    %c0_i32_0 = arith.constant 0 : i32
    %c0_i32_1 = arith.constant 0 : i32
    return %c0_i32, %c0_i32_0 : i32, i32
  }
  func.func @transform_12(%arg0: i32) -> (i32, i32) {
    %c0_i32 = arith.constant 0 : i32
    %c0_i32_0 = arith.constant 0 : i32
    %c0_i32_1 = arith.constant 0 : i32
    return %c0_i32, %c0_i32_0 : i32, i32
  }
  func.func @transform_13(%arg0: i32) -> (i32, i32) {
    %c0_i32 = arith.constant 0 : i32
    %c0_i32_0 = arith.constant 0 : i32
    %c0_i32_1 = arith.constant 0 : i32
    return %c0_i32, %c0_i32_0 : i32, i32
  }
  func.func @transform_14(%arg0: i32) -> (i32, i32) {
    %c0_i32 = arith.constant 0 : i32
    %c0_i32_0 = arith.constant 0 : i32
    %c0_i32_1 = arith.constant 0 : i32
    return %c0_i32, %c0_i32_0 : i32, i32
  }
  func.func @transform_15(%arg0: i32) -> (i32, i32) {
    %c0_i32 = arith.constant 0 : i32
    %c0_i32_0 = arith.constant 0 : i32
    %c0_i32_1 = arith.constant 0 : i32
    return %c0_i32, %c0_i32_0 : i32, i32
  }
  func.func @transform_16(%arg0: i32) -> (i32, i32) {
    %c0_i32 = arith.constant 0 : i32
    %c0_i32_0 = arith.constant 0 : i32
    %c0_i32_1 = arith.constant 0 : i32
    return %c0_i32, %c0_i32_0 : i32, i32
  }
}

</mosaic_0001>

<bundles_post_ra>
// kernel: bahdanau_encoder_forward.1
= control target key start
LH: loop header
LB: loop body
LE: loop exit
PB: predicated region body
PF: predicated region fallthrough
CT: control target
= control target key end

     0   :  { %s4468_s0 = inlined_call_operand.vmem [shape: s32[2,1], index: 0, kind: input, shape index: {}]   ;;  %s4469_s1 = inlined_call_operand.vmem [shape: s32[2,1], index: 1, kind: input, shape index: {}]   ;;  %s4470_s2 = inlined_call_operand.vmem [shape: f32[16,16], index: 2, kind: input, shape index: {}]   ;;  %s4471_s3 = inlined_call_operand.vmem [shape: f32[12,16], index: 3, kind: input, shape index: {}]   ;;  %s4472_s4 = inlined_call_operand.vmem [shape: f32[16,96], index: 4, kind: input, shape index: {}]   ;;  %s4473_s5 = inlined_call_operand.vmem [shape: f32[32,96], index: 5, kind: input, shape index: {}]   ;;  %s4474_s6 = inlined_call_operand.vmem [shape: f32[1,96], index: 6, kind: input, shape index: {}]   ;;  %s4475_s7 = inlined_call_operand.vmem [shape: f32[1,32], index: 7, kind: input, shape index: {}]   ;;  %s4476_s8 = inlined_call_operand.vmem [shape: f32[16,96], index: 8, kind: input, shape index: {}]   ;;  %s4477_s9 = inlined_call_operand.vmem [shape: f32[32,96], index: 9, kind: input, shape index: {}]   ;;  %s4478_s10 = inlined_call_operand.vmem [shape: f32[32,128], index: 10, kind: input, shape index: {}]   ;;  %s4479_s11 = inlined_call_operand.vmem [shape: f32[1,96], index: 11, kind: input, shape index: {}]   ;;  %s4480_s12 = inlined_call_operand.vmem [shape: f32[1,32], index: 12, kind: input, shape index: {}]   ;;  %s4481_s13 = inlined_call_operand.vmem [shape: f32[32,32], index: 13, kind: input, shape index: {}]   ;;  %s4482_s14 = inlined_call_operand.vmem [shape: f32[1,32], index: 14, kind: input, shape index: {}]   ;;  %s4483_s15 = inlined_call_operand.hbm [shape: f32[2,32], index: 15, kind: output, shape index: {0}]   ;;  %s4484_s16 = inlined_call_operand.hbm [shape: f32[2,32], index: 16, kind: output, shape index: {1}]  }
   0x1   :  { %4486 = sst [smem:[#allocation11_spill]] %s4468_s0 }
   0x2   :  { %22 = vsyncpa [#allocation6], 0  ;;  %v59_v0 = vld [vmem:[%s4472_s4 + $0x8] sm:$0xff]  ;;  %v58_v1 = vld [vmem:[%s4472_s4] sm:$0xff]  ;;  %vm67_vm0 = vcmask 130048   ;;  %s3655_s17 = smov 64  }
   0x3   :  { %v56_v2 = vld [vmem:[%s4470_s2] sm:$0xff]  ;;  %3172 = vmatprep.subr.mxu0 %v59_v0  ;;  %v57_v3 = vld [vmem:[%s4470_s2 + $0x8] sm:$0xff]  ;;  %v3767_v5 = vld [vmem:[%s4473_s5 + $0x18] sm:$0xff] }
   0x4   :  { %3176 = vmatprep.mubr.msk.f32.mxu0 %vm67_vm0, %v56_v2  ;;  %3173 = vmatpush3.msra.mxu0 %v59_v0  ;;  %v3016_v4 = vld [vmem:[%s4475_s7] ss:$0 sm:$0xff] }
   0x5   :  { %3174 = vmatprep.subr.mxu0 %v58_v1  ;;  %339 = vrot.lane.b32.xlu0 %v3016_v4, %s3655_s17 }
   0x6   :  { %23 = vsyncpa [#allocation8], 0  ;;  %3175 = vmatpush3.msra.mxu0 %v58_v1  ;;  %v3656_v6 = vmov 0.0   ;;  %v3775_v7 = vld [vmem:[%s4473_s5 + $0x10] sm:$0xff]  ;;  %vm3657_vm1 = vmmov 0   ;;  %v3784_v8 = vld [vmem:[%s4473_s5 + $0x8] sm:$0xff] }
   0x7   :  { %3177 = vmatmul.mubr.msk.f32.vlgmr.msra.gmra.mxu0 %vm67_vm0, %v57_v3  ;;  %3186 = vmatprep.subr.mxu0 %v3656_v6  ;;  %v3791_v9 = vld [vmem:[%s4473_s5] sm:$0xff]  ;;  %vm149_vm2 = vcmask 785408   ;;  %v3658_v24 = vmov 0   ;;  %s4487_s24 = sld [smem:[#allocation11_spill]]  ;;  %v155_v32 = vld [vmem:[%s4476_s8 + $0x8] sm:$0xff]  ;;  %vm245_vm5 = vcmask 781312  }
   0x8   :  { %3187 = vmatpush3.msra.mxu0 %v3767_v5  ;;  %3194 = vmatprep.mubr.msk.f32.mxu0 %vm3657_vm1, %v3656_v6  ;;  %v3010_v10 = vld [vmem:[%s4474_s6] ss:$0 sm:$0xff]  ;;  %v153_v35 = vld [vmem:[%s4471_s3 + $0x8] sm:$0xf]  ;;  %vm373_vm6 = vcmask 253952   ;;  %vm375_vm7 = vcmask 254977  }
   0x9   :  { %3188 = vmatprep.subr.mxu0 %v3656_v6  ;;  %3436 = vset.pattern.permute.xlu1 %v3658_v24  ;;  %v154_v33 = vld [vmem:[%s4476_s8] sm:$0xff]  ;;  %s3659_s8 = smov 96   ;;  %vm258_vm8 = vcmask 261120  }
   0xa   :  { %3189 = vmatpush3.msra.mxu0 %v3775_v7  ;;  %3437 = vset.pattern.permute.xlu0 %v3658_v24  ;;  %v152_v34 = vld [vmem:[%s4471_s3] sm:$0xff] }
   0xb   :  { %3190 = vmatprep.subr.mxu0 %v3656_v6  ;;  %3179 = vmatprep.subr.mxu1 %v155_v32  ;;  %v3013_v44 = vld [vmem:[%s4479_s11] ss:$0 sm:$0xff] }
   0xc   :  { %3191 = vmatpush3.msra.mxu0 %v3784_v8  ;;  %3183 = vmatprep.mubr.msk.f32.mxu1 %vm67_vm0, %v152_v34 }
   0xd   :  { %3192 = vmatprep.subr.mxu0 %v3656_v6  ;;  %v3822_v25 = vld [vmem:[%s4487_s24] sm:$0x3]  ;;  %3180 = vmatpush3.msra.mxu1 %v155_v32 }
   0xe   :  { %3193 = vmatpush3.msra.mxu0 %v3791_v9  ;;  %vm362_vm3 = vcmp.gt.s32.totalorder %v3822_v25, 0  ;;  %3181 = vmatprep.subr.mxu1 %v154_v33  ;;  %vm479_vm9 = vcmp.gt.s32.totalorder %v3822_v25, 1  ;;  %vm598_vm11 = vcmp.gt.s32.totalorder %v3822_v25, 2  ;;  %vm717_vm13 = vcmp.gt.s32.totalorder %v3822_v25, 3 }
   0xf   :  { %3195 = vmatmul.mubr.f32.vlgmr.msra.gmra.mxu0 %v3656_v6  ;;  %3208 = vmatprep.subr.mxu0 %v3656_v6  ;;  %v363_v29 = vsel %vm362_vm3, 1, %v3658_v24  ;;  %v480_v58 = vsel %vm479_vm9, 1, %v3658_v24  ;;  %vm836_vm15 = vcmp.gt.s32.totalorder %v3822_v25, 4  ;;  %vm1193_vm9 = vcmp.gt.s32.totalorder %v3822_v25, 7 }
  0x10   :  { %3209 = vmatpush3.msra.mxu0 %v3767_v5  ;;  %3216 = vmatprep.mubr.msk.f32.mxu0 %vm3657_vm1, %v3656_v6 }
  0x11   :  { %3210 = vmatprep.subr.mxu0 %v3656_v6  ;;  %3182 = vmatpush3.msra.mxu1 %v154_v33 }
  0x12   :  { %3211 = vmatpush3.msra.mxu0 %v3775_v7  ;;  %3184 = vmatmul.mubr.msk.f32.vlgmr.msra.gmra.mxu1 %vm67_vm0, %v153_v35 }
  0x13   :  { %3212 = vmatprep.subr.mxu0 %v3656_v6  ;;  %3197 = vmatprep.subr.mxu1 %v3656_v6 }
  0x14   :  { %3213 = vmatpush3.msra.mxu0 %v3784_v8  ;;  %3198 = vmatpush3.msra.mxu1 %v3767_v5 }
  0x15   :  { %3214 = vmatprep.subr.mxu0 %v3656_v6  ;;  %3205 = vmatprep.mubr.msk.f32.mxu1 %vm3657_vm1, %v3656_v6 }
  0x16   :  { %3215 = vmatpush3.msra.mxu0 %v3791_v9  ;;  %3199 = vmatprep.subr.mxu1 %v3656_v6 }
  0x17   :  { %3230 = vmatprep.subr.mxu0 %v3656_v6  ;;  %3200 = vmatpush3.msra.mxu1 %v3775_v7 }
  0x18   :  { %3201 = vmatprep.subr.mxu1 %v3656_v6 }
  0x19   :  { %3202 = vmatpush3.msra.mxu1 %v3784_v8 }
  0x1a   :  { %3203 = vmatprep.subr.mxu1 %v3656_v6 }
  0x1b   :  { %3204 = vmatpush3.msra.mxu1 %v3791_v9 }
  0x1c   :  { %3219 = vmatprep.subr.mxu1 %v3656_v6 }
  0x77   :  { %v3813_v15 = vpop.permute.xlu0 %339 }
  0xc7   :  { %v3178_v11 = vpop.f32.mrf.mxu0 }
  0xc8   :  { %v146_v12 = vadd.f32 %v3178_v11, %v3010_v10 }
  0xc9   :  { %v140_v13 = vpop.f32.mrf.mxu0 }
  0xca   :  { %151 = vst.msk [vmem:[#allocation3 + $0x8] sm:$0xff] %vm149_vm2, %v146_v12  ;;  %v141_v14 = vadd.f32 %v3010_v10, %v140_v13 }
  0xcc   :  { %150 = vst.msk [vmem:[#allocation3] sm:$0xff] %vm149_vm2, %v141_v14 }
  0xcf   :  { %v328_v16 = vpop.f32.mrf.mxu0 }
  0xd0   :  { %v342_v17 = vadd.f32 %v3813_v15, %v328_v16 }
  0xd1   :  { %v3196_v18 = vpop.f32.mrf.mxu0 }
  0xd2   :  { %344 = vrot.lane.b32.xlu0 %v342_v17, %s3655_s17  ;;  %v3185_v45 = vpop.f32.mrf.mxu1 }
  0xd3   :  { %v257_v19 = vld [vmem:[#allocation3] sm:$0x3]  ;;  %v241_v46 = vadd.f32 %v3185_v45, %v3013_v44  ;;  %v379_v53 = vld [vmem:[#allocation3 + $0x2] sm:$0x3] }
  0xd4   :  { %v332_v20 = vadd.f32 %v328_v16, %v257_v19  ;;  %v235_v47 = vpop.f32.mrf.mxu1 }
  0xd5   :  { %246 = vst.msk [vmem:[#allocation4 + $0x8] sm:$0xf] %vm245_vm5, %v241_v46  ;;  %v236_v48 = vadd.f32 %v3013_v44, %v235_v47  ;;  %v718_v46 = vsel %vm717_vm13, 1, %v3658_v24  ;;  %v614_v47 = vld [vmem:[#allocation3 + $0x6] sm:$0x3] }
  0xd6   :  { %v3017_v21 = vmul.f32 -1.442695, %v332_v20  ;;  %v495_v20 = vld [vmem:[#allocation3 + $0x4] sm:$0x3] }
  0xd7   :  { %244 = vst.msk [vmem:[#allocation4] sm:$0xff] %vm149_vm2, %v236_v48  ;;  %vm955_vm2 = vcmp.gt.s32.totalorder %v3822_v25, 5 }
  0xd8   :  { %3438 = vpow2.f32 %v3017_v21 }
  0xe5   :  { %v3439_v22 = vpop.eup %3438 }
  0xe6   :  { %v336_v23 = vadd.f32 1.0, %v3439_v22 }
  0xe8   :  { %3440 = vrcp.f32 %v336_v23 }
  0xf5   :  { %v3441_v26 = vpop.eup %3440 }
  0xf6   :  { %v354_v37 = vsub.f32 1.0, %v3441_v26  ;;  %v360_v40 = vmul.f32 0.0, %v3441_v26 }
 0x144   :  { %v345_v27 = vpop.permute.xlu0 %344 }
 0x145   :  { %v347_v28 = vmul.f32 %v3441_v26, %v345_v27 }
 0x147   :  { %349 = vrot.lane.b32.xlu1 %v347_v28, %s3655_s17 }
 0x14b   :  { %365 = vperm.xlu1 %3436, %v363_v29  }
 0x1b9   :  { %v350_v30 = vpop.permute.xlu1 %349 }
 0x1ba   :  { %v352_v31 = vadd.f32 %v350_v30, %v257_v19  ;;  %v599_v19 = vsel %vm598_vm11, 1, %v3658_v24 }
 0x1bc   :  { %3442 = vtanh.f32 %v352_v31 }
 0x1c6   :  { %v366_v38 = vpop.permute.xlu1 %365 }
 0x1c7   :  { %vm367_vm4 = vcmp.eq.s32.totalorder %v366_v38, 1 }
 0x1c9   :  { %v3443_v36 = vpop.eup %3442 }
 0x1ca   :  { %356 = vrot.lane.b32.xlu0 %v3443_v36, %s3659_s8 }
 0x23c   :  { %v357_v39 = vpop.permute.xlu0 %356 }
 0x23d   :  { %v359_v41 = vmul.f32 %v357_v39, %v354_v37 }
 0x23f   :  { %v361_v42 = vadd.f32 %v360_v40, %v359_v41 }
 0x241   :  { %v3853_v43 = vsel %vm367_vm4, %v361_v42, 0.0  ;;  %vm1074_vm4 = vcmp.gt.s32.totalorder %v3822_v25, 6 }
 0x242   :  { %370 = vrot.lane.b32.xlu1 %v3853_v43, %s3659_s8 }
 0x2b4   :  { %v371_v49 = vpop.permute.xlu1 %370 }
 0x2b5   :  { %374 = vst.msk [vmem:[#allocation2] sm:$0x1] %vm373_vm6, %v371_v49  ;;  %3206 = vmatmul.mubr.msk.f32.vlgmr.msra.gmra.mxu1 %vm258_vm8, %v371_v49 }
 0x2b6   :  { %376 = vst.msk [vmem:[#allocation2 + $0x7] sm:$0x2] %vm375_vm7, %v371_v49  ;;  %3220 = vmatpush3.msra.mxu1 %v3767_v5  ;;  %3227 = vmatprep.mubr.msk.f32.mxu1 %vm3657_vm1, %v3656_v6 }
 0x2b7   :  { %3221 = vmatprep.subr.mxu1 %v3656_v6 }
 0x2b8   :  { %3222 = vmatpush3.msra.mxu1 %v3775_v7 }
 0x2b9   :  { %3223 = vmatprep.subr.mxu1 %v3656_v6 }
 0x2ba   :  { %3224 = vmatpush3.msra.mxu1 %v3784_v8 }
 0x2bb   :  { %3225 = vmatprep.subr.mxu1 %v3656_v6 }
 0x2bc   :  { %3226 = vmatpush3.msra.mxu1 %v3791_v9 }
 0x2bd   :  { %3241 = vmatprep.subr.mxu1 %v3656_v6 }
 0x375   :  { %v448_v50 = vpop.f32.mrf.mxu1 }
 0x376   :  { %v459_v51 = vadd.f32 %v448_v50, %v3813_v15  ;;  %v452_v54 = vadd.f32 %v448_v50, %v379_v53 }
 0x377   :  { %v3207_v52 = vpop.f32.mrf.mxu1 }
 0x378   :  { %461 = vrot.lane.b32.xlu0 %v459_v51, %s3655_s17  ;;  %v3019_v55 = vmul.f32 -1.442695, %v452_v54 }
 0x37a   :  { %3444 = vpow2.f32 %v3019_v55 }
 0x37c   :  { %482 = vperm.xlu0 %3437, %v480_v58  }
 0x387   :  { %v3445_v56 = vpop.eup %3444 }
 0x388   :  { %v456_v57 = vadd.f32 1.0, %v3445_v56 }
 0x38a   :  { %3446 = vrcp.f32 %v456_v57 }
 0x397   :  { %v3447_v59 = vpop.eup %3446 }
 0x398   :  { %v471_v1 = vsub.f32 1.0, %v3447_v59  ;;  %v477_v4 = vmul.f32 %v3447_v59, %v3853_v43 }
 0x3ea   :  { %v462_v60 = vpop.permute.xlu0 %461 }
 0x3eb   :  { %v464_v61 = vmul.f32 %v3447_v59, %v462_v60 }
 0x3ed   :  { %466 = vrot.lane.b32.xlu1 %v464_v61, %s3655_s17 }
 0x3f7   :  { %v483_v2 = vpop.permute.xlu0 %482 }
 0x3f8   :  { %vm484_vm10 = vcmp.eq.s32.totalorder %v483_v2, 1 }
 0x45f   :  { %v467_v62 = vpop.permute.xlu1 %466 }
 0x460   :  { %v469_v63 = vadd.f32 %v467_v62, %v379_v53 }
 0x462   :  { %3448 = vtanh.f32 %v469_v63 }
 0x46f   :  { %v3449_v0 = vpop.eup %3448 }
 0x470   :  { %473 = vrot.lane.b32.xlu1 %v3449_v0, %s3659_s8 }
 0x4e2   :  { %v474_v3 = vpop.permute.xlu1 %473 }
 0x4e3   :  { %v476_v10 = vmul.f32 %v474_v3, %v471_v1 }
 0x4e5   :  { %v478_v11 = vadd.f32 %v477_v4, %v476_v10 }
 0x4e7   :  { %v3881_v12 = vsel %vm484_vm10, %v478_v11, 0.0  ;;  %v485_v13 = vsel %vm484_vm10, %v478_v11, %v3853_v43  ;;  %v837_v11 = vsel %vm836_vm15, 1, %v3658_v24 }
 0x4e8   :  { %497 = vrot.lane.b32.xlu1 %v485_v13, %s3659_s8 }
 0x55a   :  { %v498_v14 = vpop.permute.xlu1 %497 }
 0x55b   :  { %3217 = vmatmul.mubr.msk.f32.vlgmr.msra.gmra.mxu0 %vm258_vm8, %v498_v14 }
 0x55c   :  { %3231 = vmatpush3.msra.mxu0 %v3767_v5  ;;  %3238 = vmatprep.mubr.msk.f32.mxu0 %vm3657_vm1, %v3656_v6 }
 0x55d   :  { %3232 = vmatprep.subr.mxu0 %v3656_v6 }
 0x55e   :  { %3233 = vmatpush3.msra.mxu0 %v3775_v7 }
 0x55f   :  { %3234 = vmatprep.subr.mxu0 %v3656_v6 }
 0x560   :  { %3235 = vmatpush3.msra.mxu0 %v3784_v8 }
 0x561   :  { %3236 = vmatprep.subr.mxu0 %v3656_v6 }
 0x562   :  { %3237 = vmatpush3.msra.mxu0 %v3791_v9 }
 0x563   :  { %3252 = vmatprep.subr.mxu0 %v3656_v6 }
 0x61b   :  { %v567_v16 = vpop.f32.mrf.mxu0 }
 0x61c   :  { %v578_v17 = vadd.f32 %v567_v16, %v3813_v15  ;;  %v571_v21 = vadd.f32 %v567_v16, %v495_v20 }
 0x61d   :  { %v3218_v18 = vpop.f32.mrf.mxu0 }
 0x61e   :  { %580 = vrot.lane.b32.xlu0 %v578_v17, %s3655_s17  ;;  %v3021_v22 = vmul.f32 -1.442695, %v571_v21 }
 0x620   :  { %3450 = vpow2.f32 %v3021_v22 }
 0x622   :  { %601 = vperm.xlu0 %3437, %v599_v19  }
 0x62d   :  { %v3451_v23 = vpop.eup %3450 }
 0x62e   :  { %v575_v26 = vadd.f32 1.0, %v3451_v23 }
 0x630   :  { %3452 = vrcp.f32 %v575_v26 }
 0x63d   :  { %v3453_v27 = vpop.eup %3452 }
 0x63e   :  { %v590_v33 = vsub.f32 1.0, %v3453_v27  ;;  %v596_v36 = vmul.f32 %v3453_v27, %v485_v13 }
 0x690   :  { %v581_v28 = vpop.permute.xlu0 %580 }
 0x691   :  { %v583_v29 = vmul.f32 %v3453_v27, %v581_v28 }
 0x693   :  { %585 = vrot.lane.b32.xlu1 %v583_v29, %s3655_s17 }
 0x69d   :  { %v602_v35 = vpop.permute.xlu0 %601 }
 0x69e   :  { %vm603_vm12 = vcmp.eq.s32.totalorder %v602_v35, 1 }
 0x705   :  { %v586_v30 = vpop.permute.xlu1 %585 }
 0x706   :  { %v588_v31 = vadd.f32 %v586_v30, %v495_v20 }
 0x708   :  { %3454 = vtanh.f32 %v588_v31 }
 0x715   :  { %v3455_v32 = vpop.eup %3454 }
 0x716   :  { %592 = vrot.lane.b32.xlu1 %v3455_v32, %s3659_s8 }
 0x788   :  { %v593_v34 = vpop.permute.xlu1 %592 }
 0x789   :  { %v595_v37 = vmul.f32 %v593_v34, %v590_v33 }
 0x78b   :  { %v597_v38 = vadd.f32 %v596_v36, %v595_v37 }
 0x78d   :  { %v604_v39 = vsel %vm603_vm12, %v597_v38, %v485_v13  ;;  %v3902_v40 = vsel %vm603_vm12, %v597_v38, 0.0  ;;  %v733_v13 = vld [vmem:[#allocation3 + $0x8] sm:$0x3]  ;;  %v852_v38 = vld [vmem:[#allocation3 + $0xa] sm:$0x3] }
 0x78e   :  { %616 = vrot.lane.b32.xlu0 %v604_v39, %s3659_s8 }
 0x800   :  { %v617_v41 = vpop.permute.xlu0 %616 }
 0x801   :  { %3228 = vmatmul.mubr.msk.f32.vlgmr.msra.gmra.mxu1 %vm258_vm8, %v617_v41 }
 0x802   :  { %3242 = vmatpush3.msra.mxu1 %v3767_v5  ;;  %3249 = vmatprep.mubr.msk.f32.mxu1 %vm3657_vm1, %v3656_v6 }
 0x803   :  { %3243 = vmatprep.subr.mxu1 %v3656_v6 }
 0x804   :  { %3244 = vmatpush3.msra.mxu1 %v3775_v7 }
 0x805   :  { %3245 = vmatprep.subr.mxu1 %v3656_v6 }
 0x806   :  { %3246 = vmatpush3.msra.mxu1 %v3784_v8 }
 0x807   :  { %3247 = vmatprep.subr.mxu1 %v3656_v6 }
 0x808   :  { %3248 = vmatpush3.msra.mxu1 %v3791_v9 }
 0x809   :  { %3263 = vmatprep.subr.mxu1 %v3656_v6 }
 0x8c1   :  { %v686_v42 = vpop.f32.mrf.mxu1 }
 0x8c2   :  { %v697_v44 = vadd.f32 %v686_v42, %v3813_v15  ;;  %v690_v48 = vadd.f32 %v686_v42, %v614_v47 }
 0x8c3   :  { %v3229_v45 = vpop.f32.mrf.mxu1 }
 0x8c4   :  { %699 = vrot.lane.b32.xlu1 %v697_v44, %s3655_s17  ;;  %v3023_v49 = vmul.f32 -1.442695, %v690_v48 }
 0x8c6   :  { %3456 = vpow2.f32 %v3023_v49 }
 0x8c8   :  { %720 = vperm.xlu1 %3436, %v718_v46  }
 0x8d3   :  { %v3457_v50 = vpop.eup %3456 }
 0x8d4   :  { %v694_v51 = vadd.f32 1.0, %v3457_v50 }
 0x8d6   :  { %3458 = vrcp.f32 %v694_v51 }
 0x8e3   :  { %v3459_v52 = vpop.eup %3458 }
 0x8e4   :  { %v709_v58 = vsub.f32 1.0, %v3459_v52  ;;  %v715_v61 = vmul.f32 %v3459_v52, %v604_v39 }
 0x936   :  { %v700_v53 = vpop.permute.xlu1 %699 }
 0x937   :  { %v702_v54 = vmul.f32 %v3459_v52, %v700_v53 }
 0x939   :  { %704 = vrot.lane.b32.xlu0 %v702_v54, %s3655_s17 }
 0x943   :  { %v721_v60 = vpop.permute.xlu1 %720 }
 0x944   :  { %vm722_vm14 = vcmp.eq.s32.totalorder %v721_v60, 1 }
 0x9ab   :  { %v705_v55 = vpop.permute.xlu0 %704 }
 0x9ac   :  { %v707_v56 = vadd.f32 %v705_v55, %v614_v47 }
 0x9ae   :  { %3460 = vtanh.f32 %v707_v56 }
 0x9bb   :  { %v3461_v57 = vpop.eup %3460 }
 0x9bc   :  { %711 = vrot.lane.b32.xlu0 %v3461_v57, %s3659_s8 }
 0xa2e   :  { %v712_v59 = vpop.permute.xlu0 %711 }
 0xa2f   :  { %v714_v62 = vmul.f32 %v712_v59, %v709_v58 }
 0xa31   :  { %v716_v63 = vadd.f32 %v715_v61, %v714_v62  ;;  %v1075_v61 = vsel %vm1074_vm4, 1, %v3658_v24  ;;  %v971_v62 = vld [vmem:[#allocation3 + $0xc] sm:$0x3] }
 0xa33   :  { %v723_v0 = vsel %vm722_vm14, %v716_v63, %v604_v39  ;;  %v3922_v1 = vsel %vm722_vm14, %v716_v63, 0.0 }
 0xa34   :  { %735 = vrot.lane.b32.xlu1 %v723_v0, %s3659_s8 }
 0xaa6   :  { %v736_v2 = vpop.permute.xlu1 %735 }
 0xaa7   :  { %3239 = vmatmul.mubr.msk.f32.vlgmr.msra.gmra.mxu0 %vm258_vm8, %v736_v2 }
 0xaa8   :  { %3253 = vmatpush3.msra.mxu0 %v3767_v5  ;;  %3260 = vmatprep.mubr.msk.f32.mxu0 %vm3657_vm1, %v3656_v6 }
 0xaa9   :  { %3254 = vmatprep.subr.mxu0 %v3656_v6 }
 0xaaa   :  { %3255 = vmatpush3.msra.mxu0 %v3775_v7 }
 0xaab   :  { %3256 = vmatprep.subr.mxu0 %v3656_v6 }
 0xaac   :  { %3257 = vmatpush3.msra.mxu0 %v3784_v8 }
 0xaad   :  { %3258 = vmatprep.subr.mxu0 %v3656_v6 }
 0xaae   :  { %3259 = vmatpush3.msra.mxu0 %v3791_v9 }
 0xaaf   :  { %3274 = vmatprep.subr.mxu0 %v3656_v6 }
 0xb67   :  { %v805_v3 = vpop.f32.mrf.mxu0 }
 0xb68   :  { %v816_v4 = vadd.f32 %v805_v3, %v3813_v15  ;;  %v809_v14 = vadd.f32 %v805_v3, %v733_v13 }
 0xb69   :  { %v3240_v10 = vpop.f32.mrf.mxu0 }
 0xb6a   :  { %818 = vrot.lane.b32.xlu0 %v816_v4, %s3655_s17  ;;  %v3025_v16 = vmul.f32 -1.442695, %v809_v14 }
 0xb6c   :  { %3462 = vpow2.f32 %v3025_v16 }
 0xb6e   :  { %839 = vperm.xlu0 %3437, %v837_v11  }
 0xb79   :  { %v3463_v17 = vpop.eup %3462 }
 0xb7a   :  { %v813_v18 = vadd.f32 1.0, %v3463_v17 }
 0xb7c   :  { %3464 = vrcp.f32 %v813_v18 }
 0xb89   :  { %v3465_v19 = vpop.eup %3464 }
 0xb8a   :  { %v828_v27 = vsub.f32 1.0, %v3465_v19  ;;  %v834_v30 = vmul.f32 %v3465_v19, %v723_v0 }
 0xbdc   :  { %v819_v20 = vpop.permute.xlu0 %818 }
 0xbdd   :  { %v821_v21 = vmul.f32 %v3465_v19, %v819_v20 }
 0xbdf   :  { %823 = vrot.lane.b32.xlu1 %v821_v21, %s3655_s17 }
 0xbe9   :  { %v840_v29 = vpop.permute.xlu0 %839 }
 0xbea   :  { %vm841_vm0 = vcmp.eq.s32.totalorder %v840_v29, 1 }
 0xc51   :  { %v824_v22 = vpop.permute.xlu1 %823 }
 0xc52   :  { %v826_v23 = vadd.f32 %v824_v22, %v733_v13 }
 0xc54   :  { %3466 = vtanh.f32 %v826_v23 }
 0xc61   :  { %v3467_v26 = vpop.eup %3466 }
 0xc62   :  { %830 = vrot.lane.b32.xlu1 %v3467_v26, %s3659_s8 }
 0xcd4   :  { %v831_v28 = vpop.permute.xlu1 %830 }
 0xcd5   :  { %v833_v31 = vmul.f32 %v831_v28, %v828_v27 }
 0xcd7   :  { %v835_v32 = vadd.f32 %v834_v30, %v833_v31  ;;  %v1194_v31 = vsel %vm1193_vm9, 1, %v3658_v24 }
 0xcd9   :  { %v842_v33 = vsel %vm841_vm0, %v835_v32, %v723_v0  ;;  %v3942_v34 = vsel %vm841_vm0, %v835_v32, 0.0  ;;  %v1090_v32 = vld [vmem:[#allocation3 + $0xe] sm:$0x3] }
 0xcda   :  { %854 = vrot.lane.b32.xlu0 %v842_v33, %s3659_s8 }
 0xd4c   :  { %v855_v35 = vpop.permute.xlu0 %854 }
 0xd4d   :  { %3250 = vmatmul.mubr.msk.f32.vlgmr.msra.gmra.mxu1 %vm258_vm8, %v855_v35 }
 0xd4e   :  { %3264 = vmatpush3.msra.mxu1 %v3767_v5  ;;  %3271 = vmatprep.mubr.msk.f32.mxu1 %vm3657_vm1, %v3656_v6 }
 0xd4f   :  { %3265 = vmatprep.subr.mxu1 %v3656_v6 }
 0xd50   :  { %3266 = vmatpush3.msra.mxu1 %v3775_v7  ;;  %v956_v7 = vsel %vm955_vm2, 1, %v3658_v24 }
 0xd51   :  { %3267 = vmatprep.subr.mxu1 %v3656_v6 }
 0xd52   :  { %3268 = vmatpush3.msra.mxu1 %v3784_v8 }
 0xd53   :  { %3269 = vmatprep.subr.mxu1 %v3656_v6 }
 0xd54   :  { %3270 = vmatpush3.msra.mxu1 %v3791_v9 }
 0xd55   :  { %3285 = vmatprep.subr.mxu1 %v3656_v6 }
 0xe0d   :  { %v924_v36 = vpop.f32.mrf.mxu1 }
 0xe0e   :  { %v935_v5 = vadd.f32 %v924_v36, %v3813_v15  ;;  %v928_v39 = vadd.f32 %v924_v36, %v852_v38 }
 0xe0f   :  { %v3251_v37 = vpop.f32.mrf.mxu1 }
 0xe10   :  { %937 = vrot.lane.b32.xlu1 %v935_v5, %s3655_s17  ;;  %v3027_v8 = vmul.f32 -1.442695, %v928_v39 }
 0xe12   :  { %3468 = vpow2.f32 %v3027_v8 }
 0xe14   :  { %958 = vperm.xlu1 %3436, %v956_v7  }
 0xe1f   :  { %v3469_v41 = vpop.eup %3468 }
 0xe20   :  { %v932_v42 = vadd.f32 1.0, %v3469_v41 }
 0xe22   :  { %3470 = vrcp.f32 %v932_v42 }
 0xe2f   :  { %v3471_v9 = vpop.eup %3470 }
 0xe30   :  { %v947_v49 = vsub.f32 1.0, %v3471_v9  ;;  %v953_v52 = vmul.f32 %v3471_v9, %v842_v33 }
 0xe82   :  { %v938_v44 = vpop.permute.xlu1 %937 }
 0xe83   :  { %v940_v45 = vmul.f32 %v3471_v9, %v938_v44  ;;  %v1225_v44 = vld [vmem:[%s4481_s13 + $0x18] sm:$0xff] }
 0xe85   :  { %942 = vrot.lane.b32.xlu0 %v940_v45, %s3655_s17  ;;  %v1224_v45 = vld [vmem:[%s4481_s13 + $0x10] sm:$0xff] }
 0xe8f   :  { %v959_v51 = vpop.permute.xlu1 %958 }
 0xe90   :  { %vm960_vm3 = vcmp.eq.s32.totalorder %v959_v51, 1 }
 0xef7   :  { %v943_v46 = vpop.permute.xlu0 %942 }
 0xef8   :  { %v945_v47 = vadd.f32 %v943_v46, %v852_v38  ;;  %v1223_v46 = vld [vmem:[%s4481_s13 + $0x8] sm:$0xff] }
 0xefa   :  { %3472 = vtanh.f32 %v945_v47  ;;  %v1222_v47 = vld [vmem:[%s4481_s13] sm:$0xff]  ;;  %s3660_s13 = smov 32  }
 0xf07   :  { %v3473_v48 = vpop.eup %3472 }
 0xf08   :  { %949 = vrot.lane.b32.xlu0 %v3473_v48, %s3659_s8 }
 0xf7a   :  { %v950_v50 = vpop.permute.xlu0 %949 }
 0xf7b   :  { %v952_v53 = vmul.f32 %v950_v50, %v947_v49 }
 0xf7d   :  { %v954_v54 = vadd.f32 %v953_v52, %v952_v53 }
 0xf7f   :  { %v961_v55 = vsel %vm960_vm3, %v954_v54, %v842_v33  ;;  %v3962_v56 = vsel %vm960_vm3, %v954_v54, 0.0 }
 0xf80   :  { %973 = vrot.lane.b32.xlu1 %v961_v55, %s3659_s8 }
 0xff2   :  { %v974_v57 = vpop.permute.xlu1 %973 }
 0xff3   :  { %3261 = vmatmul.mubr.msk.f32.vlgmr.msra.gmra.mxu0 %vm258_vm8, %v974_v57 }
 0xff4   :  { %3282 = vmatprep.mubr.msk.f32.mxu0 %vm3657_vm1, %v3656_v6  ;;  %3275 = vmatpush3.msra.mxu0 %v1225_v44 }
 0xff5   :  { %3276 = vmatprep.subr.mxu0 %v3656_v6 }
 0xff6   :  { %3277 = vmatpush3.msra.mxu0 %v1224_v45 }
 0xff7   :  { %3278 = vmatprep.subr.mxu0 %v3656_v6 }
 0xff8   :  { %3279 = vmatpush3.msra.mxu0 %v1223_v46 }
 0xff9   :  { %3280 = vmatprep.subr.mxu0 %v3656_v6 }
 0xffa   :  { %3281 = vmatpush3.msra.mxu0 %v1222_v47 }
 0xffb   :  { %3296 = vmatprep.subr.mxu0 %v3656_v6 }
0x10b3   :  { %v1043_v58 = vpop.f32.mrf.mxu0 }
0x10b4   :  { %v1054_v59 = vadd.f32 %v1043_v58, %v3813_v15  ;;  %v1047_v63 = vadd.f32 %v1043_v58, %v971_v62 }
0x10b5   :  { %v3262_v60 = vpop.f32.mrf.mxu0 }
0x10b6   :  { %1056 = vrot.lane.b32.xlu0 %v1054_v59, %s3655_s17  ;;  %v3029_v0 = vmul.f32 -1.442695, %v1047_v63  ;;  %v4048_v60 = vld [vmem:[%s4478_s10 + $0x18] sm:$0xff]  ;;  %v4061_v63 = vld [vmem:[%s4478_s10 + $0x10] sm:$0xff] }
0x10b8   :  { %3474 = vpow2.f32 %v3029_v0  ;;  %v4070_v0 = vld [vmem:[%s4478_s10 + $0x8] sm:$0xff] }
0x10ba   :  { %1077 = vperm.xlu0 %3437, %v1075_v61  }
0x10c5   :  { %v3475_v2 = vpop.eup %3474 }
0x10c6   :  { %v1051_v3 = vadd.f32 1.0, %v3475_v2  ;;  %v4079_v2 = vld [vmem:[%s4478_s10] sm:$0xff] }
0x10c8   :  { %3476 = vrcp.f32 %v1051_v3 }
0x10d5   :  { %v3477_v4 = vpop.eup %3476 }
0x10d6   :  { %v1066_v17 = vsub.f32 1.0, %v3477_v4  ;;  %v1072_v20 = vmul.f32 %v3477_v4, %v961_v55 }
0x1128   :  { %v1057_v10 = vpop.permute.xlu0 %1056 }
0x1129   :  { %v1059_v11 = vmul.f32 %v3477_v4, %v1057_v10  ;;  %v1464_v4 = vlaneseq }
0x112b   :  { %1061 = vrot.lane.b32.xlu1 %v1059_v11, %s3655_s17 }
0x1135   :  { %v1078_v19 = vpop.permute.xlu0 %1077 }
0x1136   :  { %vm1079_vm5 = vcmp.eq.s32.totalorder %v1078_v19, 1 }
0x119d   :  { %v1062_v13 = vpop.permute.xlu1 %1061 }
0x119e   :  { %v1064_v14 = vadd.f32 %v1062_v13, %v971_v62  ;;  %v1465_v13 = vshrl.u32 %v1464_v4, 7 }
0x11a0   :  { %3478 = vtanh.f32 %v1064_v14 }
0x11ad   :  { %v3479_v16 = vpop.eup %3478 }
0x11ae   :  { %1068 = vrot.lane.b32.xlu1 %v3479_v16, %s3659_s8 }
0x1220   :  { %v1069_v18 = vpop.permute.xlu1 %1068 }
0x1221   :  { %v1071_v21 = vmul.f32 %v1069_v18, %v1066_v17  ;;  %v4100_v17 = vsub.s32 0, %v1465_v13  ;;  %v4102_v18 = vsub.s32 1, %v1465_v13 }
0x1223   :  { %v1073_v22 = vadd.f32 %v1072_v20, %v1071_v21 }
0x1225   :  { %v3974_v23 = vsel %vm1079_vm5, %v1073_v22, %v961_v55  ;;  %v3976_v26 = vsel %vm1079_vm5, %v1073_v22, 0.0  ;;  %vm1220_vm5 = vcmask 254976  }
0x1226   :  { %1092 = vrot.lane.b32.xlu0 %v3974_v23, %s3659_s8 }
0x1298   :  { %v1093_v27 = vpop.permute.xlu0 %1092 }
0x1299   :  { %3272 = vmatmul.mubr.msk.f32.vlgmr.msra.gmra.mxu1 %vm258_vm8, %v1093_v27 }
0x129a   :  { %3293 = vmatprep.mubr.msk.f32.mxu1 %vm3657_vm1, %v3656_v6  ;;  %3286 = vmatpush3.msra.mxu1 %v1225_v44 }
0x129b   :  { %3287 = vmatprep.subr.mxu1 %v3656_v6 }
0x129c   :  { %3288 = vmatpush3.msra.mxu1 %v1224_v45 }
0x129d   :  { %3289 = vmatprep.subr.mxu1 %v3656_v6 }
0x129e   :  { %3290 = vmatpush3.msra.mxu1 %v1223_v46 }
0x129f   :  { %3291 = vmatprep.subr.mxu1 %v3656_v6 }
0x12a0   :  { %3292 = vmatpush3.msra.mxu1 %v1222_v47 }
0x12a1   :  { %3307 = vmatprep.subr.mxu1 %v3656_v6 }
0x1359   :  { %v1162_v28 = vpop.f32.mrf.mxu1 }
0x135a   :  { %v1173_v29 = vadd.f32 %v1162_v28, %v3813_v15  ;;  %v1166_v33 = vadd.f32 %v1162_v28, %v1090_v32  ;;  %v4111_v28 = vld [vmem:[%s4482_s14] ss:$0 sm:$0xff] }
0x135b   :  { %v3273_v30 = vpop.f32.mrf.mxu1 }
0x135c   :  { %1175 = vrot.lane.b32.xlu1 %v1173_v29, %s3655_s17  ;;  %v3031_v15 = vmul.f32 -1.442695, %v1166_v33 }
0x135e   :  { %3480 = vpow2.f32 %v3031_v15 }
0x1360   :  { %1196 = vperm.xlu1 %3436, %v1194_v31  }
0x1364   :  { %488 = vrot.lane.b32.xlu1 %v3881_v12, %s3659_s8 }
0x1368   :  { %726 = vrot.lane.b32.xlu1 %v3922_v1, %s3659_s8 }
0x136b   :  { %v3481_v25 = vpop.eup %3480 }
0x136c   :  { %964 = vrot.lane.b32.xlu1 %v3962_v56, %s3659_s8  ;;  %v1170_v35 = vadd.f32 1.0, %v3481_v25  ;;  %v3032_v25 = vld [vmem:[%s4480_s12] ss:$0 sm:$0xff] }
0x136e   :  { %3482 = vrcp.f32 %v1170_v35  ;;  %v4125_v35 = vld [vmem:[%s4477_s9 + $0x18] sm:$0xff] }
0x137b   :  { %v3483_v36 = vpop.eup %3482 }
0x137c   :  { %v1185_v48 = vsub.f32 1.0, %v3483_v36  ;;  %v1191_v50 = vmul.f32 %v3483_v36, %v3974_v23 }
0x13ce   :  { %v1176_v5 = vpop.permute.xlu1 %1175 }
0x13cf   :  { %v1178_v37 = vmul.f32 %v3483_v36, %v1176_v5  ;;  %v4130_v36 = vld [vmem:[%s4477_s9 + $0x10] sm:$0xff]  ;;  %v4137_v5 = vld [vmem:[%s4477_s9 + $0x8] sm:$0xff] }
0x13d1   :  { %1180 = vrot.lane.b32.xlu0 %v1178_v37, %s3655_s17  ;;  %v4144_v37 = vld [vmem:[%s4477_s9] sm:$0xff] }
0x13db   :  { %v1197_v7 = vpop.permute.xlu1 %1196 }
0x13dc   :  { %vm1198_vm10 = vcmp.eq.s32.totalorder %v1197_v7, 1 }
0x13df   :  { %v489_v38 = vpop.permute.xlu1 %488 }
0x13e0   :  { %491 = vst.msk [vmem:[#allocation2 + $0x1] sm:$0x1] %vm373_vm6, %v489_v38 }
0x13e1   :  { %492 = vst.msk [vmem:[#allocation2 + $0x8] sm:$0x2] %vm375_vm7, %v489_v38 }
0x13e3   :  { %v727_v39 = vpop.permute.xlu1 %726 }
0x13e4   :  { %729 = vst.msk [vmem:[#allocation2 + $0x3] sm:$0x1] %vm373_vm6, %v727_v39 }
0x13e5   :  { %730 = vst.msk [vmem:[#allocation2 + $0xa] sm:$0x2] %vm375_vm7, %v727_v39 }
0x13e7   :  { %v965_v8 = vpop.permute.xlu1 %964 }
0x13e8   :  { %967 = vst.msk [vmem:[#allocation2 + $0x5] sm:$0x1] %vm373_vm6, %v965_v8 }
0x13e9   :  { %968 = vst.msk [vmem:[#allocation2 + $0xc] sm:$0x2] %vm375_vm7, %v965_v8 }
0x1443   :  { %v1181_v41 = vpop.permute.xlu0 %1180 }
0x1444   :  { %v1183_v42 = vadd.f32 %v1181_v41, %v1090_v32 }
0x1446   :  { %3484 = vtanh.f32 %v1183_v42  ;;  %v4153_v42 = vld [vmem:[%s4469_s1] sm:$0x3] }
0x1447   :  { %vm1913_vm12 = vcmp.lt.s32.totalorder %v4153_v42, 1  ;;  %vm2175_vm14 = vcmp.lt.s32.totalorder %v4153_v42, 2  ;;  %vm2437_vm0 = vcmp.lt.s32.totalorder %v4153_v42, 3 }
0x1453   :  { %v3485_v9 = vpop.eup %3484 }
0x1454   :  { %1187 = vrot.lane.b32.xlu0 %v3485_v9, %s3659_s8 }
0x1458   :  { %607 = vrot.lane.b32.xlu0 %v3902_v40, %s3659_s8 }
0x145c   :  { %845 = vrot.lane.b32.xlu0 %v3942_v34, %s3659_s8 }
0x1460   :  { %1083 = vrot.lane.b32.xlu0 %v3976_v26, %s3659_s8 }
0x14c6   :  { %v1188_v49 = vpop.permute.xlu0 %1187 }
0x14c7   :  { %v1190_v51 = vmul.f32 %v1188_v49, %v1185_v48 }
0x14c9   :  { %v1192_v52 = vadd.f32 %v1191_v50, %v1190_v51 }
0x14ca   :  { %v608_v53 = vpop.permute.xlu0 %607 }
0x14cb   :  { %610 = vst.msk [vmem:[#allocation2 + $0x2] sm:$0x1] %vm373_vm6, %v608_v53  ;;  %v4030_v54 = vsel %vm1198_vm10, %v1192_v52, 0.0  ;;  %v4033_v55 = vsel %vm1198_vm10, %v1192_v52, %v3974_v23 }
0x14cc   :  { %611 = vst.msk [vmem:[#allocation2 + $0x9] sm:$0x2] %vm375_vm7, %v608_v53  ;;  %1202 = vrot.lane.b32.xlu1 %v4030_v54, %s3659_s8  ;;  %1390 = vrot.lane.b32.xlu0 %v4033_v55, %s3659_s8 }
0x14ce   :  { %v846_v57 = vpop.permute.xlu0 %845 }
0x14cf   :  { %848 = vst.msk [vmem:[#allocation2 + $0x4] sm:$0x1] %vm373_vm6, %v846_v57 }
0x14d0   :  { %849 = vst.msk [vmem:[#allocation2 + $0xb] sm:$0x2] %vm375_vm7, %v846_v57 }
0x14d2   :  { %v1084_v58 = vpop.permute.xlu0 %1083 }
0x14d3   :  { %1086 = vst.msk [vmem:[#allocation2 + $0x6] sm:$0x1] %vm373_vm6, %v1084_v58 }
0x14d4   :  { %1087 = vst.msk [vmem:[#allocation2 + $0xd] sm:$0x2] %vm375_vm7, %v1084_v58 }
0x153e   :  { %v1203_v59 = vpop.permute.xlu1 %1202  ;;  %v1391_v3 = vpop.permute.xlu0 %1390 }
0x153f   :  { %1205 = vst.msk [vmem:[#allocation2 + $0x7] sm:$0x1] %vm373_vm6, %v1203_v59  ;;  %vm1651_vm6 = vcmp.lt.s32.totalorder %v4153_v42, 0 }
0x1540   :  { %1206 = vst.msk [vmem:[#allocation2 + $0xe] sm:$0x2] %vm375_vm7, %v1203_v59  ;;  %v1652_v51 = vsel %vm1651_vm6, 1, %v3658_v24  ;;  %vm1540_vm7 = vcmask 1040384  }
0x1546   :  { %v4050_v61 = vld [vmem:[#allocation2] sm:$0xff] }
0x1547   :  { %v4052_v62 = vld [vmem:[#allocation2 + $0x8] sm:$0xff]  ;;  %3283 = vmatmul.mubr.msk.f32.vlgmr.msra.gmra.mxu0 %vm258_vm8, %v4050_v61 }
0x1548   :  { %3294 = vmatmul.mubr.msk.f32.vlgmr.msra.gmra.mxu1 %vm258_vm8, %v4052_v62  ;;  %3297 = vmatpush3.msra.mxu0 %v4048_v60 }
0x1549   :  { %3304 = vmatprep.mubr.msk.f32.mxu0 %vm3657_vm1, %v3656_v6  ;;  %3298 = vmatprep.subr.mxu0 %v3656_v6 }
0x154a   :  { %3315 = vmatprep.mubr.msk.f32.mxu1 %vm3657_vm1, %v3656_v6  ;;  %3299 = vmatpush3.msra.mxu0 %v4061_v63 }
0x154b   :  { %3300 = vmatprep.subr.mxu0 %v3656_v6  ;;  %3308 = vmatpush3.msra.mxu1 %v4125_v35 }
0x154c   :  { %3301 = vmatpush3.msra.mxu0 %v4070_v0  ;;  %3309 = vmatprep.subr.mxu1 %v3656_v6 }
0x154d   :  { %3302 = vmatprep.subr.mxu0 %v3656_v6  ;;  %3310 = vmatpush3.msra.mxu1 %v4130_v36 }
0x154e   :  { %3303 = vmatpush3.msra.mxu0 %v4079_v2  ;;  %3311 = vmatprep.subr.mxu1 %v3656_v6 }
0x154f   :  { %3305 = vmatmul.mubr.msk.f32.vlgmr.msra.gmra.mxu0 %vm258_vm8, %v1391_v3  ;;  %3318 = vmatprep.subr.mxu0 %v3656_v6 }
0x1550   :  { %3319 = vmatpush3.msra.mxu0 %v4048_v60  ;;  %3326 = vmatprep.mubr.msk.f32.mxu0 %vm3657_vm1, %v3656_v6 }
0x1551   :  { %3320 = vmatprep.subr.mxu0 %v3656_v6  ;;  %3312 = vmatpush3.msra.mxu1 %v4137_v5 }
0x1552   :  { %3321 = vmatpush3.msra.mxu0 %v4061_v63  ;;  %3313 = vmatprep.subr.mxu1 %v3656_v6 }
0x1553   :  { %3322 = vmatprep.subr.mxu0 %v3656_v6  ;;  %3314 = vmatpush3.msra.mxu1 %v4144_v37 }
0x1554   :  { %3323 = vmatpush3.msra.mxu0 %v4070_v0  ;;  %3329 = vmatprep.subr.mxu1 %v3656_v6 }
0x1555   :  { %3324 = vmatprep.subr.mxu0 %v3656_v6 }
0x1556   :  { %3325 = vmatpush3.msra.mxu0 %v4079_v2 }
0x1557   :  { %3340 = vmatprep.subr.mxu0 %v3656_v6 }
0x1607   :  { %v4096_v10 = vpop.f32.mrf.mxu0 }
0x1608   :  { %v4098_v11 = vpop.f32.mrf.mxu1 }
0x1609   :  { %v3284_v14 = vpop.f32.mrf.mxu0 }
0x160a   :  { %v3295_v16 = vpop.f32.mrf.mxu1 }
0x160f   :  { %v1460_v19 = vpop.f32.mrf.mxu0 }
0x1610   :  { %v1467_v20 = vrot.slane %v1460_v19, %v4100_v17  ;;  %v1508_v21 = vrot.slane %v1460_v19, %v4102_v18 }
0x1611   :  { %v3306_v22 = vpop.f32.mrf.mxu0 }
0x1612   :  { %v1468_v23 = vadd.f32 %v1467_v20, %v4096_v10  ;;  %v1509_v27 = vadd.f32 %v1508_v21, %v4098_v11 }
0x1614   :  { %3486 = vtanh.f32 %v1468_v23 }
0x1615   :  { %3488 = vtanh.f32 %v1509_v27 }
0x1621   :  { %v3487_v29 = vpop.eup %3486 }
0x1622   :  { %v3489_v30 = vpop.eup %3488  ;;  %v1476_v31 = vmul.f32 %v3487_v29, %v4111_v28 }
0x1623   :  { %v1511_v32 = vmul.f32 %v3489_v30, %v4111_v28 }
0x1624   :  { %v1477_v33 = vsel %vm258_vm8, %v1476_v31, 0.0 }
0x1625   :  { %v1512_v15 = vsel %vm258_vm8, %v1511_v32, 0.0  ;;  %1478 = vadd.xlane.f32.xlu1 %v1477_v33 }
0x1626   :  { %1513 = vadd.xlane.f32.xlu0 %v1512_v15 }
0x1636   :  { %1618 = vrot.lane.b32.xlu1 %v1460_v19, %s3659_s8 }
0x163c   :  { %1628 = vrot.lane.b32.xlu0 %v3032_v25, %s3659_s8 }
0x16ae   :  { %v1479_v7 = vpop.xlane.xlu1 %1478 }
0x16af   :  { %v1514_v38 = vpop.xlane.xlu0 %1513  ;;  %v1480_v39 = vrot.slane %v1479_v7, 4 }
0x16b0   :  { %v1515_v8 = vrot.slane %v1514_v38, 4 }
0x16b1   :  { %v1481_v41 = vmax.f32 %v1479_v7, %v1480_v39 }
0x16b2   :  { %v1516_v9 = vmax.f32 %v1514_v38, %v1515_v8 }
0x16b3   :  { %v1482_v44 = vrot.slane %v1481_v41, 2  ;;  %v4155_v45 = vpop.permute.xlu0 %1628 }
0x16b4   :  { %v1517_v46 = vrot.slane %v1516_v9, 2  ;;  %v1631_v47 = vadd.f32 %v4155_v45, %v1460_v19 }
0x16b5   :  { %v1483_v48 = vmax.f32 %v1481_v41, %v1482_v44 }
0x16b6   :  { %v1518_v49 = vmax.f32 %v1516_v9, %v1517_v46  ;;  %1633 = vrot.lane.b32.xlu1 %v1631_v47, %s3660_s13 }
0x16b7   :  { %v1484_v50 = vrot.slane %v1483_v48, 1 }
0x16b8   :  { %v1519_v52 = vrot.slane %v1518_v49, 1 }
0x16b9   :  { %v1485_v53 = vmax.f32 %v1483_v48, %v1484_v50 }
0x16ba   :  { %v1520_v57 = vmax.f32 %v1518_v49, %v1519_v52  ;;  %1654 = vperm.xlu1 %3436, %v1652_v51  }
0x16bb   :  { %v1486_v58 = vsub.f32 %v1479_v7, %v1485_v53 }
0x16bc   :  { %v1521_v59 = vsub.f32 %v1514_v38, %v1520_v57 }
0x16bd   :  { %v1487_v3 = vmul.f32 1.442695, %v1486_v58 }
0x16be   :  { %v1522_v4 = vmul.f32 1.442695, %v1521_v59 }
0x16bf   :  { %3490 = vpow2.f32 %v1487_v3 }
0x16c0   :  { %3492 = vpow2.f32 %v1522_v4  ;;  %v1542_v4 = vld [vmem:[#allocation4] sm:$0x3] }
0x16cc   :  { %v3491_v13 = vpop.eup %3490 }
0x16cd   :  { %v3493_v14 = vpop.eup %3492  ;;  %v1489_v16 = vrot.slane %v3491_v13, 4 }
0x16ce   :  { %v1524_v19 = vrot.slane %v3493_v14, 4 }
0x16cf   :  { %v1490_v20 = vadd.f32 %v3491_v13, %v1489_v16  ;;  %v1619_v16 = vpop.permute.xlu1 %1618 }
0x16d0   :  { %v1525_v21 = vadd.f32 %v3493_v14, %v1524_v19 }
0x16d1   :  { %v1491_v22 = vrot.slane %v1490_v20, 2 }
0x16d2   :  { %v1526_v23 = vrot.slane %v1525_v21, 2 }
0x16d3   :  { %v1492_v27 = vadd.f32 %v1491_v22, %v1490_v20 }
0x16d4   :  { %v1527_v29 = vadd.f32 %v1526_v23, %v1525_v21 }
0x16d5   :  { %v1493_v30 = vrot.slane %v1492_v27, 1 }
0x16d6   :  { %v1528_v31 = vrot.slane %v1527_v29, 1 }
0x16d7   :  { %v1494_v32 = vadd.f32 %v1493_v30, %v1492_v27 }
0x16d8   :  { %v1529_v33 = vadd.f32 %v1528_v31, %v1527_v29 }
0x16d9   :  { %3494 = vrcp.f32 %v1494_v32 }
0x16da   :  { %3496 = vrcp.f32 %v1529_v33 }
0x16e6   :  { %v3495_v15 = vpop.eup %3494 }
0x16e7   :  { %v3497_v25 = vpop.eup %3496  ;;  %v1496_v7 = vmul.f32 %v3495_v15, %v3491_v13 }
0x16e8   :  { %v1531_v38 = vmul.f32 %v3497_v25, %v3493_v14 }
0x16e9   :  { %v1497_v39 = vmul.f32 %v1496_v7, %v4050_v61 }
0x16ea   :  { %v1532_v8 = vmul.f32 %v1531_v38, %v4052_v62 }
0x16eb   :  { %v1498_v41 = vsel %vm258_vm8, %v1497_v39, 0.0 }
0x16ec   :  { %v1499_v9 = vrot.slane %v1498_v41, 4  ;;  %v1533_v44 = vsel %vm258_vm8, %v1532_v8, 0.0 }
0x16ed   :  { %v1534_v46 = vrot.slane %v1533_v44, 4 }
0x16ee   :  { %v1500_v47 = vadd.f32 %v1499_v9, %v1498_v41 }
0x16ef   :  { %v1535_v48 = vadd.f32 %v1534_v46, %v1533_v44 }
0x16f0   :  { %v1501_v49 = vrot.slane %v1500_v47, 2 }
0x16f1   :  { %v1536_v50 = vrot.slane %v1535_v48, 2 }
0x16f2   :  { %v1502_v51 = vadd.f32 %v1501_v49, %v1500_v47 }
0x16f3   :  { %v1537_v52 = vadd.f32 %v1536_v50, %v1535_v48 }
0x16f4   :  { %v1503_v53 = vrot.slane %v1502_v51, 1 }
0x16f5   :  { %v1538_v57 = vrot.slane %v1537_v52, 1 }
0x16f6   :  { %v1504_v58 = vadd.f32 %v1503_v53, %v1502_v51 }
0x16f7   :  { %v1539_v59 = vadd.f32 %v1538_v57, %v1537_v52 }
0x16f9   :  { %v1541_v3 = vsel %vm1540_vm7, %v1504_v58, %v1539_v59 }
0x16fa   :  { %3316 = vmatmul.mubr.msk.f32.vlgmr.msra.gmra.mxu1 %vm258_vm8, %v1541_v3 }
0x16fb   :  { %3330 = vmatpush3.msra.mxu1 %v4125_v35  ;;  %3337 = vmatprep.mubr.msk.f32.mxu1 %vm3657_vm1, %v3656_v6 }
0x16fc   :  { %3331 = vmatprep.subr.mxu1 %v3656_v6 }
0x16fd   :  { %3332 = vmatpush3.msra.mxu1 %v4130_v36 }
0x16fe   :  { %3333 = vmatprep.subr.mxu1 %v3656_v6 }
0x16ff   :  { %3334 = vmatpush3.msra.mxu1 %v4137_v5 }
0x1700   :  { %3335 = vmatprep.subr.mxu1 %v3656_v6 }
0x1701   :  { %3336 = vmatpush3.msra.mxu1 %v4144_v37 }
0x1702   :  { %3351 = vmatprep.subr.mxu1 %v3656_v6 }
0x1728   :  { %v1634_v29 = vpop.permute.xlu1 %1633 }
0x1735   :  { %v1655_v7 = vpop.permute.xlu1 %1654 }
0x1736   :  { %vm1656_vm11 = vcmp.eq.s32.totalorder %v1655_v7, 1 }
0x17ba   :  { %v1612_v13 = vpop.f32.mrf.mxu1 }
0x17bb   :  { %v1616_v14 = vadd.f32 %v1612_v13, %v1542_v4  ;;  %v1914_v4 = vsel %vm1913_vm12, 1, %v3658_v24 }
0x17bc   :  { %v3317_v19 = vpop.f32.mrf.mxu1 }
0x17bd   :  { %v1621_v20 = vadd.f32 %v1619_v16, %v1616_v14 }
0x17bf   :  { %v3038_v21 = vmul.f32 -1.442695, %v1621_v20 }
0x17c1   :  { %3498 = vpow2.f32 %v3038_v21 }
0x17ce   :  { %v3499_v22 = vpop.eup %3498 }
0x17cf   :  { %v1625_v23 = vadd.f32 1.0, %v3499_v22 }
0x17d1   :  { %3500 = vrcp.f32 %v1625_v23 }
0x17de   :  { %v3501_v27 = vpop.eup %3500 }
0x17df   :  { %v1636_v30 = vmul.f32 %v3501_v27, %v1634_v29  ;;  %v1643_v15 = vsub.f32 1.0, %v3501_v27  ;;  %v1649_v38 = vmul.f32 %v3501_v27, %v4033_v55 }
0x17e1   :  { %1638 = vrot.lane.b32.xlu0 %v1636_v30, %s3655_s17 }
0x1853   :  { %v1639_v31 = vpop.permute.xlu0 %1638 }
0x1854   :  { %v1641_v32 = vadd.f32 %v1639_v31, %v1616_v14 }
0x1856   :  { %3502 = vtanh.f32 %v1641_v32 }
0x1863   :  { %v3503_v33 = vpop.eup %3502 }
0x1864   :  { %1645 = vrot.lane.b32.xlu0 %v3503_v33, %s3659_s8 }
0x18d6   :  { %v1646_v25 = vpop.permute.xlu0 %1645 }
0x18d7   :  { %v1648_v39 = vmul.f32 %v1646_v25, %v1643_v15 }
0x18d9   :  { %v1650_v8 = vadd.f32 %v1649_v38, %v1648_v39 }
0x18db   :  { %v4180_v41 = vsel %vm1656_vm11, 0.0, %v1650_v8  ;;  %v4183_v9 = vsel %vm1656_vm11, %v4033_v55, %v1650_v8 }
0x18dc   :  { %1661 = vrot.lane.b32.xlu1 %v4183_v9, %s3659_s8 }
0x194e   :  { %v1662_v44 = vpop.permute.xlu1 %1661 }
0x194f   :  { %3327 = vmatmul.mubr.msk.f32.vlgmr.msra.gmra.mxu0 %vm258_vm8, %v1662_v44 }
0x1950   :  { %3341 = vmatpush3.msra.mxu0 %v4048_v60  ;;  %3348 = vmatprep.mubr.msk.f32.mxu0 %vm3657_vm1, %v3656_v6 }
0x1951   :  { %3342 = vmatprep.subr.mxu0 %v3656_v6 }
0x1952   :  { %3343 = vmatpush3.msra.mxu0 %v4061_v63 }
0x1953   :  { %3344 = vmatprep.subr.mxu0 %v3656_v6 }
0x1954   :  { %3345 = vmatpush3.msra.mxu0 %v4070_v0 }
0x1955   :  { %3346 = vmatprep.subr.mxu0 %v3656_v6 }
0x1956   :  { %3347 = vmatpush3.msra.mxu0 %v4079_v2 }
0x1957   :  { %3362 = vmatprep.subr.mxu0 %v3656_v6 }
0x1a0f   :  { %v1731_v55 = vpop.f32.mrf.mxu0 }
0x1a10   :  { %v1738_v46 = vrot.slane %v1731_v55, %v4100_v17  ;;  %v1773_v47 = vrot.slane %v1731_v55, %v4102_v18  ;;  %v1893_v3 = vadd.f32 %v1731_v55, %v4155_v45 }
0x1a11   :  { %v3328_v48 = vpop.f32.mrf.mxu0 }
0x1a12   :  { %v1739_v49 = vadd.f32 %v1738_v46, %v4096_v10  ;;  %v1774_v50 = vadd.f32 %v1773_v47, %v4098_v11 }
0x1a14   :  { %3504 = vtanh.f32 %v1739_v49 }
0x1a15   :  { %3506 = vtanh.f32 %v1774_v50 }
0x1a21   :  { %v3505_v51 = vpop.eup %3504 }
0x1a22   :  { %v3507_v52 = vpop.eup %3506  ;;  %v1741_v53 = vmul.f32 %v3505_v51, %v4111_v28 }
0x1a23   :  { %v1776_v57 = vmul.f32 %v3507_v52, %v4111_v28 }
0x1a24   :  { %v1742_v58 = vsel %vm258_vm8, %v1741_v53, 0.0 }
0x1a25   :  { %v1777_v59 = vsel %vm258_vm8, %v1776_v57, 0.0  ;;  %1743 = vadd.xlane.f32.xlu0 %v1742_v58 }
0x1a26   :  { %1778 = vadd.xlane.f32.xlu1 %v1777_v59 }
0x1a37   :  { %1895 = vrot.lane.b32.xlu1 %v1893_v3, %s3660_s13 }
0x1a3b   :  { %1916 = vperm.xlu1 %3436, %v1914_v4   ;;  %1883 = vrot.lane.b32.xlu0 %v1731_v55, %s3659_s8 }
0x1aae   :  { %v1744_v13 = vpop.xlane.xlu0 %1743 }
0x1aaf   :  { %v1779_v14 = vpop.xlane.xlu1 %1778  ;;  %v1745_v16 = vrot.slane %v1744_v13, 4 }
0x1ab0   :  { %v1780_v19 = vrot.slane %v1779_v14, 4 }
0x1ab1   :  { %v1746_v20 = vmax.f32 %v1744_v13, %v1745_v16 }
0x1ab2   :  { %v1781_v21 = vmax.f32 %v1779_v14, %v1780_v19 }
0x1ab3   :  { %v1747_v22 = vrot.slane %v1746_v20, 2 }
0x1ab4   :  { %v1782_v23 = vrot.slane %v1781_v21, 2 }
0x1ab5   :  { %v1748_v27 = vmax.f32 %v1746_v20, %v1747_v22 }
0x1ab6   :  { %v1783_v29 = vmax.f32 %v1781_v21, %v1782_v23 }
0x1ab7   :  { %v1749_v30 = vrot.slane %v1748_v27, 1 }
0x1ab8   :  { %v1784_v31 = vrot.slane %v1783_v29, 1 }
0x1ab9   :  { %v1750_v32 = vmax.f32 %v1748_v27, %v1749_v30 }
0x1aba   :  { %v1785_v33 = vmax.f32 %v1783_v29, %v1784_v31 }
0x1abb   :  { %v1751_v15 = vsub.f32 %v1744_v13, %v1750_v32 }
0x1abc   :  { %v1786_v25 = vsub.f32 %v1779_v14, %v1785_v33 }
0x1abd   :  { %v1752_v7 = vmul.f32 1.442695, %v1751_v15 }
0x1abe   :  { %v1787_v38 = vmul.f32 1.442695, %v1786_v25 }
0x1abf   :  { %3508 = vpow2.f32 %v1752_v7 }
0x1ac0   :  { %3510 = vpow2.f32 %v1787_v38 }
0x1acc   :  { %v3509_v39 = vpop.eup %3508 }
0x1acd   :  { %v3511_v8 = vpop.eup %3510  ;;  %v1754_v44 = vrot.slane %v3509_v39, 4 }
0x1ace   :  { %v1789_v55 = vrot.slane %v3511_v8, 4 }
0x1acf   :  { %v1755_v46 = vadd.f32 %v3509_v39, %v1754_v44 }
0x1ad0   :  { %v1790_v47 = vadd.f32 %v3511_v8, %v1789_v55  ;;  %v1884_v55 = vpop.permute.xlu0 %1883 }
0x1ad1   :  { %v1756_v48 = vrot.slane %v1755_v46, 2 }
0x1ad2   :  { %v1791_v49 = vrot.slane %v1790_v47, 2 }
0x1ad3   :  { %v1757_v50 = vadd.f32 %v1756_v48, %v1755_v46 }
0x1ad4   :  { %v1792_v51 = vadd.f32 %v1791_v49, %v1790_v47 }
0x1ad5   :  { %v1758_v52 = vrot.slane %v1757_v50, 1 }
0x1ad6   :  { %v1793_v53 = vrot.slane %v1792_v51, 1 }
0x1ad7   :  { %v1759_v57 = vadd.f32 %v1758_v52, %v1757_v50  ;;  %v1896_v52 = vpop.permute.xlu1 %1895 }
0x1ad8   :  { %v1794_v58 = vadd.f32 %v1793_v53, %v1792_v51 }
0x1ad9   :  { %3512 = vrcp.f32 %v1759_v57 }
0x1ada   :  { %3514 = vrcp.f32 %v1794_v58 }
0x1ae6   :  { %v3513_v59 = vpop.eup %3512 }
0x1ae7   :  { %v3515_v3 = vpop.eup %3514  ;;  %v1761_v4 = vmul.f32 %v3513_v59, %v3509_v39  ;;  %v1807_v39 = vld [vmem:[#allocation4 + $0x2] sm:$0x3] }
0x1ae8   :  { %v1796_v13 = vmul.f32 %v3515_v3, %v3511_v8 }
0x1ae9   :  { %v1762_v14 = vmul.f32 %v1761_v4, %v4050_v61 }
0x1aea   :  { %v1797_v16 = vmul.f32 %v1796_v13, %v4052_v62  ;;  %v1917_v13 = vpop.permute.xlu1 %1916 }
0x1aeb   :  { %v1763_v19 = vsel %vm258_vm8, %v1762_v14, 0.0  ;;  %vm1918_vm13 = vcmp.eq.s32.totalorder %v1917_v13, 1 }
0x1aec   :  { %v1764_v20 = vrot.slane %v1763_v19, 4  ;;  %v1798_v21 = vsel %vm258_vm8, %v1797_v16, 0.0 }
0x1aed   :  { %v1799_v22 = vrot.slane %v1798_v21, 4 }
0x1aee   :  { %v1765_v23 = vadd.f32 %v1764_v20, %v1763_v19 }
0x1aef   :  { %v1800_v27 = vadd.f32 %v1799_v22, %v1798_v21 }
0x1af0   :  { %v1766_v29 = vrot.slane %v1765_v23, 2 }
0x1af1   :  { %v1801_v30 = vrot.slane %v1800_v27, 2 }
0x1af2   :  { %v1767_v31 = vadd.f32 %v1766_v29, %v1765_v23 }
0x1af3   :  { %v1802_v32 = vadd.f32 %v1801_v30, %v1800_v27 }
0x1af4   :  { %v1768_v33 = vrot.slane %v1767_v31, 1 }
0x1af5   :  { %v1803_v15 = vrot.slane %v1802_v32, 1 }
0x1af6   :  { %v1769_v25 = vadd.f32 %v1768_v33, %v1767_v31 }
0x1af7   :  { %v1804_v7 = vadd.f32 %v1803_v15, %v1802_v32 }
0x1af9   :  { %v1805_v38 = vsel %vm1540_vm7, %v1769_v25, %v1804_v7 }
0x1afa   :  { %3338 = vmatmul.mubr.msk.f32.vlgmr.msra.gmra.mxu1 %vm258_vm8, %v1805_v38 }
0x1afb   :  { %3352 = vmatpush3.msra.mxu1 %v4125_v35  ;;  %3359 = vmatprep.mubr.msk.f32.mxu1 %vm3657_vm1, %v3656_v6 }
0x1afc   :  { %3353 = vmatprep.subr.mxu1 %v3656_v6 }
0x1afd   :  { %3354 = vmatpush3.msra.mxu1 %v4130_v36 }
0x1afe   :  { %3355 = vmatprep.subr.mxu1 %v3656_v6 }
0x1aff   :  { %3356 = vmatpush3.msra.mxu1 %v4137_v5 }
0x1b00   :  { %3357 = vmatprep.subr.mxu1 %v3656_v6 }
0x1b01   :  { %3358 = vmatpush3.msra.mxu1 %v4144_v37 }
0x1b02   :  { %3373 = vmatprep.subr.mxu1 %v3656_v6 }
0x1bba   :  { %v1877_v8 = vpop.f32.mrf.mxu1 }
0x1bbb   :  { %v1881_v44 = vadd.f32 %v1877_v8, %v1807_v39  ;;  %v2176_v8 = vsel %vm2175_vm14, 1, %v3658_v24 }
0x1bbc   :  { %v3339_v46 = vpop.f32.mrf.mxu1 }
0x1bbd   :  { %v1886_v47 = vadd.f32 %v1884_v55, %v1881_v44 }
0x1bbf   :  { %v3041_v48 = vmul.f32 -1.442695, %v1886_v47 }
0x1bc1   :  { %3516 = vpow2.f32 %v3041_v48 }
0x1bce   :  { %v3517_v49 = vpop.eup %3516 }
0x1bcf   :  { %v1890_v50 = vadd.f32 1.0, %v3517_v49 }
0x1bd1   :  { %3518 = vrcp.f32 %v1890_v50 }
0x1bde   :  { %v3519_v51 = vpop.eup %3518 }
0x1bdf   :  { %v1898_v53 = vmul.f32 %v3519_v51, %v1896_v52  ;;  %v1905_v3 = vsub.f32 1.0, %v3519_v51  ;;  %v1911_v14 = vmul.f32 %v3519_v51, %v4183_v9 }
0x1be1   :  { %1900 = vrot.lane.b32.xlu0 %v1898_v53, %s3655_s17 }
0x1c53   :  { %v1901_v57 = vpop.permute.xlu0 %1900 }
0x1c54   :  { %v1903_v58 = vadd.f32 %v1901_v57, %v1881_v44 }
0x1c56   :  { %3520 = vtanh.f32 %v1903_v58 }
0x1c63   :  { %v3521_v59 = vpop.eup %3520 }
0x1c64   :  { %1907 = vrot.lane.b32.xlu0 %v3521_v59, %s3659_s8 }
0x1cd6   :  { %v1908_v4 = vpop.permute.xlu0 %1907 }
0x1cd7   :  { %v1910_v16 = vmul.f32 %v1908_v4, %v1905_v3 }
0x1cd9   :  { %v1912_v19 = vadd.f32 %v1911_v14, %v1910_v16 }
0x1cdb   :  { %v1920_v20 = vsel %vm1918_vm13, 0.0, %v1912_v19  ;;  %v4231_v21 = vsel %vm1918_vm13, %v4183_v9, %v1912_v19 }
0x1cdc   :  { %v4234_v22 = vadd.f32 %v1920_v20, %v4180_v41  ;;  %1923 = vrot.lane.b32.xlu1 %v4231_v21, %s3659_s8 }
0x1d4e   :  { %v1924_v23 = vpop.permute.xlu1 %1923 }
0x1d4f   :  { %3349 = vmatmul.mubr.msk.f32.vlgmr.msra.gmra.mxu0 %vm258_vm8, %v1924_v23 }
0x1d50   :  { %3363 = vmatpush3.msra.mxu0 %v4048_v60  ;;  %3370 = vmatprep.mubr.msk.f32.mxu0 %vm3657_vm1, %v3656_v6 }
0x1d51   :  { %3364 = vmatprep.subr.mxu0 %v3656_v6 }
0x1d52   :  { %3365 = vmatpush3.msra.mxu0 %v4061_v63 }
0x1d53   :  { %3366 = vmatprep.subr.mxu0 %v3656_v6 }
0x1d54   :  { %3367 = vmatpush3.msra.mxu0 %v4070_v0 }
0x1d55   :  { %3368 = vmatprep.subr.mxu0 %v3656_v6 }
0x1d56   :  { %3369 = vmatpush3.msra.mxu0 %v4079_v2 }
0x1d57   :  { %3384 = vmatprep.subr.mxu0 %v3656_v6 }
0x1e0f   :  { %v1993_v41 = vpop.f32.mrf.mxu0 }
0x1e10   :  { %v2000_v9 = vrot.slane %v1993_v41, %v4100_v17  ;;  %v2035_v27 = vrot.slane %v1993_v41, %v4102_v18  ;;  %v2155_v39 = vadd.f32 %v1993_v41, %v4155_v45 }
0x1e11   :  { %v3350_v29 = vpop.f32.mrf.mxu0 }
0x1e12   :  { %v2001_v30 = vadd.f32 %v2000_v9, %v4096_v10  ;;  %v2036_v31 = vadd.f32 %v2035_v27, %v4098_v11 }
0x1e14   :  { %3522 = vtanh.f32 %v2001_v30 }
0x1e15   :  { %3524 = vtanh.f32 %v2036_v31 }
0x1e21   :  { %v3523_v32 = vpop.eup %3522 }
0x1e22   :  { %v3525_v33 = vpop.eup %3524  ;;  %v2003_v15 = vmul.f32 %v3523_v32, %v4111_v28 }
0x1e23   :  { %v2038_v25 = vmul.f32 %v3525_v33, %v4111_v28 }
0x1e24   :  { %v2004_v7 = vsel %vm258_vm8, %v2003_v15, 0.0 }
0x1e25   :  { %v2039_v38 = vsel %vm258_vm8, %v2038_v25, 0.0  ;;  %2005 = vadd.xlane.f32.xlu0 %v2004_v7 }
0x1e26   :  { %2040 = vadd.xlane.f32.xlu1 %v2039_v38 }
0x1e37   :  { %2157 = vrot.lane.b32.xlu1 %v2155_v39, %s3660_s13 }
0x1e3b   :  { %2178 = vperm.xlu1 %3436, %v2176_v8   ;;  %2145 = vrot.lane.b32.xlu0 %v1993_v41, %s3659_s8 }
0x1eae   :  { %v2006_v44 = vpop.xlane.xlu0 %2005 }
0x1eaf   :  { %v2041_v55 = vpop.xlane.xlu1 %2040  ;;  %v2007_v46 = vrot.slane %v2006_v44, 4 }
0x1eb0   :  { %v2042_v47 = vrot.slane %v2041_v55, 4 }
0x1eb1   :  { %v2008_v48 = vmax.f32 %v2006_v44, %v2007_v46 }
0x1eb2   :  { %v2043_v49 = vmax.f32 %v2041_v55, %v2042_v47 }
0x1eb3   :  { %v2009_v50 = vrot.slane %v2008_v48, 2 }
0x1eb4   :  { %v2044_v51 = vrot.slane %v2043_v49, 2 }
0x1eb5   :  { %v2010_v52 = vmax.f32 %v2008_v48, %v2009_v50 }
0x1eb6   :  { %v2045_v53 = vmax.f32 %v2043_v49, %v2044_v51 }
0x1eb7   :  { %v2011_v57 = vrot.slane %v2010_v52, 1 }
0x1eb8   :  { %v2046_v58 = vrot.slane %v2045_v53, 1 }
0x1eb9   :  { %v2012_v59 = vmax.f32 %v2010_v52, %v2011_v57 }
0x1eba   :  { %v2047_v3 = vmax.f32 %v2045_v53, %v2046_v58 }
0x1ebb   :  { %v2013_v4 = vsub.f32 %v2006_v44, %v2012_v59 }
0x1ebc   :  { %v2048_v13 = vsub.f32 %v2041_v55, %v2047_v3 }
0x1ebd   :  { %v2014_v14 = vmul.f32 1.442695, %v2013_v4 }
0x1ebe   :  { %v2049_v16 = vmul.f32 1.442695, %v2048_v13 }
0x1ebf   :  { %3526 = vpow2.f32 %v2014_v14 }
0x1ec0   :  { %3528 = vpow2.f32 %v2049_v16 }
0x1ecc   :  { %v3527_v19 = vpop.eup %3526 }
0x1ecd   :  { %v3529_v20 = vpop.eup %3528  ;;  %v2016_v23 = vrot.slane %v3527_v19, 4 }
0x1ece   :  { %v2051_v41 = vrot.slane %v3529_v20, 4 }
0x1ecf   :  { %v2017_v9 = vadd.f32 %v3527_v19, %v2016_v23 }
0x1ed0   :  { %v2052_v27 = vadd.f32 %v3529_v20, %v2051_v41  ;;  %v2146_v41 = vpop.permute.xlu0 %2145 }
0x1ed1   :  { %v2018_v29 = vrot.slane %v2017_v9, 2 }
0x1ed2   :  { %v2053_v30 = vrot.slane %v2052_v27, 2 }
0x1ed3   :  { %v2019_v31 = vadd.f32 %v2018_v29, %v2017_v9 }
0x1ed4   :  { %v2054_v32 = vadd.f32 %v2053_v30, %v2052_v27 }
0x1ed5   :  { %v2020_v33 = vrot.slane %v2019_v31, 1 }
0x1ed6   :  { %v2055_v15 = vrot.slane %v2054_v32, 1 }
0x1ed7   :  { %v2021_v25 = vadd.f32 %v2020_v33, %v2019_v31  ;;  %v2158_v33 = vpop.permute.xlu1 %2157 }
0x1ed8   :  { %v2056_v7 = vadd.f32 %v2055_v15, %v2054_v32 }
0x1ed9   :  { %3530 = vrcp.f32 %v2021_v25 }
0x1eda   :  { %3532 = vrcp.f32 %v2056_v7 }
0x1ee6   :  { %v3531_v38 = vpop.eup %3530 }
0x1ee7   :  { %v3533_v39 = vpop.eup %3532  ;;  %v2023_v8 = vmul.f32 %v3531_v38, %v3527_v19  ;;  %v2069_v19 = vld [vmem:[#allocation4 + $0x4] sm:$0x3] }
0x1ee8   :  { %v2058_v44 = vmul.f32 %v3533_v39, %v3529_v20 }
0x1ee9   :  { %v2024_v55 = vmul.f32 %v2023_v8, %v4050_v61 }
0x1eea   :  { %v2059_v46 = vmul.f32 %v2058_v44, %v4052_v62  ;;  %v2179_v44 = vpop.permute.xlu1 %2178 }
0x1eeb   :  { %v2025_v47 = vsel %vm258_vm8, %v2024_v55, 0.0  ;;  %vm2180_vm15 = vcmp.eq.s32.totalorder %v2179_v44, 1 }
0x1eec   :  { %v2026_v48 = vrot.slane %v2025_v47, 4  ;;  %v2060_v49 = vsel %vm258_vm8, %v2059_v46, 0.0 }
0x1eed   :  { %v2061_v50 = vrot.slane %v2060_v49, 4 }
0x1eee   :  { %v2027_v51 = vadd.f32 %v2026_v48, %v2025_v47 }
0x1eef   :  { %v2062_v52 = vadd.f32 %v2061_v50, %v2060_v49 }
0x1ef0   :  { %v2028_v53 = vrot.slane %v2027_v51, 2 }
0x1ef1   :  { %v2063_v57 = vrot.slane %v2062_v52, 2 }
0x1ef2   :  { %v2029_v58 = vadd.f32 %v2028_v53, %v2027_v51 }
0x1ef3   :  { %v2064_v59 = vadd.f32 %v2063_v57, %v2062_v52 }
0x1ef4   :  { %v2030_v3 = vrot.slane %v2029_v58, 1 }
0x1ef5   :  { %v2065_v4 = vrot.slane %v2064_v59, 1 }
0x1ef6   :  { %v2031_v13 = vadd.f32 %v2030_v3, %v2029_v58 }
0x1ef7   :  { %v2066_v14 = vadd.f32 %v2065_v4, %v2064_v59 }
0x1ef9   :  { %v2067_v16 = vsel %vm1540_vm7, %v2031_v13, %v2066_v14  ;;  %v2438_v13 = vsel %vm2437_vm0, 1, %v3658_v24 }
0x1efa   :  { %3360 = vmatmul.mubr.msk.f32.vlgmr.msra.gmra.mxu1 %vm258_vm8, %v2067_v16 }
0x1efb   :  { %3374 = vmatpush3.msra.mxu1 %v4125_v35  ;;  %3381 = vmatprep.mubr.msk.f32.mxu1 %vm3657_vm1, %v3656_v6 }
0x1efc   :  { %3375 = vmatprep.subr.mxu1 %v3656_v6 }
0x1efd   :  { %3376 = vmatpush3.msra.mxu1 %v4130_v36 }
0x1efe   :  { %3377 = vmatprep.subr.mxu1 %v3656_v6 }
0x1eff   :  { %3378 = vmatpush3.msra.mxu1 %v4137_v5 }
0x1f00   :  { %3379 = vmatprep.subr.mxu1 %v3656_v6 }
0x1f01   :  { %3380 = vmatpush3.msra.mxu1 %v4144_v37 }
0x1f02   :  { %3395 = vmatprep.subr.mxu1 %v3656_v6 }
0x1fba   :  { %v2139_v20 = vpop.f32.mrf.mxu1 }
0x1fbb   :  { %v2143_v23 = vadd.f32 %v2139_v20, %v2069_v19 }
0x1fbc   :  { %v3361_v9 = vpop.f32.mrf.mxu1 }
0x1fbd   :  { %v2148_v27 = vadd.f32 %v2146_v41, %v2143_v23 }
0x1fbf   :  { %v3044_v29 = vmul.f32 -1.442695, %v2148_v27 }
0x1fc1   :  { %3534 = vpow2.f32 %v3044_v29 }
0x1fce   :  { %v3535_v30 = vpop.eup %3534 }
0x1fcf   :  { %v2152_v31 = vadd.f32 1.0, %v3535_v30 }
0x1fd1   :  { %3536 = vrcp.f32 %v2152_v31 }
0x1fde   :  { %v3537_v32 = vpop.eup %3536 }
0x1fdf   :  { %v2160_v15 = vmul.f32 %v3537_v32, %v2158_v33  ;;  %v2167_v39 = vsub.f32 1.0, %v3537_v32  ;;  %v2173_v55 = vmul.f32 %v3537_v32, %v4231_v21 }
0x1fe1   :  { %2162 = vrot.lane.b32.xlu0 %v2160_v15, %s3655_s17 }
0x2053   :  { %v2163_v25 = vpop.permute.xlu0 %2162 }
0x2054   :  { %v2165_v7 = vadd.f32 %v2163_v25, %v2143_v23 }
0x2056   :  { %3538 = vtanh.f32 %v2165_v7 }
0x2063   :  { %v3539_v38 = vpop.eup %3538 }
0x2064   :  { %2169 = vrot.lane.b32.xlu0 %v3539_v38, %s3659_s8 }
0x20d6   :  { %v2170_v8 = vpop.permute.xlu0 %2169 }
0x20d7   :  { %v2172_v46 = vmul.f32 %v2170_v8, %v2167_v39 }
0x20d9   :  { %v2174_v47 = vadd.f32 %v2173_v55, %v2172_v46 }
0x20db   :  { %v2182_v48 = vsel %vm2180_vm15, 0.0, %v2174_v47  ;;  %v4282_v49 = vsel %vm2180_vm15, %v4231_v21, %v2174_v47 }
0x20dc   :  { %v4285_v50 = vadd.f32 %v2182_v48, %v4234_v22  ;;  %2185 = vrot.lane.b32.xlu1 %v4282_v49, %s3659_s8 }
0x214e   :  { %v2186_v51 = vpop.permute.xlu1 %2185 }
0x214f   :  { %3371 = vmatmul.mubr.msk.f32.vlgmr.msra.gmra.mxu0 %vm258_vm8, %v2186_v51 }
0x2150   :  { %3385 = vmatpush3.msra.mxu0 %v4048_v60  ;;  %3392 = vmatprep.mubr.msk.f32.mxu0 %vm3657_vm1, %v3656_v6 }
0x2151   :  { %3386 = vmatprep.subr.mxu0 %v3656_v6 }
0x2152   :  { %3387 = vmatpush3.msra.mxu0 %v4061_v63 }
0x2153   :  { %3388 = vmatprep.subr.mxu0 %v3656_v6 }
0x2154   :  { %3389 = vmatpush3.msra.mxu0 %v4070_v0 }
0x2155   :  { %3390 = vmatprep.subr.mxu0 %v3656_v6 }
0x2156   :  { %3391 = vmatpush3.msra.mxu0 %v4079_v2 }
0x2157   :  { %3406 = vmatprep.subr.mxu0 %v3656_v6 }
0x220f   :  { %v2255_v21 = vpop.f32.mrf.mxu0 }
0x2210   :  { %v2262_v60 = vrot.slane %v2255_v21, %v4100_v17  ;;  %v2297_v22 = vrot.slane %v2255_v21, %v4102_v18  ;;  %v2417_v4 = vadd.f32 %v2255_v21, %v4155_v45 }
0x2211   :  { %v3372_v52 = vpop.f32.mrf.mxu0 }
0x2212   :  { %v2263_v53 = vadd.f32 %v2262_v60, %v4096_v10  ;;  %v2298_v63 = vadd.f32 %v2297_v22, %v4098_v11 }
0x2214   :  { %3540 = vtanh.f32 %v2263_v53 }
0x2215   :  { %3542 = vtanh.f32 %v2298_v63 }
0x2221   :  { %v3541_v57 = vpop.eup %3540 }
0x2222   :  { %v3543_v0 = vpop.eup %3542  ;;  %v2265_v58 = vmul.f32 %v3541_v57, %v4111_v28 }
0x2223   :  { %v2300_v2 = vmul.f32 %v3543_v0, %v4111_v28 }
0x2224   :  { %v2266_v59 = vsel %vm258_vm8, %v2265_v58, 0.0 }
0x2225   :  { %v2301_v3 = vsel %vm258_vm8, %v2300_v2, 0.0  ;;  %2267 = vadd.xlane.f32.xlu0 %v2266_v59 }
0x2226   :  { %2302 = vadd.xlane.f32.xlu1 %v2301_v3 }
0x2237   :  { %2419 = vrot.lane.b32.xlu1 %v2417_v4, %s3660_s13 }
0x223b   :  { %2440 = vperm.xlu1 %3436, %v2438_v13   ;;  %2407 = vrot.lane.b32.xlu0 %v2255_v21, %s3659_s8 }
0x22ae   :  { %v2268_v14 = vpop.xlane.xlu0 %2267 }
0x22af   :  { %v2303_v16 = vpop.xlane.xlu1 %2302  ;;  %v2269_v28 = vrot.slane %v2268_v14, 4 }
0x22b0   :  { %v2304_v19 = vrot.slane %v2303_v16, 4 }
0x22b1   :  { %v2270_v20 = vmax.f32 %v2268_v14, %v2269_v28 }
0x22b2   :  { %v2305_v23 = vmax.f32 %v2303_v16, %v2304_v19 }
0x22b3   :  { %v2271_v41 = vrot.slane %v2270_v20, 2 }
0x22b4   :  { %v2306_v9 = vrot.slane %v2305_v23, 2 }
0x22b5   :  { %v2272_v27 = vmax.f32 %v2270_v20, %v2271_v41 }
0x22b6   :  { %v2307_v29 = vmax.f32 %v2305_v23, %v2306_v9 }
0x22b7   :  { %v2273_v30 = vrot.slane %v2272_v27, 1 }
0x22b8   :  { %v2308_v31 = vrot.slane %v2307_v29, 1 }
0x22b9   :  { %v2274_v42 = vmax.f32 %v2272_v27, %v2273_v30 }
0x22ba   :  { %v2309_v32 = vmax.f32 %v2307_v29, %v2308_v31 }
0x22bb   :  { %v2275_v33 = vsub.f32 %v2268_v14, %v2274_v42  ;;  %v2408_v42 = vpop.permute.xlu0 %2407 }
0x22bc   :  { %v2310_v15 = vsub.f32 %v2303_v16, %v2309_v32 }
0x22bd   :  { %v2276_v25 = vmul.f32 1.442695, %v2275_v33 }
0x22be   :  { %v2311_v7 = vmul.f32 1.442695, %v2310_v15 }
0x22bf   :  { %3544 = vpow2.f32 %v2276_v25 }
0x22c0   :  { %3546 = vpow2.f32 %v2311_v7 }
0x22cc   :  { %v3545_v38 = vpop.eup %3544 }
0x22cd   :  { %v3547_v39 = vpop.eup %3546  ;;  %v2278_v8 = vrot.slane %v3545_v38, 4 }
0x22ce   :  { %v2313_v44 = vrot.slane %v3547_v39, 4 }
0x22cf   :  { %v2279_v55 = vadd.f32 %v3545_v38, %v2278_v8 }
0x22d0   :  { %v2314_v46 = vadd.f32 %v3547_v39, %v2313_v44 }
0x22d1   :  { %v2280_v47 = vrot.slane %v2279_v55, 2 }
0x22d2   :  { %v2315_v48 = vrot.slane %v2314_v46, 2 }
0x22d3   :  { %v2281_v51 = vadd.f32 %v2280_v47, %v2279_v55 }
0x22d4   :  { %v2316_v21 = vadd.f32 %v2315_v48, %v2314_v46 }
0x22d5   :  { %v2282_v60 = vrot.slane %v2281_v51, 1 }
0x22d6   :  { %v2317_v22 = vrot.slane %v2316_v21, 1 }
0x22d7   :  { %v2283_v52 = vadd.f32 %v2282_v60, %v2281_v51 }
0x22d8   :  { %v2318_v53 = vadd.f32 %v2317_v22, %v2316_v21 }
0x22d9   :  { %3548 = vrcp.f32 %v2283_v52 }
0x22da   :  { %3550 = vrcp.f32 %v2318_v53  ;;  %v3598_v53 = vld [vmem:[%s4478_s10 + $0x18] sm:$0xff] }
0x22e6   :  { %v3549_v63 = vpop.eup %3548 }
0x22e7   :  { %v3551_v57 = vpop.eup %3550  ;;  %v2285_v0 = vmul.f32 %v3549_v63, %v3545_v38  ;;  %v2420_v38 = vpop.permute.xlu1 %2419  ;;  %v3601_v63 = vld [vmem:[%s4478_s10] sm:$0xff] }
0x22e8   :  { %v2320_v58 = vmul.f32 %v3551_v57, %v3547_v39 }
0x22e9   :  { %v2286_v2 = vmul.f32 %v2285_v0, %v4050_v61 }
0x22ea   :  { %v2321_v59 = vmul.f32 %v2320_v58, %v4052_v62  ;;  %v2331_v62 = vld [vmem:[#allocation4 + $0x6] sm:$0x3] }
0x22eb   :  { %v2287_v3 = vsel %vm258_vm8, %v2286_v2, 0.0  ;;  %v2441_v46 = vpop.permute.xlu1 %2440 }
0x22ec   :  { %v2288_v4 = vrot.slane %v2287_v3, 4  ;;  %v2322_v13 = vsel %vm258_vm8, %v2321_v59, 0.0  ;;  %vm2442_vm2 = vcmp.eq.s32.totalorder %v2441_v46, 1 }
0x22ed   :  { %v2323_v14 = vrot.slane %v2322_v13, 4 }
0x22ee   :  { %v2289_v16 = vadd.f32 %v2288_v4, %v2287_v3 }
0x22ef   :  { %v2324_v28 = vadd.f32 %v2323_v14, %v2322_v13  ;;  %v4365_v14 = vld [vmem:[%s4482_s14] ss:$0 sm:$0xff] }
0x22f0   :  { %v2290_v19 = vrot.slane %v2289_v16, 2 }
0x22f1   :  { %v2325_v20 = vrot.slane %v2324_v28, 2 }
0x22f2   :  { %v2291_v23 = vadd.f32 %v2290_v19, %v2289_v16 }
0x22f3   :  { %v2326_v41 = vadd.f32 %v2325_v20, %v2324_v28 }
0x22f4   :  { %v2292_v9 = vrot.slane %v2291_v23, 1 }
0x22f5   :  { %v2327_v27 = vrot.slane %v2326_v41, 1 }
0x22f6   :  { %v2293_v29 = vadd.f32 %v2292_v9, %v2291_v23 }
0x22f7   :  { %v2328_v30 = vadd.f32 %v2327_v27, %v2326_v41  ;;  %v4375_v41 = vld [vmem:[%s4469_s1] sm:$0x3] }
0x22f8   :  { %vm2699_vm3 = vcmp.lt.s32.totalorder %v4375_v41, 4  ;;  %vm2961_vm4 = vcmp.lt.s32.totalorder %v4375_v41, 5 }
0x22f9   :  { %v2329_v61 = vsel %vm1540_vm7, %v2293_v29, %v2328_v30  ;;  %v2700_v9 = vsel %vm2699_vm3, 1, %v3658_v24 }
0x22fa   :  { %3382 = vmatmul.mubr.msk.f32.vlgmr.msra.gmra.mxu1 %vm258_vm8, %v2329_v61 }
0x22fb   :  { %3396 = vmatpush3.msra.mxu1 %v4125_v35  ;;  %3403 = vmatprep.mubr.msk.f32.mxu1 %vm3657_vm1, %v3656_v6 }
0x22fc   :  { %3397 = vmatprep.subr.mxu1 %v3656_v6 }
0x22fd   :  { %3398 = vmatpush3.msra.mxu1 %v4130_v36 }
0x22fe   :  { %3399 = vmatprep.subr.mxu1 %v3656_v6 }
0x22ff   :  { %3400 = vmatpush3.msra.mxu1 %v4137_v5 }
0x2300   :  { %3401 = vmatprep.subr.mxu1 %v3656_v6 }
0x2301   :  { %3402 = vmatpush3.msra.mxu1 %v4144_v37 }
0x2302   :  { %3417 = vmatprep.subr.mxu1 %v3656_v6 }
0x23ba   :  { %v2401_v31 = vpop.f32.mrf.mxu1 }
0x23bb   :  { %v2405_v35 = vadd.f32 %v2401_v31, %v2331_v62 }
0x23bc   :  { %v3383_v32 = vpop.f32.mrf.mxu1 }
0x23bd   :  { %v2410_v33 = vadd.f32 %v2408_v42, %v2405_v35 }
0x23bf   :  { %v3047_v15 = vmul.f32 -1.442695, %v2410_v33 }
0x23c1   :  { %3552 = vpow2.f32 %v3047_v15 }
0x23ce   :  { %v3553_v25 = vpop.eup %3552 }
0x23cf   :  { %v2414_v36 = vadd.f32 1.0, %v3553_v25 }
0x23d1   :  { %3554 = vrcp.f32 %v2414_v36 }
0x23de   :  { %v3555_v7 = vpop.eup %3554 }
0x23df   :  { %v2422_v5 = vmul.f32 %v3555_v7, %v2420_v38  ;;  %v2429_v44 = vsub.f32 1.0, %v3555_v7  ;;  %v2435_v47 = vmul.f32 %v3555_v7, %v4282_v49 }
0x23e1   :  { %2424 = vrot.lane.b32.xlu0 %v2422_v5, %s3655_s17 }
0x2453   :  { %v2425_v39 = vpop.permute.xlu0 %2424 }
0x2454   :  { %v2427_v37 = vadd.f32 %v2425_v39, %v2405_v35 }
0x2456   :  { %3556 = vtanh.f32 %v2427_v37 }
0x2463   :  { %v3557_v8 = vpop.eup %3556 }
0x2464   :  { %2431 = vrot.lane.b32.xlu0 %v3557_v8, %s3659_s8 }
0x24d6   :  { %v2432_v55 = vpop.permute.xlu0 %2431 }
0x24d7   :  { %v2434_v48 = vmul.f32 %v2432_v55, %v2429_v44 }
0x24d9   :  { %v2436_v51 = vadd.f32 %v2435_v47, %v2434_v48 }
0x24db   :  { %v2444_v21 = vsel %vm2442_vm2, 0.0, %v2436_v51  ;;  %v4333_v60 = vsel %vm2442_vm2, %v4282_v49, %v2436_v51  ;;  %v3599_v49 = vld [vmem:[%s4478_s10 + $0x10] sm:$0xff] }
0x24dc   :  { %v4336_v22 = vadd.f32 %v2444_v21, %v4285_v50  ;;  %2447 = vrot.lane.b32.xlu1 %v4333_v60, %s3659_s8  ;;  %v3600_v50 = vld [vmem:[%s4478_s10 + $0x8] sm:$0xff] }
0x254e   :  { %v2448_v52 = vpop.permute.xlu1 %2447 }
0x254f   :  { %3393 = vmatmul.mubr.msk.f32.vlgmr.msra.gmra.mxu0 %vm258_vm8, %v2448_v52 }
0x2550   :  { %3407 = vmatpush3.msra.mxu0 %v3598_v53  ;;  %3414 = vmatprep.mubr.msk.f32.mxu0 %vm3657_vm1, %v3656_v6 }
0x2551   :  { %3408 = vmatprep.subr.mxu0 %v3656_v6 }
0x2552   :  { %3409 = vmatpush3.msra.mxu0 %v3599_v49 }
0x2553   :  { %3410 = vmatprep.subr.mxu0 %v3656_v6 }
0x2554   :  { %3411 = vmatpush3.msra.mxu0 %v3600_v50 }
0x2555   :  { %3412 = vmatprep.subr.mxu0 %v3656_v6 }
0x2556   :  { %3413 = vmatpush3.msra.mxu0 %v3601_v63 }
0x260f   :  { %v2517_v57 = vpop.f32.mrf.mxu0 }
0x2610   :  { %v2524_v0 = vrot.slane %v2517_v57, %v4100_v17  ;;  %v2559_v58 = vrot.slane %v2517_v57, %v4102_v18  ;;  %v2679_v23 = vadd.f32 %v2517_v57, %v4155_v45 }
0x2611   :  { %v3394_v2 = vpop.f32.mrf.mxu0 }
0x2612   :  { %v2525_v59 = vadd.f32 %v2524_v0, %v4096_v10  ;;  %v2560_v3 = vadd.f32 %v2559_v58, %v4098_v11 }
0x2614   :  { %3558 = vtanh.f32 %v2525_v59 }
0x2615   :  { %3560 = vtanh.f32 %v2560_v3  ;;  %v4381_v3 = vld [vmem:[#allocation2] sm:$0xff] }
0x2621   :  { %v3559_v4 = vpop.eup %3558 }
0x2622   :  { %v3561_v13 = vpop.eup %3560  ;;  %v2527_v16 = vmul.f32 %v4365_v14, %v3559_v4 }
0x2623   :  { %v2562_v28 = vmul.f32 %v4365_v14, %v3561_v13  ;;  %v4384_v13 = vld [vmem:[#allocation2 + $0x8] sm:$0xff] }
0x2624   :  { %v2528_v19 = vsel %vm258_vm8, %v2527_v16, 0.0 }
0x2625   :  { %v2563_v20 = vsel %vm258_vm8, %v2562_v28, 0.0  ;;  %2529 = vadd.xlane.f32.xlu0 %v2528_v19 }
0x2626   :  { %2564 = vadd.xlane.f32.xlu1 %v2563_v20 }
0x2637   :  { %2681 = vrot.lane.b32.xlu1 %v2679_v23, %s3660_s13 }
0x263b   :  { %2702 = vperm.xlu1 %3436, %v2700_v9   ;;  %2669 = vrot.lane.b32.xlu0 %v2517_v57, %s3659_s8 }
0x26ae   :  { %v2530_v27 = vpop.xlane.xlu0 %2529 }
0x26af   :  { %v2565_v29 = vpop.xlane.xlu1 %2564  ;;  %v2531_v30 = vrot.slane %v2530_v27, 4 }
0x26b0   :  { %v2566_v61 = vrot.slane %v2565_v29, 4 }
0x26b1   :  { %v2532_v62 = vmax.f32 %v2530_v27, %v2531_v30 }
0x26b2   :  { %v2567_v31 = vmax.f32 %v2565_v29, %v2566_v61 }
0x26b3   :  { %v2533_v35 = vrot.slane %v2532_v62, 2 }
0x26b4   :  { %v2568_v42 = vrot.slane %v2567_v31, 2 }
0x26b5   :  { %v2534_v32 = vmax.f32 %v2532_v62, %v2533_v35 }
0x26b6   :  { %v2569_v33 = vmax.f32 %v2567_v31, %v2568_v42 }
0x26b7   :  { %v2535_v15 = vrot.slane %v2534_v32, 1 }
0x26b8   :  { %v2570_v25 = vrot.slane %v2569_v33, 1 }
0x26b9   :  { %v2536_v36 = vmax.f32 %v2534_v32, %v2535_v15  ;;  %v3606_v15 = vld [vmem:[%s4477_s9 + $0x18] sm:$0xff] }
0x26ba   :  { %v2571_v7 = vmax.f32 %v2569_v33, %v2570_v25  ;;  %v3607_v25 = vld [vmem:[%s4477_s9 + $0x10] sm:$0xff] }
0x26bb   :  { %v2537_v38 = vsub.f32 %v2530_v27, %v2536_v36  ;;  %v3608_v36 = vld [vmem:[%s4477_s9 + $0x8] sm:$0xff] }
0x26bc   :  { %v2572_v5 = vsub.f32 %v2565_v29, %v2571_v7  ;;  %v3609_v7 = vld [vmem:[%s4477_s9] sm:$0xff] }
0x26bd   :  { %v2538_v39 = vmul.f32 1.442695, %v2537_v38  ;;  %v2593_v38 = vld [vmem:[#allocation4 + $0x8] sm:$0x3] }
0x26be   :  { %v2573_v37 = vmul.f32 1.442695, %v2572_v5 }
0x26bf   :  { %3562 = vpow2.f32 %v2538_v39 }
0x26c0   :  { %3564 = vpow2.f32 %v2573_v37  ;;  %v2670_v37 = vpop.permute.xlu0 %2669 }
0x26cc   :  { %v3563_v8 = vpop.eup %3562 }
0x26cd   :  { %v3565_v44 = vpop.eup %3564  ;;  %v2540_v55 = vrot.slane %v3563_v8, 4 }
0x26ce   :  { %v2575_v46 = vrot.slane %v3565_v44, 4 }
0x26cf   :  { %v2541_v47 = vadd.f32 %v3563_v8, %v2540_v55 }
0x26d0   :  { %v2576_v48 = vadd.f32 %v3565_v44, %v2575_v46 }
0x26d1   :  { %v2542_v51 = vrot.slane %v2541_v47, 2 }
0x26d2   :  { %v2577_v21 = vrot.slane %v2576_v48, 2 }
0x26d3   :  { %v2543_v52 = vadd.f32 %v2542_v51, %v2541_v47  ;;  %v2682_v51 = vpop.permute.xlu1 %2681 }
0x26d4   :  { %v2578_v53 = vadd.f32 %v2577_v21, %v2576_v48 }
0x26d5   :  { %v2544_v49 = vrot.slane %v2543_v52, 1 }
0x26d6   :  { %v2579_v50 = vrot.slane %v2578_v53, 1 }
0x26d7   :  { %v2545_v63 = vadd.f32 %v2544_v49, %v2543_v52 }
0x26d8   :  { %v2580_v57 = vadd.f32 %v2579_v50, %v2578_v53 }
0x26d9   :  { %3566 = vrcp.f32 %v2545_v63  ;;  %v2703_v63 = vpop.permute.xlu1 %2702 }
0x26da   :  { %3568 = vrcp.f32 %v2580_v57 }
0x26e6   :  { %v3567_v0 = vpop.eup %3566 }
0x26e7   :  { %v3569_v58 = vpop.eup %3568  ;;  %v2547_v2 = vmul.f32 %v3567_v0, %v3563_v8 }
0x26e8   :  { %v2582_v59 = vmul.f32 %v3569_v58, %v3565_v44 }
0x26e9   :  { %v2548_v4 = vmul.f32 %v4381_v3, %v2547_v2 }
0x26ea   :  { %v2583_v16 = vmul.f32 %v4384_v13, %v2582_v59 }
0x26eb   :  { %v2549_v28 = vsel %vm258_vm8, %v2548_v4, 0.0 }
0x26ec   :  { %v2550_v19 = vrot.slane %v2549_v28, 4  ;;  %v2584_v20 = vsel %vm258_vm8, %v2583_v16, 0.0 }
0x26ed   :  { %v2585_v23 = vrot.slane %v2584_v20, 4 }
0x26ee   :  { %v2551_v9 = vadd.f32 %v2550_v19, %v2549_v28 }
0x26ef   :  { %v2586_v27 = vadd.f32 %v2585_v23, %v2584_v20 }
0x26f0   :  { %v2552_v29 = vrot.slane %v2551_v9, 2 }
0x26f1   :  { %v2587_v30 = vrot.slane %v2586_v27, 2 }
0x26f2   :  { %v2553_v61 = vadd.f32 %v2552_v29, %v2551_v9 }
0x26f3   :  { %v2588_v62 = vadd.f32 %v2587_v30, %v2586_v27 }
0x26f4   :  { %v2554_v31 = vrot.slane %v2553_v61, 1 }
0x26f5   :  { %v2589_v35 = vrot.slane %v2588_v62, 1 }
0x26f6   :  { %v2555_v42 = vadd.f32 %v2554_v31, %v2553_v61 }
0x26f7   :  { %v2590_v32 = vadd.f32 %v2589_v35, %v2588_v62 }
0x26f9   :  { %v2591_v33 = vsel %vm1540_vm7, %v2555_v42, %v2590_v32 }
0x26fa   :  { %3404 = vmatmul.mubr.msk.f32.vlgmr.msra.gmra.mxu1 %vm258_vm8, %v2591_v33 }
0x26fb   :  { %3418 = vmatpush3.msra.mxu1 %v3606_v15  ;;  %3425 = vmatprep.mubr.msk.f32.mxu1 %vm3657_vm1, %v3656_v6  ;;  %vm2704_vm1 = vcmp.eq.s32.totalorder %v2703_v63, 1 }
0x26fc   :  { %3419 = vmatprep.subr.mxu1 %v3656_v6 }
0x26fd   :  { %3420 = vmatpush3.msra.mxu1 %v3607_v25 }
0x26fe   :  { %3421 = vmatprep.subr.mxu1 %v3656_v6 }
0x26ff   :  { %3422 = vmatpush3.msra.mxu1 %v3608_v36 }
0x2700   :  { %3423 = vmatprep.subr.mxu1 %v3656_v6 }
0x2701   :  { %3424 = vmatpush3.msra.mxu1 %v3609_v7 }
0x27ba   :  { %v2663_v5 = vpop.f32.mrf.mxu1 }
0x27bb   :  { %v2667_v39 = vadd.f32 %v2663_v5, %v2593_v38 }
0x27bc   :  { %v3405_v8 = vpop.f32.mrf.mxu1 }
0x27bd   :  { %v2672_v44 = vadd.f32 %v2670_v37, %v2667_v39 }
0x27bf   :  { %v3050_v55 = vmul.f32 -1.442695, %v2672_v44 }
0x27c1   :  { %3570 = vpow2.f32 %v3050_v55 }
0x27ce   :  { %v3571_v46 = vpop.eup %3570 }
0x27cf   :  { %v2676_v47 = vadd.f32 1.0, %v3571_v46 }
0x27d1   :  { %3572 = vrcp.f32 %v2676_v47 }
0x27de   :  { %v3573_v48 = vpop.eup %3572 }
0x27df   :  { %v2684_v21 = vmul.f32 %v3573_v48, %v2682_v51  ;;  %v2691_v49 = vsub.f32 1.0, %v3573_v48  ;;  %v2697_v57 = vmul.f32 %v3573_v48, %v4333_v60 }
0x27e1   :  { %2686 = vrot.lane.b32.xlu0 %v2684_v21, %s3655_s17 }
0x2853   :  { %v2687_v6 = vpop.permute.xlu0 %2686 }
0x2854   :  { %v2689_v52 = vadd.f32 %v2687_v6, %v2667_v39  ;;  %v493_v39 = vadd.f32 %v3881_v12, %v3853_v43 }
0x2856   :  { %3574 = vtanh.f32 %v2689_v52  ;;  %v612_v8 = vadd.f32 %v3902_v40, %v493_v39 }
0x2858   :  { %v731_v46 = vadd.f32 %v3922_v1, %v612_v8 }
0x285a   :  { %v850_v51 = vadd.f32 %v3942_v34, %v731_v46 }
0x285c   :  { %v969_v6 = vadd.f32 %v3962_v56, %v850_v51 }
0x285e   :  { %v1088_v43 = vadd.f32 %v3976_v26, %v969_v6 }
0x2860   :  { %v1207_v12 = vadd.f32 %v4030_v54, %v1088_v43 }
0x2863   :  { %v3575_v53 = vpop.eup %3574 }
0x2864   :  { %2693 = vrot.lane.b32.xlu0 %v3575_v53, %s3659_s8 }
0x28d6   :  { %v2694_v50 = vpop.permute.xlu0 %2693 }
0x28d7   :  { %v2696_v0 = vmul.f32 %v2694_v50, %v2691_v49 }
0x28d9   :  { %v2698_v58 = vadd.f32 %v2697_v57, %v2696_v0 }
0x28db   :  { %v2706_v2 = vsel %vm2704_vm1, 0.0, %v2698_v58  ;;  %v4412_v59 = vsel %vm2704_vm1, %v4333_v60, %v2698_v58 }
0x28dc   :  { %v4415_v4 = vadd.f32 %v2706_v2, %v4336_v22  ;;  %2709 = vrot.lane.b32.xlu1 %v4412_v59, %s3659_s8 }
0x294e   :  { %v2710_v16 = vpop.permute.xlu1 %2709 }
0x294f   :  { %3415 = vmatmul.mubr.msk.f32.vlgmr.msra.gmra.mxu0 %vm258_vm8, %v2710_v16 }
0x2a0f   :  { %v2779_v28 = vpop.f32.mrf.mxu0 }
0x2a10   :  { %v2786_v19 = vrot.slane %v2779_v28, %v4100_v17  ;;  %v2821_v20 = vrot.slane %v2779_v28, %v4102_v18  ;;  %v2941_v17 = vadd.f32 %v2779_v28, %v4155_v45  ;;  %v2962_v18 = vsel %vm2961_vm4, 1, %v3658_v24 }
0x2a11   :  { %v3416_v23 = vpop.f32.mrf.mxu0 }
0x2a12   :  { %v2787_v9 = vadd.f32 %v2786_v19, %v4096_v10  ;;  %v2822_v60 = vadd.f32 %v2821_v20, %v4098_v11  ;;  %v3610_v10 = vld [vmem:[%s4487_s24] sm:$0x3]  ;;  %s3661_s24 = smov [#allocation5]  }
0x2a13   :  { %v1208_v11 = vcvt.s32.f32 %v3610_v10  ;;  %s2988_s21 = sshll.u32 %s3661_s24, 4  ;;  %s2989_s21 = int_to_ptr.vmem [resolvable:$true] %s2988_s21 }
0x2a14   :  { %3576 = vtanh.f32 %v2787_v9  ;;  %s3611_s5 = scalar_lea.vmem %s2989_s21, 32  ;;  %p3616_p1 = scmp.lt.s32.totalorder %s2989_s21, %s2989_s21 }
0x2a15   :  { %3578 = vtanh.f32 %v2822_v60  ;;  %p3612_p0 = scmp.ne.s32.totalorder %s2989_s21, %s3611_s5  ;;  %p3617_p2 = scmp.lt.s32.totalorder %s3611_s5, %s3611_s5 }
0x2a17   :  { %p3618_p3 = por %p3617_p2, %p3616_p1 }
0x2a19   :  { %p3619_p4 = pnand %p3618_p3, %p3612_p0 }
0x2a21   :  { %v3577_v22 = vpop.eup %3576 }
0x2a22   :  { %v3579_v27 = vpop.eup %3578  ;;  %v2789_v29 = vmul.f32 %v4365_v14, %v3577_v22 }
0x2a23   :  { %v2824_v30 = vmul.f32 %v4365_v14, %v3579_v27 }
0x2a24   :  { %v2790_v61 = vsel %vm258_vm8, %v2789_v29, 0.0 }
0x2a25   :  { %v2825_v62 = vsel %vm258_vm8, %v2824_v30, 0.0  ;;  %2791 = vadd.xlane.f32.xlu0 %v2790_v61 }
0x2a26   :  { %2826 = vadd.xlane.f32.xlu1 %v2825_v62 }
0x2a37   :  { %2943 = vrot.lane.b32.xlu1 %v2941_v17, %s3660_s13 }
0x2a3b   :  { %1211 = vperm.xlu1 %3436, %v1208_v11   ;;  %2931 = vrot.lane.b32.xlu0 %v2779_v28, %s3659_s8 }
0x2a3f   :  { %2964 = vperm.xlu1 %3436, %v2962_v18  }
0x2aae   :  { %v2792_v14 = vpop.xlane.xlu0 %2791 }
0x2aaf   :  { %v2827_v31 = vpop.xlane.xlu1 %2826  ;;  %v2793_v35 = vrot.slane %v2792_v14, 4 }
0x2ab0   :  { %v2828_v42 = vrot.slane %v2827_v31, 4 }
0x2ab1   :  { %v2794_v45 = vmax.f32 %v2792_v14, %v2793_v35 }
0x2ab2   :  { %v2829_v32 = vmax.f32 %v2827_v31, %v2828_v42 }
0x2ab3   :  { %v2795_v33 = vrot.slane %v2794_v45, 2  ;;  %v4436_v15 = vpop.permute.xlu1 %2943 }
0x2ab4   :  { %v2830_v25 = vrot.slane %v2829_v32, 2 }
0x2ab5   :  { %v2796_v36 = vmax.f32 %v2794_v45, %v2795_v33 }
0x2ab6   :  { %v2831_v7 = vmax.f32 %v2829_v32, %v2830_v25  ;;  %v2855_v32 = vld [vmem:[#allocation4 + $0xa] sm:$0x3] }
0x2ab7   :  { %v2797_v38 = vrot.slane %v2796_v36, 1  ;;  %v1212_v5 = vpop.permute.xlu1 %1211 }
0x2ab8   :  { %v2832_v37 = vrot.slane %v2831_v7, 1  ;;  %3580 = vrcp.f32 %v1212_v5 }
0x2ab9   :  { %v2798_v24 = vmax.f32 %v2796_v36, %v2797_v38  ;;  %v2932_v36 = vpop.permute.xlu0 %2931 }
0x2aba   :  { %v2833_v44 = vmax.f32 %v2831_v7, %v2832_v37 }
0x2abb   :  { %v2799_v55 = vsub.f32 %v2792_v14, %v2798_v24 }
0x2abc   :  { %v2834_v47 = vsub.f32 %v2827_v31, %v2833_v44  ;;  %v2969_v44 = vcvt.s32.f32 %v4375_v41 }
0x2abd   :  { %v2800_v48 = vmul.f32 1.442695, %v2799_v55 }
0x2abe   :  { %v2835_v21 = vmul.f32 1.442695, %v2834_v47 }
0x2abf   :  { %3582 = vpow2.f32 %v2800_v48 }
0x2ac0   :  { %3584 = vpow2.f32 %v2835_v21 }
0x2ac5   :  { %v3581_v52 = vpop.eup %3580 }
0x2ac6   :  { %v1215_v53 = vmul.f32 %v3581_v52, %v1207_v12 }
0x2ac8   :  { %1217 = vrot.lane.b32.xlu1 %v1215_v53, %s3659_s8 }
0x2acc   :  { %v3583_v40 = vpop.eup %3582 }
0x2acd   :  { %v3585_v49 = vpop.eup %3584  ;;  %v2802_v1 = vrot.slane %v3583_v40, 4 }
0x2ace   :  { %v2837_v50 = vrot.slane %v3585_v49, 4 }
0x2acf   :  { %v2803_v63 = vadd.f32 %v3583_v40, %v2802_v1 }
0x2ad0   :  { %v2838_v57 = vadd.f32 %v3585_v49, %v2837_v50 }
0x2ad1   :  { %v2804_v34 = vrot.slane %v2803_v63, 2 }
0x2ad2   :  { %v2839_v0 = vrot.slane %v2838_v57, 2 }
0x2ad3   :  { %v2805_v58 = vadd.f32 %v2804_v34, %v2803_v63 }
0x2ad4   :  { %v2840_v2 = vadd.f32 %v2839_v0, %v2838_v57 }
0x2ad5   :  { %v2806_v56 = vrot.slane %v2805_v58, 1 }
0x2ad6   :  { %v2841_v16 = vrot.slane %v2840_v2, 1 }
0x2ad7   :  { %v2807_v28 = vadd.f32 %v2806_v56, %v2805_v58 }
0x2ad8   :  { %v2842_v26 = vadd.f32 %v2841_v16, %v2840_v2 }
0x2ad9   :  { %3586 = vrcp.f32 %v2807_v28 }
0x2ada   :  { %3588 = vrcp.f32 %v2842_v26 }
0x2ae6   :  { %v3587_v54 = vpop.eup %3586 }
0x2ae7   :  { %v3589_v19 = vpop.eup %3588  ;;  %v2809_v20 = vmul.f32 %v3587_v54, %v3583_v40 }
0x2ae8   :  { %v2844_v23 = vmul.f32 %v3589_v19, %v3585_v49 }
0x2ae9   :  { %v2810_v9 = vmul.f32 %v4381_v3, %v2809_v20 }
0x2aea   :  { %v2845_v60 = vmul.f32 %v4384_v13, %v2844_v23  ;;  %v2965_v13 = vpop.permute.xlu1 %2964 }
0x2aeb   :  { %v2811_v22 = vsel %vm258_vm8, %v2810_v9, 0.0 }
0x2aec   :  { %v2812_v27 = vrot.slane %v2811_v22, 4  ;;  %v2846_v29 = vsel %vm258_vm8, %v2845_v60, 0.0 }
0x2aed   :  { %v2847_v30 = vrot.slane %v2846_v29, 4 }
0x2aee   :  { %v2813_v61 = vadd.f32 %v2812_v27, %v2811_v22 }
0x2aef   :  { %v2848_v62 = vadd.f32 %v2847_v30, %v2846_v29 }
0x2af0   :  { %v2814_v17 = vrot.slane %v2813_v61, 2 }
0x2af1   :  { %v2849_v10 = vrot.slane %v2848_v62, 2 }
0x2af2   :  { %v2815_v11 = vadd.f32 %v2814_v17, %v2813_v61 }
0x2af3   :  { %v2850_v18 = vadd.f32 %v2849_v10, %v2848_v62 }
0x2af4   :  { %v2816_v14 = vrot.slane %v2815_v11, 1 }
0x2af5   :  { %v2851_v31 = vrot.slane %v2850_v18, 1 }
0x2af6   :  { %v2817_v35 = vadd.f32 %v2816_v14, %v2815_v11 }
0x2af7   :  { %v2852_v42 = vadd.f32 %v2851_v31, %v2850_v18 }
0x2af9   :  { %v2853_v3 = vsel %vm1540_vm7, %v2817_v35, %v2852_v42 }
0x2afa   :  { %3426 = vmatmul.mubr.msk.f32.vlgmr.msra.gmra.mxu1 %vm258_vm8, %v2853_v3 }
0x2b3a   :  { %v1218_v45 = vpop.permute.xlu1 %1217 }
0x2b3b   :  { %1221 = vst.msk [vmem:[#allocation5] sm:$0x3] %vm1220_vm5, %v1218_v45 }
0x2bba   :  { %v2925_v33 = vpop.f32.mrf.mxu1 }
0x2bbb   :  { %v2929_v25 = vadd.f32 %v2925_v33, %v2855_v32 }
0x2bbc   :  { %v3427_v7 = vpop.f32.mrf.mxu1 }
0x2bbd   :  { %v2934_v38 = vadd.f32 %v2932_v36, %v2929_v25 }
0x2bbf   :  { %v3053_v5 = vmul.f32 -1.442695, %v2934_v38 }
0x2bc1   :  { %3590 = vpow2.f32 %v3053_v5 }
0x2bce   :  { %v3591_v39 = vpop.eup %3590 }
0x2bcf   :  { %v2938_v37 = vadd.f32 1.0, %v3591_v39 }
0x2bd1   :  { %3592 = vrcp.f32 %v2938_v37 }
0x2bde   :  { %v3593_v24 = vpop.eup %3592 }
0x2bdf   :  { %v2946_v8 = vmul.f32 %v3593_v24, %v4436_v15 }
0x2be1   :  { %2948 = vrot.lane.b32.xlu0 %v2946_v8, %s3655_s17 }
0x2be5   :  { %2972 = vperm.xlu0 %3437, %v2969_v44  }
0x2c53   :  { %v2949_v55 = vpop.permute.xlu0 %2948 }
0x2c54   :  { %v2951_v46 = vadd.f32 %v2949_v55, %v2929_v25 }
0x2c56   :  { %3594 = vtanh.f32 %v2951_v46 }
0x2c60   :  { %v2973_v48 = vpop.permute.xlu0 %2972 }
0x2c61   :  { %3596 = vrcp.f32 %v2973_v48 }
0x2c63   :  { %v3595_v47 = vpop.eup %3594 }
0x2c64   :  { %2955 = vrot.lane.b32.xlu0 %v3595_v47, %s3659_s8 }
0x2c65   :  { %3622 = shalt.err (!%p3619_p4)
}
0x2c66   :  { %2991 = dma.vmem_to_hbm [thread:$0]  %s2989_s21, 32, %s4483_s15, [#allocation6]   ;;  %v2953_v41 = vsub.f32 1.0, %v3593_v24  ;;  %v2959_v51 = vmul.f32 %v3593_v24, %v4412_v59  ;;  %vm2966_vm8 = vcmp.eq.s32.totalorder %v2965_v13, 1 }
0x2c67   :  { %s3662_s13 = smov [#allocation7]  }
0x2c68   :  { %s2998_s6 = sshll.u32 %s3662_s13, 4  ;;  %s2999_s6 = int_to_ptr.vmem [resolvable:$true] %s2998_s6 }
0x2c69   :  { %s3631_s15 = scalar_lea.vmem %s2999_s6, 32  ;;  %p3636_p6 = scmp.lt.s32.totalorder %s2999_s6, %s2999_s6 }
0x2c6a   :  { %p3632_p5 = scmp.ne.s32.totalorder %s2999_s6, %s3631_s15  ;;  %p3637_p7 = scmp.lt.s32.totalorder %s3631_s15, %s3631_s15 }
0x2c6c   :  { %p3638_p8 = por %p3637_p7, %p3636_p6 }
0x2c6e   :  { %v3597_v52 = vpop.eup %3596  ;;  %p3639_p9 = pnand %p3638_p8, %p3632_p5 }
0x2cd6   :  { %v2956_v15 = vpop.permute.xlu0 %2955 }
0x2cd7   :  { %v2958_v21 = vmul.f32 %v2956_v15, %v2953_v41 }
0x2cd9   :  { %v2960_v6 = vadd.f32 %v2959_v51, %v2958_v21 }
0x2cdb   :  { %v2967_v43 = vsel %vm2966_vm8, 0.0, %v2960_v6 }
0x2cdc   :  { %v2968_v12 = vadd.f32 %v2967_v43, %v4415_v4 }
0x2cde   :  { %v2976_v53 = vmul.f32 %v3597_v52, %v2968_v12 }
0x2ce0   :  { %2978 = vrot.lane.b32.xlu0 %v2976_v53, %s3659_s8 }
0x2d52   :  { %v2979_v40 = vpop.permute.xlu0 %2978 }
0x2d53   :  { %2981 = vst.msk [vmem:[#allocation7] sm:$0x3] %vm1220_vm5, %v2979_v40 }
0x2d54   :  { %3642 = shalt.err (!%p3639_p9)
}
0x2d55   :  { %3001 = dma.vmem_to_hbm [thread:$0]  %s2999_s6, 32, %s4484_s16, [#allocation8]  }
0x2d56   :  { %3651 = dma.done.wait [#allocation6], 32  }
0x2d57   :  { %3652 = vsyncadd [#allocation6], 4294967264 }
0x2d58   :  { %3653 = dma.done.wait [#allocation8], 32  }
0x2d59   :  { %3654 = vsyncadd [#allocation8], 4294967264 }
0x2d5a   :  { %3008 = vsyncpa [#allocation6], 1 }
0x2d5b   :  { %3009 = vsyncpa [#allocation8], 1 }

</bundles_post_ra>
